<compile_context>
chip_gen: v7x
topology: tpu7x:2x2x1
jax: 0.10.0
libtpu: 0.0.40
codegen_flags: <defaults>
</compile_context>

<pallas_src>
import jax
import jax.numpy as jnp
from jax import lax
from jax.experimental import pallas as pl
from jax.experimental.pallas import tpu as pltpu


# ----------------------------- Pallas kernel --------------------------------


def _conv3x3_log_images_kernel(x_ref, w_ref, b_ref, o_ref, xp_ref):
    """Nb images per grid step; NCHW in/out; halo built in-VMEM.

    x_ref : (Nb, C_in, H, W)      f32  VMEM  unpadded input block
    w_ref : (C_out*C_in*9,)       f32  SMEM  folded conv weights (co,ci,kh,kw)
    b_ref : (C_out,)              f32  SMEM  folded bias
    o_ref : (Nb, C_out, H, W)     bf16 VMEM  output block (NCHW, no reshape)
    xp_ref: (Nb, C_in, H+2, W+2)  f32  VMEM  scratch: zero halo + interior copy
    """
    nb, c_in, h, w = x_ref.shape
    c_out = o_ref.shape[1]

    # In-kernel 1-pixel zero halo (replaces the host-side jnp.pad and its
    # extra HBM pass).  Zeroed every step: under megacore "parallel" sharding
    # a core may never execute program_id(0) == 0, so a one-time border init
    # would be unsafe; the memset is pure VMEM traffic and tiny next to the
    # 9 * C_in * C_out FMAs.
    xp_ref[...] = jnp.zeros_like(xp_ref)
    xp_ref[:, :, 1:h + 1, 1:w + 1] = x_ref[...]

    # C_out accumulators live at once (not 9*C_in tap slabs), seeded with the
    # folded bias.  (ci, kh, kw) outer / co inner: one tap slab live per step,
    # each halo slice (and its kw=1,2 lane rotate) issued exactly once.
    accs = [jnp.full((nb, h, w), b_ref[co], jnp.float32) for co in range(c_out)]
    for ci in range(c_in):
        for kh in range(3):
            for kw in range(3):
                tap = xp_ref[:, ci, kh:kh + h, kw:kw + w]       # (Nb, H, W)
                for co in range(c_out):
                    w_s = w_ref[(co * c_in + ci) * 9 + kh * 3 + kw]
                    accs[co] = accs[co] + w_s * tap

    # log_images scale/shift is pre-folded into w_ref/b_ref: epilogue is only
    # the clamp (f32) and the bf16 cast at the store.
    for co in range(c_out):
        o_ref[:, co, :, :] = jnp.clip(accs[co], 0.0, 1.0).astype(o_ref.dtype)


def _pick_batch_tile(n, c_in, c_out, h, w, budget_bytes=1 << 20):
    """Images per grid step: block up to ~budget_bytes, but keep >=2 steps."""
    per_img = (c_in * h * w * 4                       # input block (f32)
               + c_in * (h + 2) * (w + 2) * 4         # halo scratch (f32)
               + c_out * h * w * 2)                   # output block (bf16)
    nb = max(1, min(n, budget_bytes // max(per_img, 1)))
    if n >= 2:
        nb = max(1, min(nb, n // 2))                  # >=2 steps for megacore
    while n % nb:                                     # divisor of n
        nb -= 1
    return nb


def conv3x3_log_images(x, weight, bias, *, out_dtype=jnp.bfloat16):
    """clip((conv3x3_same(x, weight) + bias + 1) * 0.5, 0, 1); NCHW in/out."""
    n, c_in, h, w = x.shape
    c_out = weight.shape[0]

    # Fold the log_images post-processing (y + 1) * 0.5 into the conv params.
    w_folded = (0.5 * weight).reshape(c_out * c_in * 9).astype(jnp.float32)
    b_folded = (0.5 * (bias + 1.0)).astype(jnp.float32)

    nb = _pick_batch_tile(n, c_in, c_out, h, w)

    return pl.pallas_call(
        _conv3x3_log_images_kernel,
        out_shape=jax.ShapeDtypeStruct((n, c_out, h, w), out_dtype),
        grid=(n // nb,),
        in_specs=[
            # Nb unpadded images per grid step (last two dims == full dims).
            pl.BlockSpec((nb, c_in, h, w), lambda i: (i, 0, 0, 0)),
            # Tiny conv parameters stay resident in SMEM (scalar reads).
            pl.BlockSpec(memory_space=pltpu.MemorySpace.SMEM),
            pl.BlockSpec(memory_space=pltpu.MemorySpace.SMEM),
        ],
        out_specs=pl.BlockSpec((nb, c_out, h, w), lambda i: (i, 0, 0, 0)),
        scratch_shapes=[pltpu.VMEM((nb, c_in, h + 2, w + 2), jnp.float32)],
        compiler_params=pltpu.CompilerParams(
            dimension_semantics=("parallel",),
        ),
    )(x.astype(jnp.float32), w_folded, b_folded)


# ------------------------------ model / wrapper ------------------------------


class SyntheticRefSRModel:
    """Stand-in for the checkpointed RefSR model: log_images = conv3x3 head."""

    def __init__(self, c_in, c_out, key):
        k_w, k_b = jax.random.split(key)
        # PyTorch conv weight layout: (C_out, C_in, kh, kw)
        self.weight = (
            jax.random.normal(k_w, (c_out, c_in, 3, 3), jnp.float32) * 0.1
        )
        self.bias = jax.random.normal(k_b, (c_out,), jnp.float32) * 0.1

    def log_images(self, val_data):
        x = val_data["image"]  # NCHW, float32
        samples = conv3x3_log_images(x, self.weight, self.bias)
        return {"samples": samples}


class LogImagesWrapper:
    """Mirrors the PyTorch LogImagesWrapper: forward delegates to log_images."""

    def __init__(self, model):
        self.model = model

    def __call__(self, val_data):
        return self.model.log_images(val_data)


# ----------------------------------- main ------------------------------------


def _reference(x, weight, bias):
    y = lax.conv_general_dilated(
        x, weight, window_strides=(1, 1), padding="SAME",
        dimension_numbers=("NCHW", "OIHW", "NCHW"))
    y = y + bias.reshape(1, -1, 1, 1)
    return jnp.clip((y + 1.0) * 0.5, 0.0, 1.0)


if __name__ == "__main__":
    key = jax.random.PRNGKey(0)
    k_model, k_x = jax.random.split(key)

    N, C_IN, C_OUT, H, W = 2, 4, 4, 16, 16
    x = jax.random.normal(k_x, (N, C_IN, H, W), jnp.float32)

    model = SyntheticRefSRModel(C_IN, C_OUT, k_model)
    wrapper = LogImagesWrapper(model)

    logs = wrapper({"image": x})
    out = jax.block_until_ready(logs["samples"])

    ref = _reference(x, model.weight, model.bias)
    assert out.shape == (N, C_OUT, H, W)
    err = jnp.max(jnp.abs(out.astype(jnp.float32) - ref))
    # Output is bf16 (values in [0, 1]); bf16 quantization error < 4e-3.
    assert err < 1e-2, err

    print("KERNEL_OK")
</pallas_src>

<mosaic_0001>
module attributes {stable_mosaic.version = 11 : i64} {
  func.func @_conv3x3_log_images_kernel(%arg0: i32, %arg1: memref<1x4x16x16xf32, #tpu.memory_space<vmem>>, %arg2: memref<144xf32, #tpu.memory_space<smem>>, %arg3: memref<4xf32, #tpu.memory_space<smem>>, %arg4: memref<1x4x16x16xbf16, #tpu.memory_space<vmem>>, %arg5: memref<1x4x18x18xf32, #tpu.memory_space<vmem>>) attributes {dimension_semantics = [#tpu.dimension_semantics<parallel>], iteration_bounds = array<i64: 2>, scalar_prefetch = 0 : i64, scratch_operands = 1 : i64, tpu.core_type = #tpu.core_type<tc>, window_params = [{transform_indices = @transform_0, window_bounds = array<i64: 1, 4, 16, 16>}, {transform_indices = @transform_1, window_bounds = array<i64: 144>}, {transform_indices = @transform_2, window_bounds = array<i64: 4>}, {transform_indices = @transform_3, window_bounds = array<i64: 1, 4, 16, 16>}]} {
    %cst = arith.constant 0.000000e+00 : f32
    %0 = vector.broadcast %cst : f32 to vector<1x4x18x18xf32>
    %c0 = arith.constant 0 : index
    %c0_0 = arith.constant 0 : index
    %c0_1 = arith.constant 0 : index
    %c0_2 = arith.constant 0 : index
    %1 = vector.load %arg5[%c0, %c0_0, %c0_1, %c0_2] : memref<1x4x18x18xf32, #tpu.memory_space<vmem>>, vector<1x4x18x18xf32>
    tpu.vector_store %arg5[%c0, %c0_0, %c0_1, %c0_2], %0 {strides = array<i32>} : memref<1x4x18x18xf32, #tpu.memory_space<vmem>>, vector<1x4x18x18xf32>,
    %c0_3 = arith.constant 0 : index
    %c0_4 = arith.constant 0 : index
    %c0_5 = arith.constant 0 : index
    %c0_6 = arith.constant 0 : index
    %2 = vector.load %arg1[%c0_3, %c0_4, %c0_5, %c0_6] : memref<1x4x16x16xf32, #tpu.memory_space<vmem>>, vector<1x4x16x16xf32>
    %c0_7 = arith.constant 0 : index
    %c0_8 = arith.constant 0 : index
    %c1 = arith.constant 1 : index
    %c1_9 = arith.constant 1 : index
    %3 = vector.load %arg5[%c0_7, %c0_8, %c1, %c1_9] : memref<1x4x18x18xf32, #tpu.memory_space<vmem>>, vector<1x4x16x16xf32>
    tpu.vector_store %arg5[%c0_7, %c0_8, %c1, %c1_9], %2 {strides = array<i32>} : memref<1x4x18x18xf32, #tpu.memory_space<vmem>>, vector<1x4x16x16xf32>,
    %c0_10 = arith.constant 0 : index
    %4 = memref.load %arg3[%c0_10] : memref<4xf32, #tpu.memory_space<smem>>
    %5 = vector.broadcast %4 : f32 to vector<1x16x16xf32>
    %c1_11 = arith.constant 1 : index
    %6 = memref.load %arg3[%c1_11] : memref<4xf32, #tpu.memory_space<smem>>
    %7 = vector.broadcast %6 : f32 to vector<1x16x16xf32>
    %c2 = arith.constant 2 : index
    %8 = memref.load %arg3[%c2] : memref<4xf32, #tpu.memory_space<smem>>
    %9 = vector.broadcast %8 : f32 to vector<1x16x16xf32>
    %c3 = arith.constant 3 : index
    %10 = memref.load %arg3[%c3] : memref<4xf32, #tpu.memory_space<smem>>
    %11 = vector.broadcast %10 : f32 to vector<1x16x16xf32>
    %c0_12 = arith.constant 0 : index
    %c0_13 = arith.constant 0 : index
    %c0_14 = arith.constant 0 : index
    %c0_15 = arith.constant 0 : index
    %12 = vector.load %arg5[%c0_12, %c0_13, %c0_14, %c0_15] : memref<1x4x18x18xf32, #tpu.memory_space<vmem>>, vector<1x1x16x16xf32>
    %13 = vector.shape_cast %12 : vector<1x1x16x16xf32> to vector<1x16x16xf32>
    %c0_16 = arith.constant 0 : index
    %14 = memref.load %arg2[%c0_16] : memref<144xf32, #tpu.memory_space<smem>>
    %15 = vector.broadcast %14 : f32 to vector<1x16x16xf32>
    %16 = arith.mulf %15, %13 : vector<1x16x16xf32>
    %17 = arith.addf %5, %16 : vector<1x16x16xf32>
    %c36 = arith.constant 36 : index
    %18 = memref.load %arg2[%c36] : memref<144xf32, #tpu.memory_space<smem>>
    %19 = vector.broadcast %18 : f32 to vector<1x16x16xf32>
    %20 = arith.mulf %19, %13 : vector<1x16x16xf32>
    %21 = arith.addf %7, %20 : vector<1x16x16xf32>
    %c72 = arith.constant 72 : index
    %22 = memref.load %arg2[%c72] : memref<144xf32, #tpu.memory_space<smem>>
    %23 = vector.broadcast %22 : f32 to vector<1x16x16xf32>
    %24 = arith.mulf %23, %13 : vector<1x16x16xf32>
    %25 = arith.addf %9, %24 : vector<1x16x16xf32>
    %c108 = arith.constant 108 : index
    %26 = memref.load %arg2[%c108] : memref<144xf32, #tpu.memory_space<smem>>
    %27 = vector.broadcast %26 : f32 to vector<1x16x16xf32>
    %28 = arith.mulf %27, %13 : vector<1x16x16xf32>
    %29 = arith.addf %11, %28 : vector<1x16x16xf32>
    %c0_17 = arith.constant 0 : index
    %c0_18 = arith.constant 0 : index
    %c0_19 = arith.constant 0 : index
    %c1_20 = arith.constant 1 : index
    %30 = vector.load %arg5[%c0_17, %c0_18, %c0_19, %c1_20] : memref<1x4x18x18xf32, #tpu.memory_space<vmem>>, vector<1x1x16x16xf32>
    %31 = vector.shape_cast %30 : vector<1x1x16x16xf32> to vector<1x16x16xf32>
    %c1_21 = arith.constant 1 : index
    %32 = memref.load %arg2[%c1_21] : memref<144xf32, #tpu.memory_space<smem>>
    %33 = vector.broadcast %32 : f32 to vector<1x16x16xf32>
    %34 = arith.mulf %33, %31 : vector<1x16x16xf32>
    %35 = arith.addf %17, %34 : vector<1x16x16xf32>
    %c37 = arith.constant 37 : index
    %36 = memref.load %arg2[%c37] : memref<144xf32, #tpu.memory_space<smem>>
    %37 = vector.broadcast %36 : f32 to vector<1x16x16xf32>
    %38 = arith.mulf %37, %31 : vector<1x16x16xf32>
    %39 = arith.addf %21, %38 : vector<1x16x16xf32>
    %c73 = arith.constant 73 : index
    %40 = memref.load %arg2[%c73] : memref<144xf32, #tpu.memory_space<smem>>
    %41 = vector.broadcast %40 : f32 to vector<1x16x16xf32>
    %42 = arith.mulf %41, %31 : vector<1x16x16xf32>
    %43 = arith.addf %25, %42 : vector<1x16x16xf32>
    %c109 = arith.constant 109 : index
    %44 = memref.load %arg2[%c109] : memref<144xf32, #tpu.memory_space<smem>>
    %45 = vector.broadcast %44 : f32 to vector<1x16x16xf32>
    %46 = arith.mulf %45, %31 : vector<1x16x16xf32>
    %47 = arith.addf %29, %46 : vector<1x16x16xf32>
    %c0_22 = arith.constant 0 : index
    %c0_23 = arith.constant 0 : index
    %c0_24 = arith.constant 0 : index
    %c2_25 = arith.constant 2 : index
    %48 = vector.load %arg5[%c0_22, %c0_23, %c0_24, %c2_25] : memref<1x4x18x18xf32, #tpu.memory_space<vmem>>, vector<1x1x16x16xf32>
    %49 = vector.shape_cast %48 : vector<1x1x16x16xf32> to vector<1x16x16xf32>
    %c2_26 = arith.constant 2 : index
    %50 = memref.load %arg2[%c2_26] : memref<144xf32, #tpu.memory_space<smem>>
    %51 = vector.broadcast %50 : f32 to vector<1x16x16xf32>
    %52 = arith.mulf %51, %49 : vector<1x16x16xf32>
    %53 = arith.addf %35, %52 : vector<1x16x16xf32>
    %c38 = arith.constant 38 : index
    %54 = memref.load %arg2[%c38] : memref<144xf32, #tpu.memory_space<smem>>
    %55 = vector.broadcast %54 : f32 to vector<1x16x16xf32>
    %56 = arith.mulf %55, %49 : vector<1x16x16xf32>
    %57 = arith.addf %39, %56 : vector<1x16x16xf32>
    %c74 = arith.constant 74 : index
    %58 = memref.load %arg2[%c74] : memref<144xf32, #tpu.memory_space<smem>>
    %59 = vector.broadcast %58 : f32 to vector<1x16x16xf32>
    %60 = arith.mulf %59, %49 : vector<1x16x16xf32>
    %61 = arith.addf %43, %60 : vector<1x16x16xf32>
    %c110 = arith.constant 110 : index
    %62 = memref.load %arg2[%c110] : memref<144xf32, #tpu.memory_space<smem>>
    %63 = vector.broadcast %62 : f32 to vector<1x16x16xf32>
    %64 = arith.mulf %63, %49 : vector<1x16x16xf32>
    %65 = arith.addf %47, %64 : vector<1x16x16xf32>
    %c0_27 = arith.constant 0 : index
    %c0_28 = arith.constant 0 : index
    %c1_29 = arith.constant 1 : index
    %c0_30 = arith.constant 0 : index
    %66 = vector.load %arg5[%c0_27, %c0_28, %c1_29, %c0_30] : memref<1x4x18x18xf32, #tpu.memory_space<vmem>>, vector<1x1x16x16xf32>
    %67 = vector.shape_cast %66 : vector<1x1x16x16xf32> to vector<1x16x16xf32>
    %c3_31 = arith.constant 3 : index
    %68 = memref.load %arg2[%c3_31] : memref<144xf32, #tpu.memory_space<smem>>
    %69 = vector.broadcast %68 : f32 to vector<1x16x16xf32>
    %70 = arith.mulf %69, %67 : vector<1x16x16xf32>
    %71 = arith.addf %53, %70 : vector<1x16x16xf32>
    %c39 = arith.constant 39 : index
    %72 = memref.load %arg2[%c39] : memref<144xf32, #tpu.memory_space<smem>>
    %73 = vector.broadcast %72 : f32 to vector<1x16x16xf32>
    %74 = arith.mulf %73, %67 : vector<1x16x16xf32>
    %75 = arith.addf %57, %74 : vector<1x16x16xf32>
    %c75 = arith.constant 75 : index
    %76 = memref.load %arg2[%c75] : memref<144xf32, #tpu.memory_space<smem>>
    %77 = vector.broadcast %76 : f32 to vector<1x16x16xf32>
    %78 = arith.mulf %77, %67 : vector<1x16x16xf32>
    %79 = arith.addf %61, %78 : vector<1x16x16xf32>
    %c111 = arith.constant 111 : index
    %80 = memref.load %arg2[%c111] : memref<144xf32, #tpu.memory_space<smem>>
    %81 = vector.broadcast %80 : f32 to vector<1x16x16xf32>
    %82 = arith.mulf %81, %67 : vector<1x16x16xf32>
    %83 = arith.addf %65, %82 : vector<1x16x16xf32>
    %c0_32 = arith.constant 0 : index
    %c0_33 = arith.constant 0 : index
    %c1_34 = arith.constant 1 : index
    %c1_35 = arith.constant 1 : index
    %84 = vector.load %arg5[%c0_32, %c0_33, %c1_34, %c1_35] : memref<1x4x18x18xf32, #tpu.memory_space<vmem>>, vector<1x1x16x16xf32>
    %85 = vector.shape_cast %84 : vector<1x1x16x16xf32> to vector<1x16x16xf32>
    %c4 = arith.constant 4 : index
    %86 = memref.load %arg2[%c4] : memref<144xf32, #tpu.memory_space<smem>>
    %87 = vector.broadcast %86 : f32 to vector<1x16x16xf32>
    %88 = arith.mulf %87, %85 : vector<1x16x16xf32>
    %89 = arith.addf %71, %88 : vector<1x16x16xf32>
    %c40 = arith.constant 40 : index
    %90 = memref.load %arg2[%c40] : memref<144xf32, #tpu.memory_space<smem>>
    %91 = vector.broadcast %90 : f32 to vector<1x16x16xf32>
    %92 = arith.mulf %91, %85 : vector<1x16x16xf32>
    %93 = arith.addf %75, %92 : vector<1x16x16xf32>
    %c76 = arith.constant 76 : index
    %94 = memref.load %arg2[%c76] : memref<144xf32, #tpu.memory_space<smem>>
    %95 = vector.broadcast %94 : f32 to vector<1x16x16xf32>
    %96 = arith.mulf %95, %85 : vector<1x16x16xf32>
    %97 = arith.addf %79, %96 : vector<1x16x16xf32>
    %c112 = arith.constant 112 : index
    %98 = memref.load %arg2[%c112] : memref<144xf32, #tpu.memory_space<smem>>
    %99 = vector.broadcast %98 : f32 to vector<1x16x16xf32>
    %100 = arith.mulf %99, %85 : vector<1x16x16xf32>
    %101 = arith.addf %83, %100 : vector<1x16x16xf32>
    %c0_36 = arith.constant 0 : index
    %c0_37 = arith.constant 0 : index
    %c1_38 = arith.constant 1 : index
    %c2_39 = arith.constant 2 : index
    %102 = vector.load %arg5[%c0_36, %c0_37, %c1_38, %c2_39] : memref<1x4x18x18xf32, #tpu.memory_space<vmem>>, vector<1x1x16x16xf32>
    %103 = vector.shape_cast %102 : vector<1x1x16x16xf32> to vector<1x16x16xf32>
    %c5 = arith.constant 5 : index
    %104 = memref.load %arg2[%c5] : memref<144xf32, #tpu.memory_space<smem>>
    %105 = vector.broadcast %104 : f32 to vector<1x16x16xf32>
    %106 = arith.mulf %105, %103 : vector<1x16x16xf32>
    %107 = arith.addf %89, %106 : vector<1x16x16xf32>
    %c41 = arith.constant 41 : index
    %108 = memref.load %arg2[%c41] : memref<144xf32, #tpu.memory_space<smem>>
    %109 = vector.broadcast %108 : f32 to vector<1x16x16xf32>
    %110 = arith.mulf %109, %103 : vector<1x16x16xf32>
    %111 = arith.addf %93, %110 : vector<1x16x16xf32>
    %c77 = arith.constant 77 : index
    %112 = memref.load %arg2[%c77] : memref<144xf32, #tpu.memory_space<smem>>
    %113 = vector.broadcast %112 : f32 to vector<1x16x16xf32>
    %114 = arith.mulf %113, %103 : vector<1x16x16xf32>
    %115 = arith.addf %97, %114 : vector<1x16x16xf32>
    %c113 = arith.constant 113 : index
    %116 = memref.load %arg2[%c113] : memref<144xf32, #tpu.memory_space<smem>>
    %117 = vector.broadcast %116 : f32 to vector<1x16x16xf32>
    %118 = arith.mulf %117, %103 : vector<1x16x16xf32>
    %119 = arith.addf %101, %118 : vector<1x16x16xf32>
    %c0_40 = arith.constant 0 : index
    %c0_41 = arith.constant 0 : index
    %c2_42 = arith.constant 2 : index
    %c0_43 = arith.constant 0 : index
    %120 = vector.load %arg5[%c0_40, %c0_41, %c2_42, %c0_43] : memref<1x4x18x18xf32, #tpu.memory_space<vmem>>, vector<1x1x16x16xf32>
    %121 = vector.shape_cast %120 : vector<1x1x16x16xf32> to vector<1x16x16xf32>
    %c6 = arith.constant 6 : index
    %122 = memref.load %arg2[%c6] : memref<144xf32, #tpu.memory_space<smem>>
    %123 = vector.broadcast %122 : f32 to vector<1x16x16xf32>
    %124 = arith.mulf %123, %121 : vector<1x16x16xf32>
    %125 = arith.addf %107, %124 : vector<1x16x16xf32>
    %c42 = arith.constant 42 : index
    %126 = memref.load %arg2[%c42] : memref<144xf32, #tpu.memory_space<smem>>
    %127 = vector.broadcast %126 : f32 to vector<1x16x16xf32>
    %128 = arith.mulf %127, %121 : vector<1x16x16xf32>
    %129 = arith.addf %111, %128 : vector<1x16x16xf32>
    %c78 = arith.constant 78 : index
    %130 = memref.load %arg2[%c78] : memref<144xf32, #tpu.memory_space<smem>>
    %131 = vector.broadcast %130 : f32 to vector<1x16x16xf32>
    %132 = arith.mulf %131, %121 : vector<1x16x16xf32>
    %133 = arith.addf %115, %132 : vector<1x16x16xf32>
    %c114 = arith.constant 114 : index
    %134 = memref.load %arg2[%c114] : memref<144xf32, #tpu.memory_space<smem>>
    %135 = vector.broadcast %134 : f32 to vector<1x16x16xf32>
    %136 = arith.mulf %135, %121 : vector<1x16x16xf32>
    %137 = arith.addf %119, %136 : vector<1x16x16xf32>
    %c0_44 = arith.constant 0 : index
    %c0_45 = arith.constant 0 : index
    %c2_46 = arith.constant 2 : index
    %c1_47 = arith.constant 1 : index
    %138 = vector.load %arg5[%c0_44, %c0_45, %c2_46, %c1_47] : memref<1x4x18x18xf32, #tpu.memory_space<vmem>>, vector<1x1x16x16xf32>
    %139 = vector.shape_cast %138 : vector<1x1x16x16xf32> to vector<1x16x16xf32>
    %c7 = arith.constant 7 : index
    %140 = memref.load %arg2[%c7] : memref<144xf32, #tpu.memory_space<smem>>
    %141 = vector.broadcast %140 : f32 to vector<1x16x16xf32>
    %142 = arith.mulf %141, %139 : vector<1x16x16xf32>
    %143 = arith.addf %125, %142 : vector<1x16x16xf32>
    %c43 = arith.constant 43 : index
    %144 = memref.load %arg2[%c43] : memref<144xf32, #tpu.memory_space<smem>>
    %145 = vector.broadcast %144 : f32 to vector<1x16x16xf32>
    %146 = arith.mulf %145, %139 : vector<1x16x16xf32>
    %147 = arith.addf %129, %146 : vector<1x16x16xf32>
    %c79 = arith.constant 79 : index
    %148 = memref.load %arg2[%c79] : memref<144xf32, #tpu.memory_space<smem>>
    %149 = vector.broadcast %148 : f32 to vector<1x16x16xf32>
    %150 = arith.mulf %149, %139 : vector<1x16x16xf32>
    %151 = arith.addf %133, %150 : vector<1x16x16xf32>
    %c115 = arith.constant 115 : index
    %152 = memref.load %arg2[%c115] : memref<144xf32, #tpu.memory_space<smem>>
    %153 = vector.broadcast %152 : f32 to vector<1x16x16xf32>
    %154 = arith.mulf %153, %139 : vector<1x16x16xf32>
    %155 = arith.addf %137, %154 : vector<1x16x16xf32>
    %c0_48 = arith.constant 0 : index
    %c0_49 = arith.constant 0 : index
    %c2_50 = arith.constant 2 : index
    %c2_51 = arith.constant 2 : index
    %156 = vector.load %arg5[%c0_48, %c0_49, %c2_50, %c2_51] : memref<1x4x18x18xf32, #tpu.memory_space<vmem>>, vector<1x1x16x16xf32>
    %157 = vector.shape_cast %156 : vector<1x1x16x16xf32> to vector<1x16x16xf32>
    %c8 = arith.constant 8 : index
    %158 = memref.load %arg2[%c8] : memref<144xf32, #tpu.memory_space<smem>>
    %159 = vector.broadcast %158 : f32 to vector<1x16x16xf32>
    %160 = arith.mulf %159, %157 : vector<1x16x16xf32>
    %161 = arith.addf %143, %160 : vector<1x16x16xf32>
    %c44 = arith.constant 44 : index
    %162 = memref.load %arg2[%c44] : memref<144xf32, #tpu.memory_space<smem>>
    %163 = vector.broadcast %162 : f32 to vector<1x16x16xf32>
    %164 = arith.mulf %163, %157 : vector<1x16x16xf32>
    %165 = arith.addf %147, %164 : vector<1x16x16xf32>
    %c80 = arith.constant 80 : index
    %166 = memref.load %arg2[%c80] : memref<144xf32, #tpu.memory_space<smem>>
    %167 = vector.broadcast %166 : f32 to vector<1x16x16xf32>
    %168 = arith.mulf %167, %157 : vector<1x16x16xf32>
    %169 = arith.addf %151, %168 : vector<1x16x16xf32>
    %c116 = arith.constant 116 : index
    %170 = memref.load %arg2[%c116] : memref<144xf32, #tpu.memory_space<smem>>
    %171 = vector.broadcast %170 : f32 to vector<1x16x16xf32>
    %172 = arith.mulf %171, %157 : vector<1x16x16xf32>
    %173 = arith.addf %155, %172 : vector<1x16x16xf32>
    %c0_52 = arith.constant 0 : index
    %c1_53 = arith.constant 1 : index
    %c0_54 = arith.constant 0 : index
    %c0_55 = arith.constant 0 : index
    %174 = vector.load %arg5[%c0_52, %c1_53, %c0_54, %c0_55] : memref<1x4x18x18xf32, #tpu.memory_space<vmem>>, vector<1x1x16x16xf32>
    %175 = vector.shape_cast %174 : vector<1x1x16x16xf32> to vector<1x16x16xf32>
    %c9 = arith.constant 9 : index
    %176 = memref.load %arg2[%c9] : memref<144xf32, #tpu.memory_space<smem>>
    %177 = vector.broadcast %176 : f32 to vector<1x16x16xf32>
    %178 = arith.mulf %177, %175 : vector<1x16x16xf32>
    %179 = arith.addf %161, %178 : vector<1x16x16xf32>
    %c45 = arith.constant 45 : index
    %180 = memref.load %arg2[%c45] : memref<144xf32, #tpu.memory_space<smem>>
    %181 = vector.broadcast %180 : f32 to vector<1x16x16xf32>
    %182 = arith.mulf %181, %175 : vector<1x16x16xf32>
    %183 = arith.addf %165, %182 : vector<1x16x16xf32>
    %c81 = arith.constant 81 : index
    %184 = memref.load %arg2[%c81] : memref<144xf32, #tpu.memory_space<smem>>
    %185 = vector.broadcast %184 : f32 to vector<1x16x16xf32>
    %186 = arith.mulf %185, %175 : vector<1x16x16xf32>
    %187 = arith.addf %169, %186 : vector<1x16x16xf32>
    %c117 = arith.constant 117 : index
    %188 = memref.load %arg2[%c117] : memref<144xf32, #tpu.memory_space<smem>>
    %189 = vector.broadcast %188 : f32 to vector<1x16x16xf32>
    %190 = arith.mulf %189, %175 : vector<1x16x16xf32>
    %191 = arith.addf %173, %190 : vector<1x16x16xf32>
    %c0_56 = arith.constant 0 : index
    %c1_57 = arith.constant 1 : index
    %c0_58 = arith.constant 0 : index
    %c1_59 = arith.constant 1 : index
    %192 = vector.load %arg5[%c0_56, %c1_57, %c0_58, %c1_59] : memref<1x4x18x18xf32, #tpu.memory_space<vmem>>, vector<1x1x16x16xf32>
    %193 = vector.shape_cast %192 : vector<1x1x16x16xf32> to vector<1x16x16xf32>
    %c10 = arith.constant 10 : index
    %194 = memref.load %arg2[%c10] : memref<144xf32, #tpu.memory_space<smem>>
    %195 = vector.broadcast %194 : f32 to vector<1x16x16xf32>
    %196 = arith.mulf %195, %193 : vector<1x16x16xf32>
    %197 = arith.addf %179, %196 : vector<1x16x16xf32>
    %c46 = arith.constant 46 : index
    %198 = memref.load %arg2[%c46] : memref<144xf32, #tpu.memory_space<smem>>
    %199 = vector.broadcast %198 : f32 to vector<1x16x16xf32>
    %200 = arith.mulf %199, %193 : vector<1x16x16xf32>
    %201 = arith.addf %183, %200 : vector<1x16x16xf32>
    %c82 = arith.constant 82 : index
    %202 = memref.load %arg2[%c82] : memref<144xf32, #tpu.memory_space<smem>>
    %203 = vector.broadcast %202 : f32 to vector<1x16x16xf32>
    %204 = arith.mulf %203, %193 : vector<1x16x16xf32>
    %205 = arith.addf %187, %204 : vector<1x16x16xf32>
    %c118 = arith.constant 118 : index
    %206 = memref.load %arg2[%c118] : memref<144xf32, #tpu.memory_space<smem>>
    %207 = vector.broadcast %206 : f32 to vector<1x16x16xf32>
    %208 = arith.mulf %207, %193 : vector<1x16x16xf32>
    %209 = arith.addf %191, %208 : vector<1x16x16xf32>
    %c0_60 = arith.constant 0 : index
    %c1_61 = arith.constant 1 : index
    %c0_62 = arith.constant 0 : index
    %c2_63 = arith.constant 2 : index
    %210 = vector.load %arg5[%c0_60, %c1_61, %c0_62, %c2_63] : memref<1x4x18x18xf32, #tpu.memory_space<vmem>>, vector<1x1x16x16xf32>
    %211 = vector.shape_cast %210 : vector<1x1x16x16xf32> to vector<1x16x16xf32>
    %c11 = arith.constant 11 : index
    %212 = memref.load %arg2[%c11] : memref<144xf32, #tpu.memory_space<smem>>
    %213 = vector.broadcast %212 : f32 to vector<1x16x16xf32>
    %214 = arith.mulf %213, %211 : vector<1x16x16xf32>
    %215 = arith.addf %197, %214 : vector<1x16x16xf32>
    %c47 = arith.constant 47 : index
    %216 = memref.load %arg2[%c47] : memref<144xf32, #tpu.memory_space<smem>>
    %217 = vector.broadcast %216 : f32 to vector<1x16x16xf32>
    %218 = arith.mulf %217, %211 : vector<1x16x16xf32>
    %219 = arith.addf %201, %218 : vector<1x16x16xf32>
    %c83 = arith.constant 83 : index
    %220 = memref.load %arg2[%c83] : memref<144xf32, #tpu.memory_space<smem>>
    %221 = vector.broadcast %220 : f32 to vector<1x16x16xf32>
    %222 = arith.mulf %221, %211 : vector<1x16x16xf32>
    %223 = arith.addf %205, %222 : vector<1x16x16xf32>
    %c119 = arith.constant 119 : index
    %224 = memref.load %arg2[%c119] : memref<144xf32, #tpu.memory_space<smem>>
    %225 = vector.broadcast %224 : f32 to vector<1x16x16xf32>
    %226 = arith.mulf %225, %211 : vector<1x16x16xf32>
    %227 = arith.addf %209, %226 : vector<1x16x16xf32>
    %c0_64 = arith.constant 0 : index
    %c1_65 = arith.constant 1 : index
    %c1_66 = arith.constant 1 : index
    %c0_67 = arith.constant 0 : index
    %228 = vector.load %arg5[%c0_64, %c1_65, %c1_66, %c0_67] : memref<1x4x18x18xf32, #tpu.memory_space<vmem>>, vector<1x1x16x16xf32>
    %229 = vector.shape_cast %228 : vector<1x1x16x16xf32> to vector<1x16x16xf32>
    %c12 = arith.constant 12 : index
    %230 = memref.load %arg2[%c12] : memref<144xf32, #tpu.memory_space<smem>>
    %231 = vector.broadcast %230 : f32 to vector<1x16x16xf32>
    %232 = arith.mulf %231, %229 : vector<1x16x16xf32>
    %233 = arith.addf %215, %232 : vector<1x16x16xf32>
    %c48 = arith.constant 48 : index
    %234 = memref.load %arg2[%c48] : memref<144xf32, #tpu.memory_space<smem>>
    %235 = vector.broadcast %234 : f32 to vector<1x16x16xf32>
    %236 = arith.mulf %235, %229 : vector<1x16x16xf32>
    %237 = arith.addf %219, %236 : vector<1x16x16xf32>
    %c84 = arith.constant 84 : index
    %238 = memref.load %arg2[%c84] : memref<144xf32, #tpu.memory_space<smem>>
    %239 = vector.broadcast %238 : f32 to vector<1x16x16xf32>
    %240 = arith.mulf %239, %229 : vector<1x16x16xf32>
    %241 = arith.addf %223, %240 : vector<1x16x16xf32>
    %c120 = arith.constant 120 : index
    %242 = memref.load %arg2[%c120] : memref<144xf32, #tpu.memory_space<smem>>
    %243 = vector.broadcast %242 : f32 to vector<1x16x16xf32>
    %244 = arith.mulf %243, %229 : vector<1x16x16xf32>
    %245 = arith.addf %227, %244 : vector<1x16x16xf32>
    %c0_68 = arith.constant 0 : index
    %c1_69 = arith.constant 1 : index
    %c1_70 = arith.constant 1 : index
    %c1_71 = arith.constant 1 : index
    %246 = vector.load %arg5[%c0_68, %c1_69, %c1_70, %c1_71] : memref<1x4x18x18xf32, #tpu.memory_space<vmem>>, vector<1x1x16x16xf32>
    %247 = vector.shape_cast %246 : vector<1x1x16x16xf32> to vector<1x16x16xf32>
    %c13 = arith.constant 13 : index
    %248 = memref.load %arg2[%c13] : memref<144xf32, #tpu.memory_space<smem>>
    %249 = vector.broadcast %248 : f32 to vector<1x16x16xf32>
    %250 = arith.mulf %249, %247 : vector<1x16x16xf32>
    %251 = arith.addf %233, %250 : vector<1x16x16xf32>
    %c49 = arith.constant 49 : index
    %252 = memref.load %arg2[%c49] : memref<144xf32, #tpu.memory_space<smem>>
    %253 = vector.broadcast %252 : f32 to vector<1x16x16xf32>
    %254 = arith.mulf %253, %247 : vector<1x16x16xf32>
    %255 = arith.addf %237, %254 : vector<1x16x16xf32>
    %c85 = arith.constant 85 : index
    %256 = memref.load %arg2[%c85] : memref<144xf32, #tpu.memory_space<smem>>
    %257 = vector.broadcast %256 : f32 to vector<1x16x16xf32>
    %258 = arith.mulf %257, %247 : vector<1x16x16xf32>
    %259 = arith.addf %241, %258 : vector<1x16x16xf32>
    %c121 = arith.constant 121 : index
    %260 = memref.load %arg2[%c121] : memref<144xf32, #tpu.memory_space<smem>>
    %261 = vector.broadcast %260 : f32 to vector<1x16x16xf32>
    %262 = arith.mulf %261, %247 : vector<1x16x16xf32>
    %263 = arith.addf %245, %262 : vector<1x16x16xf32>
    %c0_72 = arith.constant 0 : index
    %c1_73 = arith.constant 1 : index
    %c1_74 = arith.constant 1 : index
    %c2_75 = arith.constant 2 : index
    %264 = vector.load %arg5[%c0_72, %c1_73, %c1_74, %c2_75] : memref<1x4x18x18xf32, #tpu.memory_space<vmem>>, vector<1x1x16x16xf32>
    %265 = vector.shape_cast %264 : vector<1x1x16x16xf32> to vector<1x16x16xf32>
    %c14 = arith.constant 14 : index
    %266 = memref.load %arg2[%c14] : memref<144xf32, #tpu.memory_space<smem>>
    %267 = vector.broadcast %266 : f32 to vector<1x16x16xf32>
    %268 = arith.mulf %267, %265 : vector<1x16x16xf32>
    %269 = arith.addf %251, %268 : vector<1x16x16xf32>
    %c50 = arith.constant 50 : index
    %270 = memref.load %arg2[%c50] : memref<144xf32, #tpu.memory_space<smem>>
    %271 = vector.broadcast %270 : f32 to vector<1x16x16xf32>
    %272 = arith.mulf %271, %265 : vector<1x16x16xf32>
    %273 = arith.addf %255, %272 : vector<1x16x16xf32>
    %c86 = arith.constant 86 : index
    %274 = memref.load %arg2[%c86] : memref<144xf32, #tpu.memory_space<smem>>
    %275 = vector.broadcast %274 : f32 to vector<1x16x16xf32>
    %276 = arith.mulf %275, %265 : vector<1x16x16xf32>
    %277 = arith.addf %259, %276 : vector<1x16x16xf32>
    %c122 = arith.constant 122 : index
    %278 = memref.load %arg2[%c122] : memref<144xf32, #tpu.memory_space<smem>>
    %279 = vector.broadcast %278 : f32 to vector<1x16x16xf32>
    %280 = arith.mulf %279, %265 : vector<1x16x16xf32>
    %281 = arith.addf %263, %280 : vector<1x16x16xf32>
    %c0_76 = arith.constant 0 : index
    %c1_77 = arith.constant 1 : index
    %c2_78 = arith.constant 2 : index
    %c0_79 = arith.constant 0 : index
    %282 = vector.load %arg5[%c0_76, %c1_77, %c2_78, %c0_79] : memref<1x4x18x18xf32, #tpu.memory_space<vmem>>, vector<1x1x16x16xf32>
    %283 = vector.shape_cast %282 : vector<1x1x16x16xf32> to vector<1x16x16xf32>
    %c15 = arith.constant 15 : index
    %284 = memref.load %arg2[%c15] : memref<144xf32, #tpu.memory_space<smem>>
    %285 = vector.broadcast %284 : f32 to vector<1x16x16xf32>
    %286 = arith.mulf %285, %283 : vector<1x16x16xf32>
    %287 = arith.addf %269, %286 : vector<1x16x16xf32>
    %c51 = arith.constant 51 : index
    %288 = memref.load %arg2[%c51] : memref<144xf32, #tpu.memory_space<smem>>
    %289 = vector.broadcast %288 : f32 to vector<1x16x16xf32>
    %290 = arith.mulf %289, %283 : vector<1x16x16xf32>
    %291 = arith.addf %273, %290 : vector<1x16x16xf32>
    %c87 = arith.constant 87 : index
    %292 = memref.load %arg2[%c87] : memref<144xf32, #tpu.memory_space<smem>>
    %293 = vector.broadcast %292 : f32 to vector<1x16x16xf32>
    %294 = arith.mulf %293, %283 : vector<1x16x16xf32>
    %295 = arith.addf %277, %294 : vector<1x16x16xf32>
    %c123 = arith.constant 123 : index
    %296 = memref.load %arg2[%c123] : memref<144xf32, #tpu.memory_space<smem>>
    %297 = vector.broadcast %296 : f32 to vector<1x16x16xf32>
    %298 = arith.mulf %297, %283 : vector<1x16x16xf32>
    %299 = arith.addf %281, %298 : vector<1x16x16xf32>
    %c0_80 = arith.constant 0 : index
    %c1_81 = arith.constant 1 : index
    %c2_82 = arith.constant 2 : index
    %c1_83 = arith.constant 1 : index
    %300 = vector.load %arg5[%c0_80, %c1_81, %c2_82, %c1_83] : memref<1x4x18x18xf32, #tpu.memory_space<vmem>>, vector<1x1x16x16xf32>
    %301 = vector.shape_cast %300 : vector<1x1x16x16xf32> to vector<1x16x16xf32>
    %c16 = arith.constant 16 : index
    %302 = memref.load %arg2[%c16] : memref<144xf32, #tpu.memory_space<smem>>
    %303 = vector.broadcast %302 : f32 to vector<1x16x16xf32>
    %304 = arith.mulf %303, %301 : vector<1x16x16xf32>
    %305 = arith.addf %287, %304 : vector<1x16x16xf32>
    %c52 = arith.constant 52 : index
    %306 = memref.load %arg2[%c52] : memref<144xf32, #tpu.memory_space<smem>>
    %307 = vector.broadcast %306 : f32 to vector<1x16x16xf32>
    %308 = arith.mulf %307, %301 : vector<1x16x16xf32>
    %309 = arith.addf %291, %308 : vector<1x16x16xf32>
    %c88 = arith.constant 88 : index
    %310 = memref.load %arg2[%c88] : memref<144xf32, #tpu.memory_space<smem>>
    %311 = vector.broadcast %310 : f32 to vector<1x16x16xf32>
    %312 = arith.mulf %311, %301 : vector<1x16x16xf32>
    %313 = arith.addf %295, %312 : vector<1x16x16xf32>
    %c124 = arith.constant 124 : index
    %314 = memref.load %arg2[%c124] : memref<144xf32, #tpu.memory_space<smem>>
    %315 = vector.broadcast %314 : f32 to vector<1x16x16xf32>
    %316 = arith.mulf %315, %301 : vector<1x16x16xf32>
    %317 = arith.addf %299, %316 : vector<1x16x16xf32>
    %c0_84 = arith.constant 0 : index
    %c1_85 = arith.constant 1 : index
    %c2_86 = arith.constant 2 : index
    %c2_87 = arith.constant 2 : index
    %318 = vector.load %arg5[%c0_84, %c1_85, %c2_86, %c2_87] : memref<1x4x18x18xf32, #tpu.memory_space<vmem>>, vector<1x1x16x16xf32>
    %319 = vector.shape_cast %318 : vector<1x1x16x16xf32> to vector<1x16x16xf32>
    %c17 = arith.constant 17 : index
    %320 = memref.load %arg2[%c17] : memref<144xf32, #tpu.memory_space<smem>>
    %321 = vector.broadcast %320 : f32 to vector<1x16x16xf32>
    %322 = arith.mulf %321, %319 : vector<1x16x16xf32>
    %323 = arith.addf %305, %322 : vector<1x16x16xf32>
    %c53 = arith.constant 53 : index
    %324 = memref.load %arg2[%c53] : memref<144xf32, #tpu.memory_space<smem>>
    %325 = vector.broadcast %324 : f32 to vector<1x16x16xf32>
    %326 = arith.mulf %325, %319 : vector<1x16x16xf32>
    %327 = arith.addf %309, %326 : vector<1x16x16xf32>
    %c89 = arith.constant 89 : index
    %328 = memref.load %arg2[%c89] : memref<144xf32, #tpu.memory_space<smem>>
    %329 = vector.broadcast %328 : f32 to vector<1x16x16xf32>
    %330 = arith.mulf %329, %319 : vector<1x16x16xf32>
    %331 = arith.addf %313, %330 : vector<1x16x16xf32>
    %c125 = arith.constant 125 : index
    %332 = memref.load %arg2[%c125] : memref<144xf32, #tpu.memory_space<smem>>
    %333 = vector.broadcast %332 : f32 to vector<1x16x16xf32>
    %334 = arith.mulf %333, %319 : vector<1x16x16xf32>
    %335 = arith.addf %317, %334 : vector<1x16x16xf32>
    %c0_88 = arith.constant 0 : index
    %c2_89 = arith.constant 2 : index
    %c0_90 = arith.constant 0 : index
    %c0_91 = arith.constant 0 : index
    %336 = vector.load %arg5[%c0_88, %c2_89, %c0_90, %c0_91] : memref<1x4x18x18xf32, #tpu.memory_space<vmem>>, vector<1x1x16x16xf32>
    %337 = vector.shape_cast %336 : vector<1x1x16x16xf32> to vector<1x16x16xf32>
    %c18 = arith.constant 18 : index
    %338 = memref.load %arg2[%c18] : memref<144xf32, #tpu.memory_space<smem>>
    %339 = vector.broadcast %338 : f32 to vector<1x16x16xf32>
    %340 = arith.mulf %339, %337 : vector<1x16x16xf32>
    %341 = arith.addf %323, %340 : vector<1x16x16xf32>
    %c54 = arith.constant 54 : index
    %342 = memref.load %arg2[%c54] : memref<144xf32, #tpu.memory_space<smem>>
    %343 = vector.broadcast %342 : f32 to vector<1x16x16xf32>
    %344 = arith.mulf %343, %337 : vector<1x16x16xf32>
    %345 = arith.addf %327, %344 : vector<1x16x16xf32>
    %c90 = arith.constant 90 : index
    %346 = memref.load %arg2[%c90] : memref<144xf32, #tpu.memory_space<smem>>
    %347 = vector.broadcast %346 : f32 to vector<1x16x16xf32>
    %348 = arith.mulf %347, %337 : vector<1x16x16xf32>
    %349 = arith.addf %331, %348 : vector<1x16x16xf32>
    %c126 = arith.constant 126 : index
    %350 = memref.load %arg2[%c126] : memref<144xf32, #tpu.memory_space<smem>>
    %351 = vector.broadcast %350 : f32 to vector<1x16x16xf32>
    %352 = arith.mulf %351, %337 : vector<1x16x16xf32>
    %353 = arith.addf %335, %352 : vector<1x16x16xf32>
    %c0_92 = arith.constant 0 : index
    %c2_93 = arith.constant 2 : index
    %c0_94 = arith.constant 0 : index
    %c1_95 = arith.constant 1 : index
    %354 = vector.load %arg5[%c0_92, %c2_93, %c0_94, %c1_95] : memref<1x4x18x18xf32, #tpu.memory_space<vmem>>, vector<1x1x16x16xf32>
    %355 = vector.shape_cast %354 : vector<1x1x16x16xf32> to vector<1x16x16xf32>
    %c19 = arith.constant 19 : index
    %356 = memref.load %arg2[%c19] : memref<144xf32, #tpu.memory_space<smem>>
    %357 = vector.broadcast %356 : f32 to vector<1x16x16xf32>
    %358 = arith.mulf %357, %355 : vector<1x16x16xf32>
    %359 = arith.addf %341, %358 : vector<1x16x16xf32>
    %c55 = arith.constant 55 : index
    %360 = memref.load %arg2[%c55] : memref<144xf32, #tpu.memory_space<smem>>
    %361 = vector.broadcast %360 : f32 to vector<1x16x16xf32>
    %362 = arith.mulf %361, %355 : vector<1x16x16xf32>
    %363 = arith.addf %345, %362 : vector<1x16x16xf32>
    %c91 = arith.constant 91 : index
    %364 = memref.load %arg2[%c91] : memref<144xf32, #tpu.memory_space<smem>>
    %365 = vector.broadcast %364 : f32 to vector<1x16x16xf32>
    %366 = arith.mulf %365, %355 : vector<1x16x16xf32>
    %367 = arith.addf %349, %366 : vector<1x16x16xf32>
    %c127 = arith.constant 127 : index
    %368 = memref.load %arg2[%c127] : memref<144xf32, #tpu.memory_space<smem>>
    %369 = vector.broadcast %368 : f32 to vector<1x16x16xf32>
    %370 = arith.mulf %369, %355 : vector<1x16x16xf32>
    %371 = arith.addf %353, %370 : vector<1x16x16xf32>
    %c0_96 = arith.constant 0 : index
    %c2_97 = arith.constant 2 : index
    %c0_98 = arith.constant 0 : index
    %c2_99 = arith.constant 2 : index
    %372 = vector.load %arg5[%c0_96, %c2_97, %c0_98, %c2_99] : memref<1x4x18x18xf32, #tpu.memory_space<vmem>>, vector<1x1x16x16xf32>
    %373 = vector.shape_cast %372 : vector<1x1x16x16xf32> to vector<1x16x16xf32>
    %c20 = arith.constant 20 : index
    %374 = memref.load %arg2[%c20] : memref<144xf32, #tpu.memory_space<smem>>
    %375 = vector.broadcast %374 : f32 to vector<1x16x16xf32>
    %376 = arith.mulf %375, %373 : vector<1x16x16xf32>
    %377 = arith.addf %359, %376 : vector<1x16x16xf32>
    %c56 = arith.constant 56 : index
    %378 = memref.load %arg2[%c56] : memref<144xf32, #tpu.memory_space<smem>>
    %379 = vector.broadcast %378 : f32 to vector<1x16x16xf32>
    %380 = arith.mulf %379, %373 : vector<1x16x16xf32>
    %381 = arith.addf %363, %380 : vector<1x16x16xf32>
    %c92 = arith.constant 92 : index
    %382 = memref.load %arg2[%c92] : memref<144xf32, #tpu.memory_space<smem>>
    %383 = vector.broadcast %382 : f32 to vector<1x16x16xf32>
    %384 = arith.mulf %383, %373 : vector<1x16x16xf32>
    %385 = arith.addf %367, %384 : vector<1x16x16xf32>
    %c128 = arith.constant 128 : index
    %386 = memref.load %arg2[%c128] : memref<144xf32, #tpu.memory_space<smem>>
    %387 = vector.broadcast %386 : f32 to vector<1x16x16xf32>
    %388 = arith.mulf %387, %373 : vector<1x16x16xf32>
    %389 = arith.addf %371, %388 : vector<1x16x16xf32>
    %c0_100 = arith.constant 0 : index
    %c2_101 = arith.constant 2 : index
    %c1_102 = arith.constant 1 : index
    %c0_103 = arith.constant 0 : index
    %390 = vector.load %arg5[%c0_100, %c2_101, %c1_102, %c0_103] : memref<1x4x18x18xf32, #tpu.memory_space<vmem>>, vector<1x1x16x16xf32>
    %391 = vector.shape_cast %390 : vector<1x1x16x16xf32> to vector<1x16x16xf32>
    %c21 = arith.constant 21 : index
    %392 = memref.load %arg2[%c21] : memref<144xf32, #tpu.memory_space<smem>>
    %393 = vector.broadcast %392 : f32 to vector<1x16x16xf32>
    %394 = arith.mulf %393, %391 : vector<1x16x16xf32>
    %395 = arith.addf %377, %394 : vector<1x16x16xf32>
    %c57 = arith.constant 57 : index
    %396 = memref.load %arg2[%c57] : memref<144xf32, #tpu.memory_space<smem>>
    %397 = vector.broadcast %396 : f32 to vector<1x16x16xf32>
    %398 = arith.mulf %397, %391 : vector<1x16x16xf32>
    %399 = arith.addf %381, %398 : vector<1x16x16xf32>
    %c93 = arith.constant 93 : index
    %400 = memref.load %arg2[%c93] : memref<144xf32, #tpu.memory_space<smem>>
    %401 = vector.broadcast %400 : f32 to vector<1x16x16xf32>
    %402 = arith.mulf %401, %391 : vector<1x16x16xf32>
    %403 = arith.addf %385, %402 : vector<1x16x16xf32>
    %c129 = arith.constant 129 : index
    %404 = memref.load %arg2[%c129] : memref<144xf32, #tpu.memory_space<smem>>
    %405 = vector.broadcast %404 : f32 to vector<1x16x16xf32>
    %406 = arith.mulf %405, %391 : vector<1x16x16xf32>
    %407 = arith.addf %389, %406 : vector<1x16x16xf32>
    %c0_104 = arith.constant 0 : index
    %c2_105 = arith.constant 2 : index
    %c1_106 = arith.constant 1 : index
    %c1_107 = arith.constant 1 : index
    %408 = vector.load %arg5[%c0_104, %c2_105, %c1_106, %c1_107] : memref<1x4x18x18xf32, #tpu.memory_space<vmem>>, vector<1x1x16x16xf32>
    %409 = vector.shape_cast %408 : vector<1x1x16x16xf32> to vector<1x16x16xf32>
    %c22 = arith.constant 22 : index
    %410 = memref.load %arg2[%c22] : memref<144xf32, #tpu.memory_space<smem>>
    %411 = vector.broadcast %410 : f32 to vector<1x16x16xf32>
    %412 = arith.mulf %411, %409 : vector<1x16x16xf32>
    %413 = arith.addf %395, %412 : vector<1x16x16xf32>
    %c58 = arith.constant 58 : index
    %414 = memref.load %arg2[%c58] : memref<144xf32, #tpu.memory_space<smem>>
    %415 = vector.broadcast %414 : f32 to vector<1x16x16xf32>
    %416 = arith.mulf %415, %409 : vector<1x16x16xf32>
    %417 = arith.addf %399, %416 : vector<1x16x16xf32>
    %c94 = arith.constant 94 : index
    %418 = memref.load %arg2[%c94] : memref<144xf32, #tpu.memory_space<smem>>
    %419 = vector.broadcast %418 : f32 to vector<1x16x16xf32>
    %420 = arith.mulf %419, %409 : vector<1x16x16xf32>
    %421 = arith.addf %403, %420 : vector<1x16x16xf32>
    %c130 = arith.constant 130 : index
    %422 = memref.load %arg2[%c130] : memref<144xf32, #tpu.memory_space<smem>>
    %423 = vector.broadcast %422 : f32 to vector<1x16x16xf32>
    %424 = arith.mulf %423, %409 : vector<1x16x16xf32>
    %425 = arith.addf %407, %424 : vector<1x16x16xf32>
    %c0_108 = arith.constant 0 : index
    %c2_109 = arith.constant 2 : index
    %c1_110 = arith.constant 1 : index
    %c2_111 = arith.constant 2 : index
    %426 = vector.load %arg5[%c0_108, %c2_109, %c1_110, %c2_111] : memref<1x4x18x18xf32, #tpu.memory_space<vmem>>, vector<1x1x16x16xf32>
    %427 = vector.shape_cast %426 : vector<1x1x16x16xf32> to vector<1x16x16xf32>
    %c23 = arith.constant 23 : index
    %428 = memref.load %arg2[%c23] : memref<144xf32, #tpu.memory_space<smem>>
    %429 = vector.broadcast %428 : f32 to vector<1x16x16xf32>
    %430 = arith.mulf %429, %427 : vector<1x16x16xf32>
    %431 = arith.addf %413, %430 : vector<1x16x16xf32>
    %c59 = arith.constant 59 : index
    %432 = memref.load %arg2[%c59] : memref<144xf32, #tpu.memory_space<smem>>
    %433 = vector.broadcast %432 : f32 to vector<1x16x16xf32>
    %434 = arith.mulf %433, %427 : vector<1x16x16xf32>
    %435 = arith.addf %417, %434 : vector<1x16x16xf32>
    %c95 = arith.constant 95 : index
    %436 = memref.load %arg2[%c95] : memref<144xf32, #tpu.memory_space<smem>>
    %437 = vector.broadcast %436 : f32 to vector<1x16x16xf32>
    %438 = arith.mulf %437, %427 : vector<1x16x16xf32>
    %439 = arith.addf %421, %438 : vector<1x16x16xf32>
    %c131 = arith.constant 131 : index
    %440 = memref.load %arg2[%c131] : memref<144xf32, #tpu.memory_space<smem>>
    %441 = vector.broadcast %440 : f32 to vector<1x16x16xf32>
    %442 = arith.mulf %441, %427 : vector<1x16x16xf32>
    %443 = arith.addf %425, %442 : vector<1x16x16xf32>
    %c0_112 = arith.constant 0 : index
    %c2_113 = arith.constant 2 : index
    %c2_114 = arith.constant 2 : index
    %c0_115 = arith.constant 0 : index
    %444 = vector.load %arg5[%c0_112, %c2_113, %c2_114, %c0_115] : memref<1x4x18x18xf32, #tpu.memory_space<vmem>>, vector<1x1x16x16xf32>
    %445 = vector.shape_cast %444 : vector<1x1x16x16xf32> to vector<1x16x16xf32>
    %c24 = arith.constant 24 : index
    %446 = memref.load %arg2[%c24] : memref<144xf32, #tpu.memory_space<smem>>
    %447 = vector.broadcast %446 : f32 to vector<1x16x16xf32>
    %448 = arith.mulf %447, %445 : vector<1x16x16xf32>
    %449 = arith.addf %431, %448 : vector<1x16x16xf32>
    %c60 = arith.constant 60 : index
    %450 = memref.load %arg2[%c60] : memref<144xf32, #tpu.memory_space<smem>>
    %451 = vector.broadcast %450 : f32 to vector<1x16x16xf32>
    %452 = arith.mulf %451, %445 : vector<1x16x16xf32>
    %453 = arith.addf %435, %452 : vector<1x16x16xf32>
    %c96 = arith.constant 96 : index
    %454 = memref.load %arg2[%c96] : memref<144xf32, #tpu.memory_space<smem>>
    %455 = vector.broadcast %454 : f32 to vector<1x16x16xf32>
    %456 = arith.mulf %455, %445 : vector<1x16x16xf32>
    %457 = arith.addf %439, %456 : vector<1x16x16xf32>
    %c132 = arith.constant 132 : index
    %458 = memref.load %arg2[%c132] : memref<144xf32, #tpu.memory_space<smem>>
    %459 = vector.broadcast %458 : f32 to vector<1x16x16xf32>
    %460 = arith.mulf %459, %445 : vector<1x16x16xf32>
    %461 = arith.addf %443, %460 : vector<1x16x16xf32>
    %c0_116 = arith.constant 0 : index
    %c2_117 = arith.constant 2 : index
    %c2_118 = arith.constant 2 : index
    %c1_119 = arith.constant 1 : index
    %462 = vector.load %arg5[%c0_116, %c2_117, %c2_118, %c1_119] : memref<1x4x18x18xf32, #tpu.memory_space<vmem>>, vector<1x1x16x16xf32>
    %463 = vector.shape_cast %462 : vector<1x1x16x16xf32> to vector<1x16x16xf32>
    %c25 = arith.constant 25 : index
    %464 = memref.load %arg2[%c25] : memref<144xf32, #tpu.memory_space<smem>>
    %465 = vector.broadcast %464 : f32 to vector<1x16x16xf32>
    %466 = arith.mulf %465, %463 : vector<1x16x16xf32>
    %467 = arith.addf %449, %466 : vector<1x16x16xf32>
    %c61 = arith.constant 61 : index
    %468 = memref.load %arg2[%c61] : memref<144xf32, #tpu.memory_space<smem>>
    %469 = vector.broadcast %468 : f32 to vector<1x16x16xf32>
    %470 = arith.mulf %469, %463 : vector<1x16x16xf32>
    %471 = arith.addf %453, %470 : vector<1x16x16xf32>
    %c97 = arith.constant 97 : index
    %472 = memref.load %arg2[%c97] : memref<144xf32, #tpu.memory_space<smem>>
    %473 = vector.broadcast %472 : f32 to vector<1x16x16xf32>
    %474 = arith.mulf %473, %463 : vector<1x16x16xf32>
    %475 = arith.addf %457, %474 : vector<1x16x16xf32>
    %c133 = arith.constant 133 : index
    %476 = memref.load %arg2[%c133] : memref<144xf32, #tpu.memory_space<smem>>
    %477 = vector.broadcast %476 : f32 to vector<1x16x16xf32>
    %478 = arith.mulf %477, %463 : vector<1x16x16xf32>
    %479 = arith.addf %461, %478 : vector<1x16x16xf32>
    %c0_120 = arith.constant 0 : index
    %c2_121 = arith.constant 2 : index
    %c2_122 = arith.constant 2 : index
    %c2_123 = arith.constant 2 : index
    %480 = vector.load %arg5[%c0_120, %c2_121, %c2_122, %c2_123] : memref<1x4x18x18xf32, #tpu.memory_space<vmem>>, vector<1x1x16x16xf32>
    %481 = vector.shape_cast %480 : vector<1x1x16x16xf32> to vector<1x16x16xf32>
    %c26 = arith.constant 26 : index
    %482 = memref.load %arg2[%c26] : memref<144xf32, #tpu.memory_space<smem>>
    %483 = vector.broadcast %482 : f32 to vector<1x16x16xf32>
    %484 = arith.mulf %483, %481 : vector<1x16x16xf32>
    %485 = arith.addf %467, %484 : vector<1x16x16xf32>
    %c62 = arith.constant 62 : index
    %486 = memref.load %arg2[%c62] : memref<144xf32, #tpu.memory_space<smem>>
    %487 = vector.broadcast %486 : f32 to vector<1x16x16xf32>
    %488 = arith.mulf %487, %481 : vector<1x16x16xf32>
    %489 = arith.addf %471, %488 : vector<1x16x16xf32>
    %c98 = arith.constant 98 : index
    %490 = memref.load %arg2[%c98] : memref<144xf32, #tpu.memory_space<smem>>
    %491 = vector.broadcast %490 : f32 to vector<1x16x16xf32>
    %492 = arith.mulf %491, %481 : vector<1x16x16xf32>
    %493 = arith.addf %475, %492 : vector<1x16x16xf32>
    %c134 = arith.constant 134 : index
    %494 = memref.load %arg2[%c134] : memref<144xf32, #tpu.memory_space<smem>>
    %495 = vector.broadcast %494 : f32 to vector<1x16x16xf32>
    %496 = arith.mulf %495, %481 : vector<1x16x16xf32>
    %497 = arith.addf %479, %496 : vector<1x16x16xf32>
    %c0_124 = arith.constant 0 : index
    %c3_125 = arith.constant 3 : index
    %c0_126 = arith.constant 0 : index
    %c0_127 = arith.constant 0 : index
    %498 = vector.load %arg5[%c0_124, %c3_125, %c0_126, %c0_127] : memref<1x4x18x18xf32, #tpu.memory_space<vmem>>, vector<1x1x16x16xf32>
    %499 = vector.shape_cast %498 : vector<1x1x16x16xf32> to vector<1x16x16xf32>
    %c27 = arith.constant 27 : index
    %500 = memref.load %arg2[%c27] : memref<144xf32, #tpu.memory_space<smem>>
    %501 = vector.broadcast %500 : f32 to vector<1x16x16xf32>
    %502 = arith.mulf %501, %499 : vector<1x16x16xf32>
    %503 = arith.addf %485, %502 : vector<1x16x16xf32>
    %c63 = arith.constant 63 : index
    %504 = memref.load %arg2[%c63] : memref<144xf32, #tpu.memory_space<smem>>
    %505 = vector.broadcast %504 : f32 to vector<1x16x16xf32>
    %506 = arith.mulf %505, %499 : vector<1x16x16xf32>
    %507 = arith.addf %489, %506 : vector<1x16x16xf32>
    %c99 = arith.constant 99 : index
    %508 = memref.load %arg2[%c99] : memref<144xf32, #tpu.memory_space<smem>>
    %509 = vector.broadcast %508 : f32 to vector<1x16x16xf32>
    %510 = arith.mulf %509, %499 : vector<1x16x16xf32>
    %511 = arith.addf %493, %510 : vector<1x16x16xf32>
    %c135 = arith.constant 135 : index
    %512 = memref.load %arg2[%c135] : memref<144xf32, #tpu.memory_space<smem>>
    %513 = vector.broadcast %512 : f32 to vector<1x16x16xf32>
    %514 = arith.mulf %513, %499 : vector<1x16x16xf32>
    %515 = arith.addf %497, %514 : vector<1x16x16xf32>
    %c0_128 = arith.constant 0 : index
    %c3_129 = arith.constant 3 : index
    %c0_130 = arith.constant 0 : index
    %c1_131 = arith.constant 1 : index
    %516 = vector.load %arg5[%c0_128, %c3_129, %c0_130, %c1_131] : memref<1x4x18x18xf32, #tpu.memory_space<vmem>>, vector<1x1x16x16xf32>
    %517 = vector.shape_cast %516 : vector<1x1x16x16xf32> to vector<1x16x16xf32>
    %c28 = arith.constant 28 : index
    %518 = memref.load %arg2[%c28] : memref<144xf32, #tpu.memory_space<smem>>
    %519 = vector.broadcast %518 : f32 to vector<1x16x16xf32>
    %520 = arith.mulf %519, %517 : vector<1x16x16xf32>
    %521 = arith.addf %503, %520 : vector<1x16x16xf32>
    %c64 = arith.constant 64 : index
    %522 = memref.load %arg2[%c64] : memref<144xf32, #tpu.memory_space<smem>>
    %523 = vector.broadcast %522 : f32 to vector<1x16x16xf32>
    %524 = arith.mulf %523, %517 : vector<1x16x16xf32>
    %525 = arith.addf %507, %524 : vector<1x16x16xf32>
    %c100 = arith.constant 100 : index
    %526 = memref.load %arg2[%c100] : memref<144xf32, #tpu.memory_space<smem>>
    %527 = vector.broadcast %526 : f32 to vector<1x16x16xf32>
    %528 = arith.mulf %527, %517 : vector<1x16x16xf32>
    %529 = arith.addf %511, %528 : vector<1x16x16xf32>
    %c136 = arith.constant 136 : index
    %530 = memref.load %arg2[%c136] : memref<144xf32, #tpu.memory_space<smem>>
    %531 = vector.broadcast %530 : f32 to vector<1x16x16xf32>
    %532 = arith.mulf %531, %517 : vector<1x16x16xf32>
    %533 = arith.addf %515, %532 : vector<1x16x16xf32>
    %c0_132 = arith.constant 0 : index
    %c3_133 = arith.constant 3 : index
    %c0_134 = arith.constant 0 : index
    %c2_135 = arith.constant 2 : index
    %534 = vector.load %arg5[%c0_132, %c3_133, %c0_134, %c2_135] : memref<1x4x18x18xf32, #tpu.memory_space<vmem>>, vector<1x1x16x16xf32>
    %535 = vector.shape_cast %534 : vector<1x1x16x16xf32> to vector<1x16x16xf32>
    %c29 = arith.constant 29 : index
    %536 = memref.load %arg2[%c29] : memref<144xf32, #tpu.memory_space<smem>>
    %537 = vector.broadcast %536 : f32 to vector<1x16x16xf32>
    %538 = arith.mulf %537, %535 : vector<1x16x16xf32>
    %539 = arith.addf %521, %538 : vector<1x16x16xf32>
    %c65 = arith.constant 65 : index
    %540 = memref.load %arg2[%c65] : memref<144xf32, #tpu.memory_space<smem>>
    %541 = vector.broadcast %540 : f32 to vector<1x16x16xf32>
    %542 = arith.mulf %541, %535 : vector<1x16x16xf32>
    %543 = arith.addf %525, %542 : vector<1x16x16xf32>
    %c101 = arith.constant 101 : index
    %544 = memref.load %arg2[%c101] : memref<144xf32, #tpu.memory_space<smem>>
    %545 = vector.broadcast %544 : f32 to vector<1x16x16xf32>
    %546 = arith.mulf %545, %535 : vector<1x16x16xf32>
    %547 = arith.addf %529, %546 : vector<1x16x16xf32>
    %c137 = arith.constant 137 : index
    %548 = memref.load %arg2[%c137] : memref<144xf32, #tpu.memory_space<smem>>
    %549 = vector.broadcast %548 : f32 to vector<1x16x16xf32>
    %550 = arith.mulf %549, %535 : vector<1x16x16xf32>
    %551 = arith.addf %533, %550 : vector<1x16x16xf32>
    %c0_136 = arith.constant 0 : index
    %c3_137 = arith.constant 3 : index
    %c1_138 = arith.constant 1 : index
    %c0_139 = arith.constant 0 : index
    %552 = vector.load %arg5[%c0_136, %c3_137, %c1_138, %c0_139] : memref<1x4x18x18xf32, #tpu.memory_space<vmem>>, vector<1x1x16x16xf32>
    %553 = vector.shape_cast %552 : vector<1x1x16x16xf32> to vector<1x16x16xf32>
    %c30 = arith.constant 30 : index
    %554 = memref.load %arg2[%c30] : memref<144xf32, #tpu.memory_space<smem>>
    %555 = vector.broadcast %554 : f32 to vector<1x16x16xf32>
    %556 = arith.mulf %555, %553 : vector<1x16x16xf32>
    %557 = arith.addf %539, %556 : vector<1x16x16xf32>
    %c66 = arith.constant 66 : index
    %558 = memref.load %arg2[%c66] : memref<144xf32, #tpu.memory_space<smem>>
    %559 = vector.broadcast %558 : f32 to vector<1x16x16xf32>
    %560 = arith.mulf %559, %553 : vector<1x16x16xf32>
    %561 = arith.addf %543, %560 : vector<1x16x16xf32>
    %c102 = arith.constant 102 : index
    %562 = memref.load %arg2[%c102] : memref<144xf32, #tpu.memory_space<smem>>
    %563 = vector.broadcast %562 : f32 to vector<1x16x16xf32>
    %564 = arith.mulf %563, %553 : vector<1x16x16xf32>
    %565 = arith.addf %547, %564 : vector<1x16x16xf32>
    %c138 = arith.constant 138 : index
    %566 = memref.load %arg2[%c138] : memref<144xf32, #tpu.memory_space<smem>>
    %567 = vector.broadcast %566 : f32 to vector<1x16x16xf32>
    %568 = arith.mulf %567, %553 : vector<1x16x16xf32>
    %569 = arith.addf %551, %568 : vector<1x16x16xf32>
    %c0_140 = arith.constant 0 : index
    %c3_141 = arith.constant 3 : index
    %c1_142 = arith.constant 1 : index
    %c1_143 = arith.constant 1 : index
    %570 = vector.load %arg5[%c0_140, %c3_141, %c1_142, %c1_143] : memref<1x4x18x18xf32, #tpu.memory_space<vmem>>, vector<1x1x16x16xf32>
    %571 = vector.shape_cast %570 : vector<1x1x16x16xf32> to vector<1x16x16xf32>
    %c31 = arith.constant 31 : index
    %572 = memref.load %arg2[%c31] : memref<144xf32, #tpu.memory_space<smem>>
    %573 = vector.broadcast %572 : f32 to vector<1x16x16xf32>
    %574 = arith.mulf %573, %571 : vector<1x16x16xf32>
    %575 = arith.addf %557, %574 : vector<1x16x16xf32>
    %c67 = arith.constant 67 : index
    %576 = memref.load %arg2[%c67] : memref<144xf32, #tpu.memory_space<smem>>
    %577 = vector.broadcast %576 : f32 to vector<1x16x16xf32>
    %578 = arith.mulf %577, %571 : vector<1x16x16xf32>
    %579 = arith.addf %561, %578 : vector<1x16x16xf32>
    %c103 = arith.constant 103 : index
    %580 = memref.load %arg2[%c103] : memref<144xf32, #tpu.memory_space<smem>>
    %581 = vector.broadcast %580 : f32 to vector<1x16x16xf32>
    %582 = arith.mulf %581, %571 : vector<1x16x16xf32>
    %583 = arith.addf %565, %582 : vector<1x16x16xf32>
    %c139 = arith.constant 139 : index
    %584 = memref.load %arg2[%c139] : memref<144xf32, #tpu.memory_space<smem>>
    %585 = vector.broadcast %584 : f32 to vector<1x16x16xf32>
    %586 = arith.mulf %585, %571 : vector<1x16x16xf32>
    %587 = arith.addf %569, %586 : vector<1x16x16xf32>
    %c0_144 = arith.constant 0 : index
    %c3_145 = arith.constant 3 : index
    %c1_146 = arith.constant 1 : index
    %c2_147 = arith.constant 2 : index
    %588 = vector.load %arg5[%c0_144, %c3_145, %c1_146, %c2_147] : memref<1x4x18x18xf32, #tpu.memory_space<vmem>>, vector<1x1x16x16xf32>
    %589 = vector.shape_cast %588 : vector<1x1x16x16xf32> to vector<1x16x16xf32>
    %c32 = arith.constant 32 : index
    %590 = memref.load %arg2[%c32] : memref<144xf32, #tpu.memory_space<smem>>
    %591 = vector.broadcast %590 : f32 to vector<1x16x16xf32>
    %592 = arith.mulf %591, %589 : vector<1x16x16xf32>
    %593 = arith.addf %575, %592 : vector<1x16x16xf32>
    %c68 = arith.constant 68 : index
    %594 = memref.load %arg2[%c68] : memref<144xf32, #tpu.memory_space<smem>>
    %595 = vector.broadcast %594 : f32 to vector<1x16x16xf32>
    %596 = arith.mulf %595, %589 : vector<1x16x16xf32>
    %597 = arith.addf %579, %596 : vector<1x16x16xf32>
    %c104 = arith.constant 104 : index
    %598 = memref.load %arg2[%c104] : memref<144xf32, #tpu.memory_space<smem>>
    %599 = vector.broadcast %598 : f32 to vector<1x16x16xf32>
    %600 = arith.mulf %599, %589 : vector<1x16x16xf32>
    %601 = arith.addf %583, %600 : vector<1x16x16xf32>
    %c140 = arith.constant 140 : index
    %602 = memref.load %arg2[%c140] : memref<144xf32, #tpu.memory_space<smem>>
    %603 = vector.broadcast %602 : f32 to vector<1x16x16xf32>
    %604 = arith.mulf %603, %589 : vector<1x16x16xf32>
    %605 = arith.addf %587, %604 : vector<1x16x16xf32>
    %c0_148 = arith.constant 0 : index
    %c3_149 = arith.constant 3 : index
    %c2_150 = arith.constant 2 : index
    %c0_151 = arith.constant 0 : index
    %606 = vector.load %arg5[%c0_148, %c3_149, %c2_150, %c0_151] : memref<1x4x18x18xf32, #tpu.memory_space<vmem>>, vector<1x1x16x16xf32>
    %607 = vector.shape_cast %606 : vector<1x1x16x16xf32> to vector<1x16x16xf32>
    %c33 = arith.constant 33 : index
    %608 = memref.load %arg2[%c33] : memref<144xf32, #tpu.memory_space<smem>>
    %609 = vector.broadcast %608 : f32 to vector<1x16x16xf32>
    %610 = arith.mulf %609, %607 : vector<1x16x16xf32>
    %611 = arith.addf %593, %610 : vector<1x16x16xf32>
    %c69 = arith.constant 69 : index
    %612 = memref.load %arg2[%c69] : memref<144xf32, #tpu.memory_space<smem>>
    %613 = vector.broadcast %612 : f32 to vector<1x16x16xf32>
    %614 = arith.mulf %613, %607 : vector<1x16x16xf32>
    %615 = arith.addf %597, %614 : vector<1x16x16xf32>
    %c105 = arith.constant 105 : index
    %616 = memref.load %arg2[%c105] : memref<144xf32, #tpu.memory_space<smem>>
    %617 = vector.broadcast %616 : f32 to vector<1x16x16xf32>
    %618 = arith.mulf %617, %607 : vector<1x16x16xf32>
    %619 = arith.addf %601, %618 : vector<1x16x16xf32>
    %c141 = arith.constant 141 : index
    %620 = memref.load %arg2[%c141] : memref<144xf32, #tpu.memory_space<smem>>
    %621 = vector.broadcast %620 : f32 to vector<1x16x16xf32>
    %622 = arith.mulf %621, %607 : vector<1x16x16xf32>
    %623 = arith.addf %605, %622 : vector<1x16x16xf32>
    %c0_152 = arith.constant 0 : index
    %c3_153 = arith.constant 3 : index
    %c2_154 = arith.constant 2 : index
    %c1_155 = arith.constant 1 : index
    %624 = vector.load %arg5[%c0_152, %c3_153, %c2_154, %c1_155] : memref<1x4x18x18xf32, #tpu.memory_space<vmem>>, vector<1x1x16x16xf32>
    %625 = vector.shape_cast %624 : vector<1x1x16x16xf32> to vector<1x16x16xf32>
    %c34 = arith.constant 34 : index
    %626 = memref.load %arg2[%c34] : memref<144xf32, #tpu.memory_space<smem>>
    %627 = vector.broadcast %626 : f32 to vector<1x16x16xf32>
    %628 = arith.mulf %627, %625 : vector<1x16x16xf32>
    %629 = arith.addf %611, %628 : vector<1x16x16xf32>
    %c70 = arith.constant 70 : index
    %630 = memref.load %arg2[%c70] : memref<144xf32, #tpu.memory_space<smem>>
    %631 = vector.broadcast %630 : f32 to vector<1x16x16xf32>
    %632 = arith.mulf %631, %625 : vector<1x16x16xf32>
    %633 = arith.addf %615, %632 : vector<1x16x16xf32>
    %c106 = arith.constant 106 : index
    %634 = memref.load %arg2[%c106] : memref<144xf32, #tpu.memory_space<smem>>
    %635 = vector.broadcast %634 : f32 to vector<1x16x16xf32>
    %636 = arith.mulf %635, %625 : vector<1x16x16xf32>
    %637 = arith.addf %619, %636 : vector<1x16x16xf32>
    %c142 = arith.constant 142 : index
    %638 = memref.load %arg2[%c142] : memref<144xf32, #tpu.memory_space<smem>>
    %639 = vector.broadcast %638 : f32 to vector<1x16x16xf32>
    %640 = arith.mulf %639, %625 : vector<1x16x16xf32>
    %641 = arith.addf %623, %640 : vector<1x16x16xf32>
    %c0_156 = arith.constant 0 : index
    %c3_157 = arith.constant 3 : index
    %c2_158 = arith.constant 2 : index
    %c2_159 = arith.constant 2 : index
    %642 = vector.load %arg5[%c0_156, %c3_157, %c2_158, %c2_159] : memref<1x4x18x18xf32, #tpu.memory_space<vmem>>, vector<1x1x16x16xf32>
    %643 = vector.shape_cast %642 : vector<1x1x16x16xf32> to vector<1x16x16xf32>
    %c35 = arith.constant 35 : index
    %644 = memref.load %arg2[%c35] : memref<144xf32, #tpu.memory_space<smem>>
    %645 = vector.broadcast %644 : f32 to vector<1x16x16xf32>
    %646 = arith.mulf %645, %643 : vector<1x16x16xf32>
    %647 = arith.addf %629, %646 : vector<1x16x16xf32>
    %c71 = arith.constant 71 : index
    %648 = memref.load %arg2[%c71] : memref<144xf32, #tpu.memory_space<smem>>
    %649 = vector.broadcast %648 : f32 to vector<1x16x16xf32>
    %650 = arith.mulf %649, %643 : vector<1x16x16xf32>
    %651 = arith.addf %633, %650 : vector<1x16x16xf32>
    %c107 = arith.constant 107 : index
    %652 = memref.load %arg2[%c107] : memref<144xf32, #tpu.memory_space<smem>>
    %653 = vector.broadcast %652 : f32 to vector<1x16x16xf32>
    %654 = arith.mulf %653, %643 : vector<1x16x16xf32>
    %655 = arith.addf %637, %654 : vector<1x16x16xf32>
    %c143 = arith.constant 143 : index
    %656 = memref.load %arg2[%c143] : memref<144xf32, #tpu.memory_space<smem>>
    %657 = vector.broadcast %656 : f32 to vector<1x16x16xf32>
    %658 = arith.mulf %657, %643 : vector<1x16x16xf32>
    %659 = arith.addf %641, %658 : vector<1x16x16xf32>
    %cst_160 = arith.constant 0.000000e+00 : f32
    %cst_161 = arith.constant 1.000000e+00 : f32
    %660 = vector.broadcast %cst_160 : f32 to vector<1x16x16xf32>
    %661 = arith.maximumf %660, %647 : vector<1x16x16xf32>
    %662 = vector.broadcast %cst_161 : f32 to vector<1x16x16xf32>
    %663 = arith.minimumf %662, %661 : vector<1x16x16xf32>
    %664 = arith.truncf %663 : vector<1x16x16xf32> to vector<1x16x16xbf16>
    %c0_162 = arith.constant 0 : index
    %c0_163 = arith.constant 0 : index
    %c0_164 = arith.constant 0 : index
    %c0_165 = arith.constant 0 : index
    %665 = vector.load %arg4[%c0_162, %c0_163, %c0_164, %c0_165] : memref<1x4x16x16xbf16, #tpu.memory_space<vmem>>, vector<1x1x16x16xbf16>
    %666 = vector.shape_cast %665 : vector<1x1x16x16xbf16> to vector<1x16x16xbf16>
    %667 = vector.shape_cast %664 : vector<1x16x16xbf16> to vector<1x1x16x16xbf16>
    tpu.vector_store %arg4[%c0_162, %c0_163, %c0_164, %c0_165], %667 {strides = array<i32>} : memref<1x4x16x16xbf16, #tpu.memory_space<vmem>>, vector<1x1x16x16xbf16>,
    %cst_166 = arith.constant 0.000000e+00 : f32
    %cst_167 = arith.constant 1.000000e+00 : f32
    %668 = vector.broadcast %cst_166 : f32 to vector<1x16x16xf32>
    %669 = arith.maximumf %668, %651 : vector<1x16x16xf32>
    %670 = vector.broadcast %cst_167 : f32 to vector<1x16x16xf32>
    %671 = arith.minimumf %670, %669 : vector<1x16x16xf32>
    %672 = arith.truncf %671 : vector<1x16x16xf32> to vector<1x16x16xbf16>
    %c0_168 = arith.constant 0 : index
    %c1_169 = arith.constant 1 : index
    %c0_170 = arith.constant 0 : index
    %c0_171 = arith.constant 0 : index
    %673 = vector.load %arg4[%c0_168, %c1_169, %c0_170, %c0_171] : memref<1x4x16x16xbf16, #tpu.memory_space<vmem>>, vector<1x1x16x16xbf16>
    %674 = vector.shape_cast %673 : vector<1x1x16x16xbf16> to vector<1x16x16xbf16>
    %675 = vector.shape_cast %672 : vector<1x16x16xbf16> to vector<1x1x16x16xbf16>
    tpu.vector_store %arg4[%c0_168, %c1_169, %c0_170, %c0_171], %675 {strides = array<i32>} : memref<1x4x16x16xbf16, #tpu.memory_space<vmem>>, vector<1x1x16x16xbf16>,
    %cst_172 = arith.constant 0.000000e+00 : f32
    %cst_173 = arith.constant 1.000000e+00 : f32
    %676 = vector.broadcast %cst_172 : f32 to vector<1x16x16xf32>
    %677 = arith.maximumf %676, %655 : vector<1x16x16xf32>
    %678 = vector.broadcast %cst_173 : f32 to vector<1x16x16xf32>
    %679 = arith.minimumf %678, %677 : vector<1x16x16xf32>
    %680 = arith.truncf %679 : vector<1x16x16xf32> to vector<1x16x16xbf16>
    %c0_174 = arith.constant 0 : index
    %c2_175 = arith.constant 2 : index
    %c0_176 = arith.constant 0 : index
    %c0_177 = arith.constant 0 : index
    %681 = vector.load %arg4[%c0_174, %c2_175, %c0_176, %c0_177] : memref<1x4x16x16xbf16, #tpu.memory_space<vmem>>, vector<1x1x16x16xbf16>
    %682 = vector.shape_cast %681 : vector<1x1x16x16xbf16> to vector<1x16x16xbf16>
    %683 = vector.shape_cast %680 : vector<1x16x16xbf16> to vector<1x1x16x16xbf16>
    tpu.vector_store %arg4[%c0_174, %c2_175, %c0_176, %c0_177], %683 {strides = array<i32>} : memref<1x4x16x16xbf16, #tpu.memory_space<vmem>>, vector<1x1x16x16xbf16>,
    %cst_178 = arith.constant 0.000000e+00 : f32
    %cst_179 = arith.constant 1.000000e+00 : f32
    %684 = vector.broadcast %cst_178 : f32 to vector<1x16x16xf32>
    %685 = arith.maximumf %684, %659 : vector<1x16x16xf32>
    %686 = vector.broadcast %cst_179 : f32 to vector<1x16x16xf32>
    %687 = arith.minimumf %686, %685 : vector<1x16x16xf32>
    %688 = arith.truncf %687 : vector<1x16x16xf32> to vector<1x16x16xbf16>
    %c0_180 = arith.constant 0 : index
    %c3_181 = arith.constant 3 : index
    %c0_182 = arith.constant 0 : index
    %c0_183 = arith.constant 0 : index
    %689 = vector.load %arg4[%c0_180, %c3_181, %c0_182, %c0_183] : memref<1x4x16x16xbf16, #tpu.memory_space<vmem>>, vector<1x1x16x16xbf16>
    %690 = vector.shape_cast %689 : vector<1x1x16x16xbf16> to vector<1x16x16xbf16>
    %691 = vector.shape_cast %688 : vector<1x16x16xbf16> to vector<1x1x16x16xbf16>
    tpu.vector_store %arg4[%c0_180, %c3_181, %c0_182, %c0_183], %691 {strides = array<i32>} : memref<1x4x16x16xbf16, #tpu.memory_space<vmem>>, vector<1x1x16x16xbf16>,
    return
  }
  func.func @transform_0(%arg0: i32) -> (i32, i32, i32, i32) {
    %c0_i32 = arith.constant 0 : i32
    %c0_i32_0 = arith.constant 0 : i32
    %c0_i32_1 = arith.constant 0 : i32
    %c0_i32_2 = arith.constant 0 : i32
    return %arg0, %c0_i32, %c0_i32_0, %c0_i32_1 : i32, i32, i32, i32
  }
  func.func @transform_1(%arg0: i32) -> i32 {
    %c0_i32 = arith.constant 0 : i32
    %c0_i32_0 = arith.constant 0 : i32
    return %c0_i32 : i32
  }
  func.func @transform_2(%arg0: i32) -> i32 {
    %c0_i32 = arith.constant 0 : i32
    %c0_i32_0 = arith.constant 0 : i32
    return %c0_i32 : i32
  }
  func.func @transform_3(%arg0: i32) -> (i32, i32, i32, i32) {
    %c0_i32 = arith.constant 0 : i32
    %c0_i32_0 = arith.constant 0 : i32
    %c0_i32_1 = arith.constant 0 : i32
    %c0_i32_2 = arith.constant 0 : i32
    return %arg0, %c0_i32, %c0_i32_0, %c0_i32_1 : i32, i32, i32, i32
  }
}

</mosaic_0001>

<bundles_post_ra>
// kernel: tpu_custom_call.1
= control target key start
LH: loop header
LB: loop body
LE: loop exit
PB: predicated region body
PF: predicated region fallthrough
CT: control target
= control target key end

     0   :  { %8 = vsyncpa [#allocation4], 0  ;;  %s3793_s0 = inlined_call_operand.hbm [shape: f32[2,4,16,16], index: 0, kind: input, shape index: {}]   ;;  %s3794_s1 = inlined_call_operand.vmem [shape: f32[144], index: 1, kind: input, shape index: {}]   ;;  %s3795_s2 = inlined_call_operand.vmem [shape: f32[4], index: 2, kind: input, shape index: {}]   ;;  %s3796_s3 = inlined_call_operand.hbm [shape: bf16[2,4,16,16], index: 3, kind: output, shape index: {}]  }
   0x1   :  { %10 = vsyncpa [#allocation4 + $0x1], 0 }
   0x2   :  { %11 = vsyncpa [#allocation6], 0 }
   0x3   :  { %12 = vsyncpa [#allocation9], 0 }
   0x4   :  { %13 = vsyncpa [#allocation5], 0 }
   0x5   :  { %15 = vsyncpa [#allocation5 + $0x1], 0  ;;  %s2546_s12 = smov 0   ;;  %s2548_s13 = smov 0  }
   0x6   :  { %s2550_s14 = smov 0   ;;  %s2552_s15 = smov 0  }
   0x7 LB: > { %s2567_s16 = sadd.s32 4294967295, %s2512_s15   ;;  %s2115_s17 = sadd.s32 4294967294, %s2512_s15   ;;  %s2512_s15 = sphi %s2552_s15, %s3822_s15   ;;  %s2508_s14 = sphi %s2550_s14, %s3821_s14   ;;  %s2504_s13 = sphi %s2548_s13, %s3820_s13   ;;  %s2500_s12 = sphi %s2546_s12, %s3819_s12  }
   0x8   : > { %s2571_s18 = sadd.s32 1, %s2512_s15   ;;  %s28_s19 = sadd.s32 1, %s2508_s14 }
   0x9   : > { %s25_s20 = ssub.s32 %s2512_s15, %s2571_s18  ;;  %p35_p0 = scmp.ne.s32.totalorder %s2508_s14, %s2504_s13 }
   0xa   : > { %p26_p1 = scmp.eq.s32.totalorder %s25_s20, 0  ;;  %p36_p2 = scmp.eq.s32.totalorder %s2512_s15, 0 }
   0xb   : > { %p41_p3 = scmp.ne.s32.totalorder %s2504_s13, %s2500_s12  ;;  %p3797_p4 = scmp.eq.s32.totalorder %s2567_s16, 0 }
   0xc   : > { %s2583_s21 = scalar_select %p26_p1, %s2508_s14, %s28_s19  }
   0xd   : > { %p2585_p5 = por %p36_p2, %p35_p0  ;;  %p2591_p6 = por %p3797_p4, %p41_p3 }
   0xe   : > { %p107_p7 = scmp.eq.s32.totalorder %s2567_s16, 1  ;;  %p113_p8 = scmp.eq.s32.totalorder %s2115_s17, 1 }
   0xf   : > { %s3803_s23 = scalar_select %p2591_p6, 1, 0 }
  0x10   : > { %p2116_p9 = scmp.ge.s32.totalorder %s2512_s15, 1  ;;  %p120_p10 = scmp.lt.s32.totalorder %s2512_s15, 3 }
  0x11   : > { %p2598_p11 = por %p107_p7, %p35_p0  ;;  %p2602_p12 = por %p113_p8, %p41_p3 }
  0x12   : > { %p2606_p13 = pnand %p2116_p9, %p120_p10  ;;  %s133_s29 = sshll.u32 %s3794_s1, 4  ;;  %s134_s29 = int_to_ptr.vmem [resolvable:$true] %s133_s29 }
  0x13   : > { %s3804_s24 = scalar_select %p2598_p11, 1, 0 }
  0x14   : > { %s3805_s25 = scalar_select %p2602_p12, 1, 0 }
  0x15   : > { %s3806_s26 = scalar_select %p2606_p13, 1, 0 }
  0x16   : > { %p2315_p1 = pneg %p2606_p13  ;;  %p2332_p2 = scmp.lt.s32.totalorder %s2512_s15, 2 }
  0x17   : > { %s144_s6 = sshll.u32 %s3795_s2, 4  ;;  %s2378_s8 = scalar_lea.vmem %s134_s29, 32  ;;  %s145_s6 = int_to_ptr.vmem [resolvable:$true] %s144_s6 }
  0x18   : > { %p2619_p7 = pnand %p2315_p1, %p3797_p4  ;;  %p2628_p3 = pnand %p2332_p2, %p2585_p5 }
  0x19   : > { %p2379_p8 = scmp.ne.s32.totalorder %s134_s29, %s2378_s8  ;;  %p2386_p0 = scmp.lt.s32.totalorder %s134_s29, %s134_s29 }
  0x1a   : > { %s3808_s7 = scalar_select %p2628_p3, 1, 0 }
  0x1b   : > { %p2380_p9 = pneg %p2619_p7  ;;  %p2387_p4 = scmp.lt.s32.totalorder %s2378_s8, %s2378_s8 }
  0x1d   : > { %p2381_p10 = pnand %p2380_p9, %p2379_p8  ;;  %p2388_p12 = por %p2387_p4, %p2386_p0 }
  0x1f   : > { %p2382_p1 = pneg %p2381_p10 }
  0x21   : > { %p2389_p11 = pnand %p2388_p12, %p2382_p1 }
  0x23   : > { %2392 = shalt.err (!%p2389_p11)
}
  0x24   : > { %s2514_s9 = smov [#allocation7]   ;;  %s155_s10 = sand.u32 1, %s2508_s14  }
  0x25   : > { %2318 = dma.vmem_to_smem (!%p2619_p7), %s134_s29, 32, %s2514_s9, [#allocation6]  }
  0x26   : > { %s2393_s11 = scalar_lea.vmem %s145_s6, 16  ;;  %p2401_p8 = scmp.lt.s32.totalorder %s145_s6, %s145_s6 }
  0x27   : > { %p2394_p5 = scmp.ne.s32.totalorder %s145_s6, %s2393_s11  ;;  %p2402_p10 = scmp.lt.s32.totalorder %s2393_s11, %s2393_s11 }
  0x29   : > { %p2396_p2 = pnand %p2394_p5, %p2380_p9  ;;  %p2403_p13 = por %p2402_p10, %p2401_p8 }
  0x2b   : > { %p2397_p6 = pneg %p2396_p2 }
  0x2d   : > { %p2404_p3 = pnand %p2403_p13, %p2397_p6 }
  0x2f   : > { %2407 = shalt.err (!%p2404_p3)
}
  0x30   : > { %s2515_s17 = smov [#allocation8]   ;;  %s2120_s19 = sshll.u32 %s155_s10, 6 }
  0x31   : > { %2321 = dma.vmem_to_smem (!%p2619_p7), %s145_s6, 16, %s2515_s17, [#allocation9]  }
  0x32   : > { %s2293_s20 = sshll.u32 %s2512_s15, 10  ;;  %s159_s29 = scalar_lea.vmem [#allocation3], %s2120_s19 }
  0x33   : > { %s2649_s28 = scalar_lea.hbm %s3793_s0, %s2293_s20  ;;  %s166_s4 = sshll.u32 %s159_s29, 4  ;;  %s2651_s4 = int_to_ptr.vmem [resolvable:$true] %s166_s4 }
  0x34   : > { %s2653_s30 = scalar_lea.sflag [#allocation4], %s155_s10  ;;  %s2408_s5 = scalar_lea.hbm %s2649_s28, 1024 }
  0x35   : > { %p2409_p4 = scmp.ne.s32.totalorder %s2649_s28, %s2408_s5  ;;  %p3809_p6 = scmp.ne.s32.totalorder %s3808_s7, 0 }
  0x36   : > { %s2413_s9 = scalar_lea.hbm %s3793_s0, 2048  ;;  %p2414_p0 = scmp.lt.u32.totalorder %s2649_s28, %s3793_s0 }
  0x37   : > { %p2410_p11 = pneg %p3809_p6  ;;  %p2415_p7 = scmp.lt.u32.totalorder %s2413_s9, %s2408_s5 }
  0x38   : > { %p2417_p9 = scmp.lt.u32.totalorder %s2408_s5, %s2649_s28 }
  0x39   : > { %p2411_p12 = pnand %p2410_p11, %p2409_p4  ;;  %p2416_p3 = por %p2415_p7, %p2414_p0 }
  0x3b   : > { %p2412_p13 = pneg %p2411_p12  ;;  %p2418_p1 = por %p2417_p9, %p2416_p3 }
  0x3d   : > { %p2419_p5 = pnand %p2418_p1, %p2412_p13 }
  0x3f   : > { %2422 = shalt.err (!%p2419_p5)
}
  0x40   : > { %s2423_s10 = scalar_lea.vmem %s2651_s4, 1024  ;;  %s2516_s19 = smov [#allocation3]  }
  0x41   : > { %p2424_p2 = scmp.ne.s32.totalorder %s2651_s4, %s2423_s10  ;;  %s2428_s20 = sshll.u32 %s2516_s19, 4  ;;  %s2429_s20 = int_to_ptr.vmem [resolvable:$false] %s2428_s20 }
  0x42   : > { %s2430_s22 = scalar_lea.vmem %s2429_s20, 2048  ;;  %p2431_p4 = scmp.lt.s32.totalorder %s2651_s4, %s2429_s20 }
  0x43   : > { %p2426_p8 = pnand %p2424_p2, %p2410_p11  ;;  %p2432_p12 = scmp.lt.s32.totalorder %s2430_s22, %s2423_s10 }
  0x45   : > { %p2427_p10 = pneg %p2426_p8  ;;  %p2433_p0 = por %p2432_p12, %p2431_p4 }
  0x47   : > { %p2434_p7 = pnand %p2433_p0, %p2427_p10 }
  0x49   : > { %2437 = shalt.err (!%p2434_p7)
}
  0x4a   : > { %s2517_s27 = smov 128   ;;  %s2518_s29 = smov 8  }
  0x4b   : > { %2325 = dma.hbm_to_vmem [thread:$0]  (!%p3809_p6), %s2649_s28, 1024, %s2651_s4, %s2653_s30, %s2517_s27, %s2517_s27, %s2518_s29  }
  0x4c   : > { %p3810_p11 = scmp.ne.s32.totalorder %s3806_s26, 0 }
  0x4d   : > { %s2684_s5 = sand.u32 (!%p3810_p11), 1, %s2504_s13   ;;  %p3811_p13 = scmp.ne.s32.totalorder (!%p3810_p11), %s3803_s23, 0 }
  0x4e   : > { %178 = sbr.rel (%p3810_p11) target bundleno = 743 (0x2e7), region = 32  ;;  %s2124_s6 = sshll.u32 (!%p3810_p11), %s2684_s5, 6 }
  0x4f   : > { %s181_s8 = scalar_lea.sflag (!%p3810_p11), [#allocation4], %s2684_s5  ;;  %s2688_s9 = scalar_lea.vmem (!%p3810_p11), [#allocation3], %s2124_s6 }
  0x55   : > { %2483 = dma.done.wait (%p3811_p13), %s181_s8, 1024  }
  0x56   : > { %2485 = vsyncadd (%p3811_p13), %s181_s8, 4294966272  ;;  %p3812_p6 = scmp.eq.s32.totalorder %s2567_s16, 0 }
  0x58   : > { %2487 = dma.done.wait (%p3812_p6), [#allocation6], 32   ;;  %p3813_p3 = pmov %p3812_p6 }
  0x5a   : > { %2489 = vsyncadd (%p3813_p3), [#allocation6], 4294967264  ;;  %p3814_p9 = pmov %p3813_p3 }
  0x5b   : > { %p3815_p1 = pmov %p3813_p3 }
  0x5c   : > { %2491 = dma.done.wait (%p3814_p9), [#allocation9], 16  }
  0x5d   : > { %2493 = vsyncadd (%p3815_p1), [#allocation9], 4294967280 }
  0x5e   : > { %197 = sfence }
  0x5f   : > { %v230_v0 = vld [vmem:[%s2688_s9] sm:$0xff]  ;;  %v232_v1 = vld [vmem:[%s2688_s9 + $0x10] sm:$0xff]  ;;  %vm216_vm0 = vcmask 146432   ;;  %s2519_s23 = smov 1   ;;  %vm219_vm1 = vcmask 140288   ;;  %v231_v2 = vld [vmem:[%s2688_s9 + $0x8] sm:$0xff] }
  0x60   : > { %246 = vrot.lane.b32.xlu0 %v230_v0, %s2519_s23  ;;  %250 = vrot.lane.b32.xlu1 %v232_v1, %s2519_s23  ;;  %v233_v3 = vld [vmem:[%s2688_s9 + $0x18] sm:$0xff]  ;;  %v2520_v4 = vmov 0.0   ;;  %v234_v5 = vld [vmem:[%s2688_s9 + $0x20] sm:$0xff]  ;;  %vm270_vm2 = vcmask 138248   ;;  %s2134_s26 = sld [smem:[#allocation7 + $0x1]]  ;;  %s2135_s7 = sld [smem:[#allocation7 + $0x25]] }
  0x61   : > { %217 = vst.msk [vmem:[#allocation2] sm:$0xff] %vm216_vm0, %v2520_v4  ;;  %218 = vst.msk [vmem:[#allocation2 + $0x8] sm:$0xff] %vm216_vm0, %v2520_v4  ;;  %v235_v6 = vld [vmem:[%s2688_s9 + $0x28] sm:$0xff]  ;;  %v236_v7 = vld [vmem:[%s2688_s9 + $0x30] sm:$0xff]  ;;  %s2136_s28 = sld [smem:[#allocation7 + $0x49]]  ;;  %s2137_s4 = sld [smem:[#allocation7 + $0x6d]] }
  0x62   : > { %221 = vst.msk [vmem:[#allocation2 + $0x18] sm:$0xff] %vm216_vm0, %v2520_v4  ;;  %222 = vst.msk [vmem:[#allocation2 + $0x20] sm:$0xff] %vm216_vm0, %v2520_v4  ;;  %v237_v8 = vld [vmem:[%s2688_s9 + $0x38] sm:$0xff]  ;;  %s2521_s30 = smov 127   ;;  %s2138_s11 = sld [smem:[#allocation7 + $0x2]]  ;;  %vm1958_vm3 = vcmask 125952  }
  0x63   : > { %224 = vst.msk [vmem:[#allocation2 + $0x30] sm:$0xff] %vm216_vm0, %v2520_v4  ;;  %225 = vst.msk [vmem:[#allocation2 + $0x38] sm:$0xff] %vm216_vm0, %v2520_v4  ;;  %s2139_s17 = sld [smem:[#allocation7 + $0x26]]  ;;  %s2140_s10 = sld [smem:[#allocation7 + $0x4a]] }
  0x64   : > { %227 = vst.msk [vmem:[#allocation2 + $0x48] sm:$0xff] %vm216_vm0, %v2520_v4  ;;  %228 = vst.msk [vmem:[#allocation2 + $0x50] sm:$0xff] %vm216_vm0, %v2520_v4  ;;  %248 = vrot.lane.b32.xlu0 %v231_v2, %s2519_s23  ;;  %252 = vrot.lane.b32.xlu1 %v233_v3, %s2519_s23  ;;  %s2141_s19 = sld [smem:[#allocation7 + $0x6e]]  ;;  %s2522_s20 = smov 126  }
  0x65   : > { %220 = vst.msk [vmem:[#allocation2 + $0x10] sm:$0x3] %vm219_vm1, %v2520_v4  ;;  %223 = vst.msk [vmem:[#allocation2 + $0x28] sm:$0x3] %vm219_vm1, %v2520_v4  ;;  %s2146_s22 = sld [smem:[#allocation7 + $0x4]]  ;;  %s2147_s27 = sld [smem:[#allocation7 + $0x28]] }
  0x66   : > { %226 = vst.msk [vmem:[#allocation2 + $0x40] sm:$0x3] %vm219_vm1, %v2520_v4  ;;  %229 = vst.msk [vmem:[#allocation2 + $0x58] sm:$0x3] %vm219_vm1, %v2520_v4  ;;  %v314_v13 = vstv %s2134_s26  ;;  %v328_v18 = vstv %s2135_s7  ;;  %s2148_s29 = sld [smem:[#allocation7 + $0x4c]]  ;;  %s2149_s6 = sld [smem:[#allocation7 + $0x70]] }
  0x67   : > { %v342_v24 = vstv %s2136_s28  ;;  %v356_v27 = vstv %s2137_s4  ;;  %s2150_s8 = sld [smem:[#allocation7 + $0x5]]  ;;  %s2151_s9 = sld [smem:[#allocation7 + $0x29]] }
  0x68   : > { %254 = vrot.lane.b32.xlu0 %v234_v5, %s2519_s23  ;;  %256 = vrot.lane.b32.xlu1 %v235_v6, %s2519_s23  ;;  %v370_v30 = vstv %s2138_s11  ;;  %s2153_s26 = sld [smem:[#allocation7 + $0x71]]  ;;  %s2158_s7 = sld [smem:[#allocation7 + $0x7]] }
  0x69   : > { %v384_v33 = vstv %s2139_s17  ;;  %v398_v36 = vstv %s2140_s10  ;;  %s2159_s28 = sld [smem:[#allocation7 + $0x2b]]  ;;  %s2160_s4 = sld [smem:[#allocation7 + $0x4f]] }
  0x6a   : > { %v412_v39 = vstv %s2141_s19  ;;  %s2161_s11 = sld [smem:[#allocation7 + $0x73]]  ;;  %s2162_s17 = sld [smem:[#allocation7 + $0x8]] }
  0x6b   : > { %v452_v43 = vstv %s2146_s22  ;;  %v466_v47 = vstv %s2147_s27  ;;  %s2163_s10 = sld [smem:[#allocation7 + $0x2c]]  ;;  %s2164_s19 = sld [smem:[#allocation7 + $0x50]] }
  0x6c   : > { %258 = vrot.lane.b32.xlu0 %v236_v7, %s2519_s23  ;;  %260 = vrot.lane.b32.xlu1 %v237_v8, %s2519_s23  ;;  %v480_v50 = vstv %s2148_s29  ;;  %v494_v53 = vstv %s2149_s6  ;;  %s2152_s23 = sld [smem:[#allocation7 + $0x4d]]  ;;  %s2165_s22 = sld [smem:[#allocation7 + $0x74]] }
  0x6d   : > { %v508_v56 = vstv %s2150_s8  ;;  %v522_v59 = vstv %s2151_s9  ;;  %s2170_s27 = sld [smem:[#allocation7 + $0xa]]  ;;  %s2171_s29 = sld [smem:[#allocation7 + $0x2e]] }
  0x6e   : > { %v550_v1 = vstv %s2153_s26  ;;  %v590_v5 = vstv %s2158_s7  ;;  %s2172_s6 = sld [smem:[#allocation7 + $0x52]]  ;;  %s2173_s8 = sld [smem:[#allocation7 + $0x76]] }
  0x6f   : > { %s2174_s9 = sld [smem:[#allocation7 + $0xb]]  ;;  %s2848_s7 = sld [smem:[#allocation7 + $0x77]] }
  0x70   : > { %s2842_s26 = sld [smem:[#allocation7 + $0x53]]  ;;  %p3816_p2 = scmp.ne.s32.totalorder %s3804_s24, 0 }
  0x72   : > { %v536_v62 = vstv %s2152_s23  ;;  %s2175_s23 = sld [smem:[#allocation7 + $0x2f]] }
  0xd2   : > { %v247_v9 = vpop.permute.xlu0 %246  ;;  %v251_v10 = vpop.permute.xlu1 %250 }
  0xd3   : > { %271 = vst.msk [vmem:[#allocation2 + $0x1] sm:$0xff] %vm270_vm2, %v247_v9  ;;  %273 = vst.msk [vmem:[#allocation2 + $0x19] sm:$0xff] %vm270_vm2, %v251_v10  ;;  %v604_v9 = vstv %s2159_s28  ;;  %s2852_s28 = sld [smem:[#allocation7]] }
  0xd6   : > { %v249_v11 = vpop.permute.xlu0 %248  ;;  %v253_v12 = vpop.permute.xlu1 %252 }
  0xd7   : > { %272 = vst.msk [vmem:[#allocation2 + $0x9] sm:$0xff] %vm270_vm2, %v249_v11  ;;  %274 = vst.msk [vmem:[#allocation2 + $0x21] sm:$0xff] %vm270_vm2, %v253_v12  ;;  %v618_v12 = vstv %s2160_s4  ;;  %s2857_s4 = sld [smem:[#allocation7 + $0xd]] }
  0xda   : > { %v2714_v14 = vld [vmem:[#allocation2] sm:$0xff]  ;;  %v255_v15 = vpop.permute.xlu0 %254  ;;  %v257_v16 = vpop.permute.xlu1 %256 }
  0xdb   : > { %v315_v17 = vmul.f32 %v314_v13, %v2714_v14  ;;  %275 = vst.msk [vmem:[#allocation2 + $0x31] sm:$0xff] %vm270_vm2, %v255_v15  ;;  %276 = vst.msk [vmem:[#allocation2 + $0x39] sm:$0xff] %vm270_vm2, %v257_v16  ;;  %v329_v23 = vmul.f32 %v328_v18, %v2714_v14  ;;  %v343_v26 = vmul.f32 %v342_v24, %v2714_v14  ;;  %v2750_v42 = vld [vmem:[#allocation2 + $0x1] sm:$0xff]  ;;  %v632_v16 = vstv %s2161_s11  ;;  %s2859_s11 = sld [smem:[#allocation8]] }
  0xdc   : > { %v357_v29 = vmul.f32 %v356_v27, %v2714_v14  ;;  %v371_v32 = vmul.f32 %v370_v30, %v2714_v14  ;;  %v385_v35 = vmul.f32 %v384_v33, %v2714_v14  ;;  %v399_v38 = vmul.f32 %v398_v36, %v2714_v14 }
  0xdd   : > { %319 = vrot.lane.b32.xlu0 %v315_v17, %s2521_s30  ;;  %v413_v41 = vmul.f32 %v412_v39, %v2714_v14  ;;  %v453_v45 = vmul.f32 %v452_v43, %v2750_v42  ;;  %v467_v49 = vmul.f32 %v466_v47, %v2750_v42  ;;  %v481_v52 = vmul.f32 %v480_v50, %v2750_v42 }
  0xde   : > { %v2720_v19 = vld [vmem:[#allocation2 + $0x8] sm:$0xff]  ;;  %v259_v20 = vpop.permute.xlu0 %258  ;;  %v261_v21 = vpop.permute.xlu1 %260  ;;  %v495_v55 = vmul.f32 %v494_v53, %v2750_v42  ;;  %v509_v58 = vmul.f32 %v508_v56, %v2750_v42  ;;  %v523_v61 = vmul.f32 %v522_v59, %v2750_v42  ;;  %v537_v0 = vmul.f32 %v536_v62, %v2750_v42 }
  0xdf   : > { %v316_v22 = vmul.f32 %v314_v13, %v2720_v19  ;;  %277 = vst.msk [vmem:[#allocation2 + $0x49] sm:$0xff] %vm270_vm2, %v259_v20  ;;  %278 = vst.msk [vmem:[#allocation2 + $0x51] sm:$0xff] %vm270_vm2, %v261_v21  ;;  %v330_v25 = vmul.f32 %v328_v18, %v2720_v19  ;;  %v344_v28 = vmul.f32 %v342_v24, %v2720_v19  ;;  %v2756_v46 = vld [vmem:[#allocation2 + $0x9] sm:$0xff]  ;;  %v646_v20 = vstv %s2162_s17  ;;  %s2863_s17 = sld [smem:[#allocation7 + $0x24]] }
  0xe0   : > { %v358_v31 = vmul.f32 %v356_v27, %v2720_v19  ;;  %v372_v34 = vmul.f32 %v370_v30, %v2720_v19  ;;  %v386_v37 = vmul.f32 %v384_v33, %v2720_v19  ;;  %v400_v40 = vmul.f32 %v398_v36, %v2720_v19  ;;  %v2786_v4 = vld [vmem:[#allocation2 + $0x2] sm:$0xff]  ;;  %v2792_v8 = vld [vmem:[#allocation2 + $0xa] sm:$0xff]  ;;  %v2820_v30 = vld [vmem:[#allocation2 + $0x18] sm:$0xff] }
  0xe1   : > { %321 = vrot.lane.b32.xlu1 %v316_v22, %s2521_s30  ;;  %333 = vrot.lane.b32.xlu0 %v329_v23, %s2521_s30  ;;  %v414_v44 = vmul.f32 %v412_v39, %v2720_v19  ;;  %v454_v48 = vmul.f32 %v452_v43, %v2756_v46  ;;  %v468_v51 = vmul.f32 %v466_v47, %v2756_v46  ;;  %v660_v23 = vstv %s2163_s10  ;;  %v2828_v36 = vld [vmem:[#allocation2 + $0x20] sm:$0xff]  ;;  %s2871_s10 = sld [smem:[#allocation7 + $0x48]] }
  0xe2   : > { %v482_v54 = vmul.f32 %v480_v50, %v2756_v46  ;;  %v496_v57 = vmul.f32 %v494_v53, %v2756_v46  ;;  %v510_v60 = vmul.f32 %v508_v56, %v2756_v46  ;;  %v524_v63 = vmul.f32 %v522_v59, %v2756_v46 }
  0xe3   : > { %v538_v2 = vmul.f32 %v536_v62, %v2756_v46  ;;  %v551_v3 = vmul.f32 %v550_v1, %v2750_v42  ;;  %v552_v6 = vmul.f32 %v550_v1, %v2756_v46  ;;  %v591_v7 = vmul.f32 %v590_v5, %v2786_v4 }
  0xe4   : > { %v592_v10 = vmul.f32 %v590_v5, %v2792_v8  ;;  %v605_v11 = vmul.f32 %v604_v9, %v2786_v4  ;;  %v606_v13 = vmul.f32 %v604_v9, %v2792_v8  ;;  %v619_v15 = vmul.f32 %v618_v12, %v2786_v4 }
  0xe5   : > { %335 = vrot.lane.b32.xlu1 %v330_v25, %s2521_s30  ;;  %347 = vrot.lane.b32.xlu0 %v343_v26, %s2521_s30  ;;  %v620_v17 = vmul.f32 %v618_v12, %v2792_v8  ;;  %v633_v18 = vmul.f32 %v632_v16, %v2786_v4  ;;  %v634_v21 = vmul.f32 %v632_v16, %v2792_v8  ;;  %v674_v26 = vstv %s2164_s19  ;;  %s2874_s19 = sld [smem:[#allocation7 + $0x31]] }
  0xe6   : > { %v647_v22 = vmul.f32 %v646_v20, %v2786_v4  ;;  %v648_v24 = vmul.f32 %v646_v20, %v2792_v8  ;;  %v661_v25 = vmul.f32 %v660_v23, %v2786_v4  ;;  %v662_v27 = vmul.f32 %v660_v23, %v2792_v8 }
  0xe7   : > { %v867_v5 = vstv %s2857_s4  ;;  %v302_v9 = vstv %s2871_s10  ;;  %s2944_s4 = sld [smem:[#allocation7 + $0x6f]]  ;;  %s2987_s10 = sld [smem:[#allocation7 + $0x7a]] }
  0xe9   : > { %349 = vrot.lane.b32.xlu1 %v344_v28, %s2521_s30  ;;  %361 = vrot.lane.b32.xlu0 %v357_v29, %s2521_s30  ;;  %v675_v28 = vmul.f32 %v674_v26, %v2786_v4  ;;  %v688_v29 = vstv %s2165_s22  ;;  %s2877_s22 = sld [smem:[#allocation8 + $0x1]] }
  0xea   : > { %v689_v33 = vmul.f32 %v688_v29, %v2786_v4 }
  0xeb   : > { %v881_v20 = vstv %s2874_s19  ;;  %s3001_s19 = sld [smem:[#allocation7 + $0x10]] }
  0xed   : > { %363 = vrot.lane.b32.xlu1 %v358_v31, %s2521_s30  ;;  %375 = vrot.lane.b32.xlu0 %v371_v32, %s2522_s20  ;;  %v729_v31 = vstv %s2170_s27  ;;  %v676_v32 = vmul.f32 %v674_v26, %v2792_v8  ;;  %s2881_s27 = sld [smem:[#allocation7 + $0x3]]  ;;  %v303_v26 = vmul.f32 %v302_v9, %v2714_v14 }
  0xf1   : > { %377 = vrot.lane.b32.xlu1 %v372_v34, %s2522_s20  ;;  %389 = vrot.lane.b32.xlu0 %v385_v35, %s2522_s20  ;;  %v730_v34 = vmul.f32 %v729_v31, %v2820_v30  ;;  %v690_v35 = vmul.f32 %v688_v29, %v2792_v8 }
  0xf3   : > { %v428_v23 = vstv %s2881_s27  ;;  %s3015_s27 = sld [smem:[#allocation7 + $0x6]] }
  0xf5   : > { %391 = vrot.lane.b32.xlu1 %v386_v37, %s2522_s20  ;;  %403 = vrot.lane.b32.xlu0 %v399_v38, %s2522_s20  ;;  %v743_v37 = vstv %s2171_s29  ;;  %v731_v38 = vmul.f32 %v729_v31, %v2828_v36  ;;  %s2883_s29 = sld [smem:[#allocation8 + $0x2]] }
  0xf6   : > { %v744_v39 = vmul.f32 %v743_v37, %v2820_v30 }
  0xf9   : > { %405 = vrot.lane.b32.xlu1 %v400_v40, %s2522_s20  ;;  %417 = vrot.lane.b32.xlu0 %v413_v41, %s2522_s20  ;;  %v757_v40 = vstv %s2172_s6  ;;  %v745_v41 = vmul.f32 %v743_v37, %v2828_v36  ;;  %s2885_s6 = sld [smem:[#allocation8 + $0x3]] }
  0xfa   : > { %v758_v43 = vmul.f32 %v757_v40, %v2820_v30 }
  0xfd   : > { %419 = vrot.lane.b32.xlu1 %v414_v44, %s2522_s20  ;;  %457 = vrot.lane.b32.xlu0 %v453_v45, %s2521_s30  ;;  %v771_v44 = vstv %s2173_s8  ;;  %v759_v45 = vmul.f32 %v757_v40, %v2828_v36  ;;  %s2893_s8 = sld [smem:[#allocation7 + $0x6c]] }
  0xfe   : > { %v772_v47 = vmul.f32 %v771_v44, %v2820_v30 }
 0x101   : > { %459 = vrot.lane.b32.xlu1 %v454_v48, %s2521_s30  ;;  %471 = vrot.lane.b32.xlu0 %v467_v49, %s2521_s30  ;;  %v785_v48 = vstv %s2174_s9  ;;  %v773_v49 = vmul.f32 %v771_v44, %v2828_v36  ;;  %s2895_s9 = sld [smem:[#allocation7 + $0x55]] }
 0x102   : > { %v786_v50 = vmul.f32 %v785_v48, %v2820_v30  ;;  %v787_v53 = vmul.f32 %v785_v48, %v2828_v36 }
 0x105   : > { %473 = vrot.lane.b32.xlu1 %v468_v51, %s2521_s30  ;;  %485 = vrot.lane.b32.xlu0 %v481_v52, %s2521_s30  ;;  %v799_v51 = vstv %s2175_s23  ;;  %s2905_s23 = sld [smem:[#allocation7 + $0x79]] }
 0x109   : > { %487 = vrot.lane.b32.xlu1 %v482_v54, %s2521_s30  ;;  %499 = vrot.lane.b32.xlu0 %v495_v55, %s2521_s30  ;;  %v800_v54 = vmul.f32 %v799_v51, %v2820_v30  ;;  %v813_v55 = vstv %s2842_s26  ;;  %s2907_s26 = sld [smem:[#allocation7 + $0x27]] }
 0x10a   : > { %v814_v59 = vmul.f32 %v813_v55, %v2820_v30 }
 0x10d   : > { %501 = vrot.lane.b32.xlu1 %v496_v57, %s2521_s30  ;;  %513 = vrot.lane.b32.xlu0 %v509_v58, %s2522_s20  ;;  %v801_v58 = vmul.f32 %v799_v51, %v2828_v36 }
 0x111   : > { %515 = vrot.lane.b32.xlu1 %v510_v60, %s2522_s20  ;;  %527 = vrot.lane.b32.xlu0 %v523_v61, %s2522_s20  ;;  %v827_v60 = vstv %s2848_s7  ;;  %v290_v61 = vstv %s2852_s28  ;;  %s2925_s7 = sld [smem:[#allocation7 + $0xe]]  ;;  %s2928_s28 = sld [smem:[#allocation7 + $0x4b]] }
 0x112   : > { %v828_v1 = vmul.f32 %v827_v60, %v2820_v30  ;;  %v829_v12 = vmul.f32 %v827_v60, %v2828_v36 }
 0x115   : > { %529 = vrot.lane.b32.xlu1 %v524_v63, %s2522_s20  ;;  %541 = vrot.lane.b32.xlu0 %v537_v0, %s2522_s20  ;;  %v815_v0 = vmul.f32 %v813_v55, %v2828_v36 }
 0x117   : > { %v440_v60 = vstv %s2928_s28  ;;  %s3075_s28 = sld [smem:[#allocation7 + $0x59]] }
 0x119   : > { %543 = vrot.lane.b32.xlu1 %v538_v2, %s2522_s20  ;;  %555 = vrot.lane.b32.xlu0 %v551_v3, %s2522_s20  ;;  %v2897_v2 = vld [vmem:[#allocation2 + $0x19] sm:$0xff]  ;;  %v291_v3 = vmul.f32 %v290_v61, %v2714_v14 }
 0x11d   : > { %557 = vrot.lane.b32.xlu1 %v552_v6, %s2522_s20  ;;  %595 = vrot.lane.b32.xlu0 %v591_v7, %s2521_s30  ;;  %v280_v6 = vstv %s2859_s11  ;;  %v296_v7 = vstv %s2863_s17  ;;  %s2954_s11 = sld [smem:[#allocation7 + $0x32]]  ;;  %s2971_s17 = sld [smem:[#allocation7 + $0x56]] }
 0x11e   : > { %v293_v16 = vadd.f32 %v291_v3, %v280_v6 }
 0x121   : > { %597 = vrot.lane.b32.xlu1 %v592_v10, %s2521_s30  ;;  %609 = vrot.lane.b32.xlu0 %v605_v11, %s2521_s30 }
 0x125   : > { %611 = vrot.lane.b32.xlu1 %v606_v13, %s2521_s30  ;;  %623 = vrot.lane.b32.xlu0 %v619_v15, %s2521_s30  ;;  %v868_v13 = vmul.f32 %v867_v5, %v2897_v2  ;;  %v2916_v15 = vld [vmem:[#allocation2 + $0x21] sm:$0xff] }
 0x129   : > { %625 = vrot.lane.b32.xlu1 %v620_v17, %s2521_s30  ;;  %637 = vrot.lane.b32.xlu0 %v633_v18, %s2521_s30  ;;  %v292_v17 = vmul.f32 %v290_v61, %v2720_v19  ;;  %v297_v18 = vmul.f32 %v296_v7, %v2714_v14 }
 0x12d   : > { %639 = vrot.lane.b32.xlu1 %v634_v21, %s2521_s30  ;;  %651 = vrot.lane.b32.xlu0 %v647_v22, %s2522_s20  ;;  %v282_v21 = vstv %s2877_s22  ;;  %v298_v22 = vmul.f32 %v296_v7, %v2720_v19  ;;  %s3011_s22 = sld [smem:[#allocation7 + $0x34]] }
 0x12e   : > { %v299_v37 = vadd.f32 %v297_v18, %v282_v21 }
 0x12f   : > { %v300_v40 = vadd.f32 %v298_v22, %v282_v21 }
 0x131   : > { %653 = vrot.lane.b32.xlu1 %v648_v24, %s2522_s20  ;;  %665 = vrot.lane.b32.xlu0 %v661_v25, %s2522_s20  ;;  %v284_v25 = vstv %s2883_s29  ;;  %s3022_s29 = sld [smem:[#allocation7 + $0x58]] }
 0x135   : > { %667 = vrot.lane.b32.xlu1 %v662_v27, %s2522_s20  ;;  %679 = vrot.lane.b32.xlu0 %v675_v28, %s2522_s20  ;;  %v286_v27 = vstv %s2885_s6  ;;  %v308_v28 = vstv %s2893_s8  ;;  %s3026_s6 = sld [smem:[#allocation7 + $0x2a]]  ;;  %s3030_s8 = sld [smem:[#allocation7 + $0x7c]] }
 0x139   : > { %681 = vrot.lane.b32.xlu1 %v676_v32, %s2522_s20  ;;  %693 = vrot.lane.b32.xlu0 %v689_v33, %s2522_s20  ;;  %v869_v32 = vmul.f32 %v867_v5, %v2916_v15  ;;  %v882_v33 = vmul.f32 %v881_v20, %v2897_v2 }
 0x13d   : > { %695 = vrot.lane.b32.xlu1 %v690_v35, %s2522_s20  ;;  %734 = vrot.lane.b32.xlu0 %v730_v34, %s2521_s30  ;;  %v895_v34 = vstv %s2895_s9  ;;  %v294_v35 = vadd.f32 %v292_v17, %v280_v6  ;;  %v446_v17 = vstv %s2944_s4  ;;  %s3038_s9 = sld [smem:[#allocation7 + $0x4e]]  ;;  %s3091_s4 = sld [smem:[#allocation7 + $0x7d]] }
 0x141   : > { %736 = vrot.lane.b32.xlu1 %v731_v38, %s2521_s30  ;;  %748 = vrot.lane.b32.xlu0 %v744_v39, %s2521_s30  ;;  %v429_v39 = vmul.f32 %v428_v23, %v2750_v42 }
 0x145   : > { %750 = vrot.lane.b32.xlu1 %v745_v41, %s2521_s30  ;;  %762 = vrot.lane.b32.xlu0 %v758_v43, %s2521_s30  ;;  %v909_v41 = vstv %s2905_s23  ;;  %v434_v43 = vstv %s2907_s26  ;;  %s3043_s23 = sld [smem:[#allocation7 + $0x11]]  ;;  %s3050_s26 = sld [smem:[#allocation7 + $0x72]] }
 0x149   : > { %764 = vrot.lane.b32.xlu1 %v759_v45, %s2521_s30  ;;  %776 = vrot.lane.b32.xlu0 %v772_v47, %s2521_s30  ;;  %v305_v47 = vadd.f32 %v303_v26, %v284_v25  ;;  %v911_v26 = vmul.f32 %v909_v41, %v2916_v15 }
 0x14d   : > { %778 = vrot.lane.b32.xlu1 %v773_v49, %s2521_s30  ;;  %790 = vrot.lane.b32.xlu0 %v786_v50, %s2522_s20  ;;  %v304_v49 = vmul.f32 %v302_v9, %v2720_v19  ;;  %v309_v50 = vmul.f32 %v308_v28, %v2714_v14  ;;  %v923_v14 = vstv %s2925_s7  ;;  %s3059_s7 = sld [smem:[#allocation7 + $0x35]] }
 0x14f   : > { %v320_v52 = vpop.permute.xlu0 %319  ;;  %v306_v5 = vadd.f32 %v304_v49, %v284_v25  ;;  %v311_v6 = vadd.f32 %v309_v50, %v286_v27  ;;  %v965_v50 = vstv %s2987_s10  ;;  %s3119_s10 = sld [smem:[#allocation7 + $0x9]] }
 0x150   : > { %v325_v24 = vadd.f32 %v320_v52, %v293_v16 }
 0x151   : > { %792 = vrot.lane.b32.xlu1 %v787_v53, %s2522_s20  ;;  %804 = vrot.lane.b32.xlu0 %v800_v54, %s2522_s20  ;;  %v883_v53 = vmul.f32 %v881_v20, %v2916_v15  ;;  %v896_v54 = vmul.f32 %v895_v34, %v2897_v2 }
 0x153   : > { %v2865_v56 = vpop.permute.xlu1 %321  ;;  %v2867_v57 = vpop.permute.xlu0 %333 }
 0x154   : > { %v326_v44 = vadd.f32 %v2865_v56, %v294_v35  ;;  %v339_v45 = vadd.f32 %v2867_v57, %v299_v37  ;;  %v430_v57 = vmul.f32 %v428_v23, %v2756_v46 }
 0x155   : > { %806 = vrot.lane.b32.xlu1 %v801_v58, %s2522_s20  ;;  %818 = vrot.lane.b32.xlu0 %v814_v59, %s2522_s20  ;;  %v435_v58 = vmul.f32 %v434_v43, %v2750_v42  ;;  %v310_v59 = vmul.f32 %v308_v28, %v2720_v19  ;;  %v897_v19 = vmul.f32 %v895_v34, %v2916_v15 }
 0x156   : > { %v924_v28 = vmul.f32 %v923_v14, %v2897_v2 }
 0x157   : > { %v2887_v62 = vpop.permute.xlu1 %335  ;;  %v2889_v63 = vpop.permute.xlu0 %347  ;;  %v312_v23 = vadd.f32 %v310_v59, %v286_v27 }
 0x158   : > { %v340_v61 = vadd.f32 %v2887_v62, %v300_v40  ;;  %v436_v62 = vmul.f32 %v434_v43, %v2756_v46  ;;  %v951_v43 = vstv %s2971_s17  ;;  %s3115_s17 = sld [smem:[#allocation7 + $0x37]] }
 0x159   : > { %820 = vrot.lane.b32.xlu1 %v815_v0, %s2522_s20  ;;  %832 = vrot.lane.b32.xlu0 %v828_v1, %s2522_s20  ;;  %v353_v0 = vadd.f32 %v2889_v63, %v305_v47  ;;  %v441_v63 = vmul.f32 %v440_v60, %v2750_v42  ;;  %v952_v49 = vmul.f32 %v951_v43, %v2897_v2 }
 0x15b   : > { %v2910_v10 = vpop.permute.xlu1 %349  ;;  %v2912_v11 = vpop.permute.xlu0 %361 }
 0x15c   : > { %v354_v18 = vadd.f32 %v2910_v10, %v306_v5  ;;  %v367_v20 = vadd.f32 %v2912_v11, %v311_v6  ;;  %v442_v10 = vmul.f32 %v440_v60, %v2756_v46  ;;  %v447_v11 = vmul.f32 %v446_v17, %v2750_v42 }
 0x15d   : > { %834 = vrot.lane.b32.xlu1 %v829_v12, %s2522_s20  ;;  %872 = vrot.lane.b32.xlu0 %v868_v13, %s2521_s30  ;;  %v910_v12 = vmul.f32 %v909_v41, %v2897_v2  ;;  %v448_v42 = vmul.f32 %v446_v17, %v2756_v46  ;;  %v1019_v60 = vstv %s3011_s22  ;;  %s3130_s22 = sld [smem:[#allocation7 + $0x2d]] }
 0x15f   : > { %v2934_v29 = vpop.permute.xlu1 %363  ;;  %v376_v31 = vpop.permute.xlu0 %375 }
 0x160   : > { %v381_v38 = vadd.f32 %v376_v31, %v325_v24  ;;  %v937_v31 = vstv %s2954_s11  ;;  %v368_v27 = vadd.f32 %v2934_v29, %v312_v23  ;;  %s3105_s11 = sld [smem:[#allocation7 + $0x13]] }
 0x161   : > { %874 = vrot.lane.b32.xlu1 %v869_v32, %s2521_s30  ;;  %886 = vrot.lane.b32.xlu0 %v882_v33, %s2521_s30  ;;  %v938_v40 = vmul.f32 %v937_v31, %v2897_v2  ;;  %v939_v47 = vmul.f32 %v937_v31, %v2916_v15 }
 0x162   : > { %v2948_v48 = vadd.f32 %v429_v39, %v381_v38  ;;  %v925_v39 = vmul.f32 %v923_v14, %v2916_v15  ;;  %v3032_v14 = vld [vmem:[#allocation2 + $0x22] sm:$0xff] }
 0x163   : > { %v378_v51 = vpop.permute.xlu1 %377  ;;  %v390_v52 = vpop.permute.xlu0 %389 }
 0x164   : > { %v382_v55 = vadd.f32 %v378_v51, %v326_v44  ;;  %v395_v56 = vadd.f32 %v390_v52, %v339_v45  ;;  %v953_v52 = vmul.f32 %v951_v43, %v2916_v15  ;;  %v584_v43 = vstv %s3050_s26  ;;  %s3195_s26 = sld [smem:[#allocation7 + $0x80]] }
 0x165   : > { %888 = vrot.lane.b32.xlu1 %v883_v53, %s2521_s30  ;;  %900 = vrot.lane.b32.xlu0 %v896_v54, %s2521_s30  ;;  %v966_v53 = vmul.f32 %v965_v50, %v2897_v2  ;;  %v3019_v54 = vld [vmem:[#allocation2 + $0x1a] sm:$0xff] }
 0x166   : > { %v2965_v1 = vadd.f32 %v430_v57, %v382_v55  ;;  %v2967_v3 = vadd.f32 %v435_v58, %v395_v56  ;;  %v1005_v55 = vstv %s3001_s19  ;;  %v967_v58 = vmul.f32 %v965_v50, %v2916_v15  ;;  %s3126_s19 = sld [smem:[#allocation7 + $0x5b]] }
 0x167   : > { %v392_v7 = vpop.permute.xlu1 %391  ;;  %v404_v9 = vpop.permute.xlu0 %403  ;;  %v1006_v59 = vmul.f32 %v1005_v55, %v3019_v54 }
 0x168   : > { %v396_v13 = vadd.f32 %v392_v7, %v340_v61  ;;  %v409_v16 = vadd.f32 %v404_v9, %v353_v0  ;;  %v566_v61 = vstv %s3015_s27  ;;  %v1007_v7 = vmul.f32 %v1005_v55, %v3032_v14  ;;  %s3134_s27 = sld [smem:[#allocation7 + $0x7f]] }
 0x169   : > { %902 = vrot.lane.b32.xlu1 %v897_v19, %s2521_s30  ;;  %914 = vrot.lane.b32.xlu0 %v910_v12, %s2521_s30  ;;  %v1020_v9 = vmul.f32 %v1019_v60, %v3019_v54  ;;  %v1033_v12 = vstv %s3022_s29  ;;  %s3142_s29 = sld [smem:[#allocation7 + $0x51]] }
 0x16a   : > { %v2980_v21 = vadd.f32 %v436_v62, %v396_v13  ;;  %v2982_v22 = vadd.f32 %v441_v63, %v409_v16  ;;  %v567_v13 = vmul.f32 %v566_v61, %v2786_v4  ;;  %v572_v16 = vstv %s3026_s6  ;;  %s3147_s6 = sld [smem:[#allocation7 + $0x14]] }
 0x16b   : > { %v406_v24 = vpop.permute.xlu1 %405  ;;  %v418_v25 = vpop.permute.xlu0 %417  ;;  %v1034_v23 = vmul.f32 %v1033_v12, %v3019_v54 }
 0x16c   : > { %v410_v32 = vadd.f32 %v406_v24, %v354_v18  ;;  %v423_v33 = vadd.f32 %v418_v25, %v367_v20  ;;  %v1021_v20 = vmul.f32 %v1019_v60, %v3032_v14  ;;  %v1047_v24 = vstv %s3030_s8  ;;  %s3154_s8 = sld [smem:[#allocation7 + $0x75]] }
 0x16d   : > { %916 = vrot.lane.b32.xlu1 %v911_v26, %s2521_s30  ;;  %928 = vrot.lane.b32.xlu0 %v924_v28, %s2522_s20  ;;  %v568_v28 = vmul.f32 %v566_v61, %v2792_v8 }
 0x16e   : > { %v2994_v34 = vadd.f32 %v442_v10, %v410_v32  ;;  %v2996_v35 = vadd.f32 %v447_v11, %v423_v33 }
 0x16f   : > { %v420_v37 = vpop.permute.xlu1 %419  ;;  %v458_v38 = vpop.permute.xlu0 %457 }
 0x170   : > { %v424_v41 = vadd.f32 %v420_v37, %v368_v27  ;;  %v463_v0 = vadd.f32 %v458_v38, %v2948_v48  ;;  %v1035_v37 = vmul.f32 %v1033_v12, %v3032_v14  ;;  %v1048_v38 = vmul.f32 %v1047_v24, %v3019_v54 }
 0x171   : > { %930 = vrot.lane.b32.xlu1 %v925_v39, %s2522_s20  ;;  %942 = vrot.lane.b32.xlu0 %v938_v40, %s2522_s20  ;;  %v1061_v39 = vstv %s3043_s23  ;;  %s3179_s23 = sld [smem:[#allocation7 + $0x5c]] }
 0x172   : > { %v3006_v29 = vadd.f32 %v448_v42, %v424_v41  ;;  %v1063_v61 = vmul.f32 %v1061_v39, %v3032_v14 }
 0x173   : > { %v460_v44 = vpop.permute.xlu1 %459  ;;  %v472_v45 = vpop.permute.xlu0 %471 }
 0x174   : > { %v464_v48 = vadd.f32 %v460_v44, %v2965_v1  ;;  %v477_v62 = vadd.f32 %v472_v45, %v2967_v3  ;;  %v573_v1 = vmul.f32 %v572_v16, %v2786_v4  ;;  %v578_v3 = vstv %s3038_s9  ;;  %s3163_s9 = sld [smem:[#allocation7 + $0x38]] }
 0x175   : > { %944 = vrot.lane.b32.xlu1 %v939_v47, %s2522_s20  ;;  %956 = vrot.lane.b32.xlu0 %v952_v49, %s2522_s20 }
 0x177   : > { %v474_v46 = vpop.permute.xlu1 %473  ;;  %v486_v51 = vpop.permute.xlu0 %485 }
 0x178   : > { %v478_v31 = vadd.f32 %v474_v46, %v2980_v21  ;;  %v491_v32 = vadd.f32 %v486_v51, %v2982_v22  ;;  %v574_v21 = vmul.f32 %v572_v16, %v2792_v8  ;;  %v579_v22 = vmul.f32 %v578_v3, %v2786_v4 }
 0x179   : > { %958 = vrot.lane.b32.xlu1 %v953_v52, %s2522_s20  ;;  %970 = vrot.lane.b32.xlu0 %v966_v53, %s2522_s20  ;;  %v1049_v46 = vmul.f32 %v1047_v24, %v3032_v14  ;;  %v1062_v51 = vmul.f32 %v1061_v39, %v3019_v54  ;;  %v1075_v52 = vstv %s3059_s7  ;;  %s3209_s7 = sld [smem:[#allocation7 + $0x16]] }
 0x17b   : > { %v488_v56 = vpop.permute.xlu1 %487  ;;  %v500_v57 = vpop.permute.xlu0 %499 }
 0x17c   : > { %v492_v42 = vadd.f32 %v488_v56, %v2994_v34  ;;  %v505_v44 = vadd.f32 %v500_v57, %v2996_v35  ;;  %v580_v34 = vmul.f32 %v578_v3, %v2792_v8  ;;  %v585_v35 = vmul.f32 %v584_v43, %v2786_v4 }
 0x17d   : > { %972 = vrot.lane.b32.xlu1 %v967_v58, %s2522_s20  ;;  %1010 = vrot.lane.b32.xlu0 %v1006_v59, %s2521_s30  ;;  %v586_v4 = vmul.f32 %v584_v43, %v2792_v8 }
 0x17f   : > { %v502_v5 = vpop.permute.xlu1 %501  ;;  %v514_v6 = vpop.permute.xlu0 %513 }
 0x180   : > { %v519_v19 = vadd.f32 %v514_v6, %v463_v0  ;;  %v506_v56 = vadd.f32 %v502_v5, %v3006_v29  ;;  %v1076_v0 = vmul.f32 %v1075_v52, %v3019_v54 }
 0x181   : > { %1012 = vrot.lane.b32.xlu1 %v1007_v7, %s2521_s30  ;;  %1024 = vrot.lane.b32.xlu0 %v1020_v9, %s2521_s30  ;;  %v1089_v7 = vstv %s3075_s28  ;;  %s3219_s28 = sld [smem:[#allocation7 + $0x3a]] }
 0x182   : > { %v3054_v63 = vadd.f32 %v567_v13, %v519_v19  ;;  %v1077_v19 = vmul.f32 %v1075_v52, %v3032_v14  ;;  %v1090_v12 = vmul.f32 %v1089_v7, %v3019_v54  ;;  %v1103_v13 = vstv %s3091_s4  ;;  %s3223_s4 = sld [smem:[#allocation7 + $0xc]] }
 0x183   : > { %v516_v17 = vpop.permute.xlu1 %515  ;;  %v528_v18 = vpop.permute.xlu0 %527  ;;  %v1105_v24 = vmul.f32 %v1103_v13, %v3032_v14 }
 0x184   : > { %v520_v25 = vadd.f32 %v516_v17, %v464_v48  ;;  %v533_v26 = vadd.f32 %v528_v18, %v477_v62  ;;  %v1091_v48 = vmul.f32 %v1089_v7, %v3032_v14  ;;  %v1104_v62 = vmul.f32 %v1103_v13, %v3019_v54  ;;  %v3123_v17 = vld [vmem:[#allocation2 + $0x30] sm:$0xff] }
 0x185   : > { %1026 = vrot.lane.b32.xlu1 %v1021_v20, %s2521_s30  ;;  %1038 = vrot.lane.b32.xlu0 %v1034_v23, %s2521_s30  ;;  %v1144_v18 = vstv %s3105_s11  ;;  %v723_v7 = vstv %s3154_s8  ;;  %s3230_s11 = sld [smem:[#allocation7 + $0x5e]]  ;;  %s3299_s8 = sld [smem:[#allocation7 + $0x83]] }
 0x186   : > { %v3068_v33 = vadd.f32 %v568_v28, %v520_v25  ;;  %v3070_v10 = vadd.f32 %v573_v1, %v533_v26  ;;  %v1145_v25 = vmul.f32 %v1144_v18, %v3123_v17  ;;  %v3136_v26 = vld [vmem:[#allocation2 + $0x38] sm:$0xff]  ;;  %v1158_v28 = vstv %s3115_s17  ;;  %s3234_s17 = sld [smem:[#allocation7 + $0x30]] }
 0x187   : > { %v530_v11 = vpop.permute.xlu1 %529  ;;  %v542_v27 = vpop.permute.xlu0 %541  ;;  %v705_v1 = vstv %s3119_s10  ;;  %s3238_s10 = sld [smem:[#allocation7 + $0x82]] }
 0x188   : > { %v534_v40 = vadd.f32 %v530_v11, %v478_v31  ;;  %v547_v41 = vadd.f32 %v542_v27, %v491_v32  ;;  %v1146_v11 = vmul.f32 %v1144_v18, %v3136_v26  ;;  %v1159_v27 = vmul.f32 %v1158_v28, %v3123_v17 }
 0x189   : > { %1040 = vrot.lane.b32.xlu1 %v1035_v37, %s2521_s30  ;;  %1052 = vrot.lane.b32.xlu0 %v1048_v38, %s2521_s30  ;;  %v1172_v38 = vstv %s3126_s19  ;;  %v706_v39 = vmul.f32 %v705_v1, %v2820_v30  ;;  %s3246_s19 = sld [smem:[#allocation7 + $0x54]] }
 0x18a   : > { %v3084_v45 = vadd.f32 %v574_v21, %v534_v40  ;;  %v3086_v47 = vadd.f32 %v579_v22, %v547_v41  ;;  %v711_v40 = vstv %s3130_s22  ;;  %s3251_s22 = sld [smem:[#allocation7 + $0x17]] }
 0x18b   : > { %v544_v49 = vpop.permute.xlu1 %543  ;;  %v556_v50 = vpop.permute.xlu0 %555 }
 0x18c   : > { %v548_v53 = vadd.f32 %v544_v49, %v492_v42  ;;  %v561_v55 = vadd.f32 %v556_v50, %v505_v44  ;;  %v1160_v42 = vmul.f32 %v1158_v28, %v3136_v26  ;;  %v1173_v44 = vmul.f32 %v1172_v38, %v3123_v17 }
 0x18d   : > { %1054 = vrot.lane.b32.xlu1 %v1049_v46, %s2521_s30  ;;  %1066 = vrot.lane.b32.xlu0 %v1062_v51, %s2522_s20  ;;  %v1186_v49 = vstv %s3134_s27  ;;  %v707_v51 = vmul.f32 %v705_v1, %v2828_v36  ;;  %s3258_s27 = sld [smem:[#allocation7 + $0x78]] }
 0x18e   : > { %v3098_v57 = vadd.f32 %v580_v34, %v548_v53  ;;  %v3100_v58 = vadd.f32 %v585_v35, %v561_v55 }
 0x18f   : > { %v558_v59 = vpop.permute.xlu1 %557  ;;  %v596_v60 = vpop.permute.xlu0 %595 }
 0x190   : > { %v562_v6 = vadd.f32 %v558_v59, %v506_v56  ;;  %v601_v3 = vadd.f32 %v596_v60, %v3054_v63  ;;  %v1174_v59 = vmul.f32 %v1172_v38, %v3136_v26  ;;  %v1187_v60 = vmul.f32 %v1186_v49, %v3123_v17 }
 0x191   : > { %1068 = vrot.lane.b32.xlu1 %v1063_v61, %s2522_s20  ;;  %1080 = vrot.lane.b32.xlu0 %v1076_v0, %s2522_s20  ;;  %v1200_v61 = vstv %s3147_s6  ;;  %s3283_s6 = sld [smem:[#allocation7 + $0x5f]] }
 0x192   : > { %v3110_v29 = vadd.f32 %v586_v4, %v562_v6  ;;  %v1202_v1 = vmul.f32 %v1200_v61, %v3136_v26 }
 0x193   : > { %v598_v5 = vpop.permute.xlu1 %597  ;;  %v610_v9 = vpop.permute.xlu0 %609 }
 0x194   : > { %v602_v63 = vadd.f32 %v598_v5, %v3068_v33  ;;  %v615_v41 = vadd.f32 %v610_v9, %v3070_v10  ;;  %v712_v33 = vmul.f32 %v711_v40, %v2820_v30  ;;  %v717_v10 = vstv %s3142_s29  ;;  %s3267_s29 = sld [smem:[#allocation7 + $0x3b]] }
 0x195   : > { %1082 = vrot.lane.b32.xlu1 %v1077_v19, %s2522_s20  ;;  %1094 = vrot.lane.b32.xlu0 %v1090_v12, %s2522_s20 }
 0x197   : > { %v612_v8 = vpop.permute.xlu1 %611  ;;  %v624_v16 = vpop.permute.xlu0 %623 }
 0x198   : > { %v616_v52 = vadd.f32 %v612_v8, %v3084_v45  ;;  %v629_v53 = vadd.f32 %v624_v16, %v3086_v47  ;;  %v713_v45 = vmul.f32 %v711_v40, %v2828_v36  ;;  %v718_v47 = vmul.f32 %v717_v10, %v2820_v30 }
 0x199   : > { %1096 = vrot.lane.b32.xlu1 %v1091_v48, %s2522_s20  ;;  %1108 = vrot.lane.b32.xlu0 %v1104_v62, %s2522_s20  ;;  %v1188_v8 = vmul.f32 %v1186_v49, %v3136_v26  ;;  %v1201_v16 = vmul.f32 %v1200_v61, %v3123_v17  ;;  %v1214_v48 = vstv %s3163_s9  ;;  %s3313_s9 = sld [smem:[#allocation7 + $0x19]] }
 0x19b   : > { %v626_v20 = vpop.permute.xlu1 %625  ;;  %v638_v23 = vpop.permute.xlu0 %637 }
 0x19c   : > { %v630_v4 = vadd.f32 %v626_v20, %v3098_v57  ;;  %v643_v5 = vadd.f32 %v638_v23, %v3100_v58  ;;  %v719_v57 = vmul.f32 %v717_v10, %v2828_v36  ;;  %v724_v58 = vmul.f32 %v723_v7, %v2820_v30 }
 0x19d   : > { %1110 = vrot.lane.b32.xlu1 %v1105_v24, %s2522_s20  ;;  %1149 = vrot.lane.b32.xlu0 %v1145_v25, %s2521_s30  ;;  %v725_v30 = vmul.f32 %v723_v7, %v2828_v36 }
 0x19f   : > { %v640_v31 = vpop.permute.xlu1 %639  ;;  %v652_v32 = vpop.permute.xlu0 %651 }
 0x1a0   : > { %v657_v37 = vadd.f32 %v652_v32, %v601_v3  ;;  %v644_v20 = vadd.f32 %v640_v31, %v3110_v29  ;;  %v1215_v3 = vmul.f32 %v1214_v48, %v3123_v17 }
 0x1a1   : > { %1151 = vrot.lane.b32.xlu1 %v1146_v11, %s2521_s30  ;;  %1163 = vrot.lane.b32.xlu0 %v1159_v27, %s2521_s30  ;;  %v1228_v11 = vstv %s3179_s23  ;;  %s3323_s23 = sld [smem:[#allocation7 + $0x3d]] }
 0x1a2   : > { %v3158_v21 = vadd.f32 %v706_v39, %v657_v37  ;;  %v1216_v37 = vmul.f32 %v1214_v48, %v3136_v26  ;;  %v1229_v38 = vmul.f32 %v1228_v11, %v3123_v17  ;;  %v1242_v39 = vstv %s3195_s26  ;;  %s3327_s26 = sld [smem:[#allocation7 + $0xf]] }
 0x1a3   : > { %v654_v22 = vpop.permute.xlu1 %653  ;;  %v666_v43 = vpop.permute.xlu0 %665  ;;  %v1244_v49 = vmul.f32 %v1242_v39, %v3136_v26 }
 0x1a4   : > { %v658_v50 = vadd.f32 %v654_v22, %v602_v63  ;;  %v671_v46 = vadd.f32 %v666_v43, %v615_v41  ;;  %v1230_v63 = vmul.f32 %v1228_v11, %v3136_v26  ;;  %v1243_v41 = vmul.f32 %v1242_v39, %v3123_v17  ;;  %v3227_v22 = vld [vmem:[#allocation2 + $0x31] sm:$0xff] }
 0x1a5   : > { %1165 = vrot.lane.b32.xlu1 %v1160_v42, %s2521_s30  ;;  %1177 = vrot.lane.b32.xlu0 %v1173_v44, %s2521_s30  ;;  %v1282_v43 = vstv %s3209_s7  ;;  %v861_v11 = vstv %s3258_s27  ;;  %s3334_s7 = sld [smem:[#allocation7 + $0x61]]  ;;  %s3403_s27 = sld [smem:[#allocation7 + $0x86]] }
 0x1a6   : > { %v3172_v55 = vadd.f32 %v707_v51, %v658_v50  ;;  %v3174_v34 = vadd.f32 %v712_v33, %v671_v46  ;;  %v1283_v50 = vmul.f32 %v1282_v43, %v3227_v22  ;;  %v3240_v46 = vld [vmem:[#allocation2 + $0x39] sm:$0xff]  ;;  %v1296_v51 = vstv %s3219_s28  ;;  %s3338_s28 = sld [smem:[#allocation7 + $0x33]] }
 0x1a7   : > { %v668_v35 = vpop.permute.xlu1 %667  ;;  %v680_v56 = vpop.permute.xlu0 %679  ;;  %v843_v33 = vstv %s3223_s4  ;;  %s3342_s4 = sld [smem:[#allocation7 + $0x85]] }
 0x1a8   : > { %v672_v0 = vadd.f32 %v668_v35, %v616_v52  ;;  %v685_v6 = vadd.f32 %v680_v56, %v629_v53  ;;  %v1284_v35 = vmul.f32 %v1282_v43, %v3240_v46  ;;  %v1297_v56 = vmul.f32 %v1296_v51, %v3227_v22 }
 0x1a9   : > { %1179 = vrot.lane.b32.xlu1 %v1174_v59, %s2521_s30  ;;  %1191 = vrot.lane.b32.xlu0 %v1187_v60, %s2521_s30  ;;  %v1310_v60 = vstv %s3230_s11  ;;  %v844_v61 = vmul.f32 %v843_v33, %v2897_v2  ;;  %s3350_s11 = sld [smem:[#allocation7 + $0x57]] }
 0x1aa   : > { %v3188_v9 = vadd.f32 %v713_v45, %v672_v0  ;;  %v3190_v19 = vadd.f32 %v718_v47, %v685_v6  ;;  %v849_v0 = vstv %s3234_s17  ;;  %s3355_s17 = sld [smem:[#allocation7 + $0x1a]] }
 0x1ab   : > { %v682_v12 = vpop.permute.xlu1 %681  ;;  %v694_v13 = vpop.permute.xlu0 %693 }
 0x1ac   : > { %v686_v62 = vadd.f32 %v682_v12, %v630_v4  ;;  %v699_v18 = vadd.f32 %v694_v13, %v643_v5  ;;  %v1298_v4 = vmul.f32 %v1296_v51, %v3240_v46  ;;  %v1311_v5 = vmul.f32 %v1310_v60, %v3227_v22 }
 0x1ad   : > { %1193 = vrot.lane.b32.xlu1 %v1188_v8, %s2521_s30  ;;  %1205 = vrot.lane.b32.xlu0 %v1201_v16, %s2522_s20  ;;  %v1324_v12 = vstv %s3238_s10  ;;  %v845_v16 = vmul.f32 %v843_v33, %v2916_v15  ;;  %s3362_s10 = sld [smem:[#allocation7 + $0x7b]] }
 0x1ae   : > { %v3202_v23 = vadd.f32 %v719_v57, %v686_v62  ;;  %v3204_v24 = vadd.f32 %v724_v58, %v699_v18 }
 0x1af   : > { %v696_v25 = vpop.permute.xlu1 %695  ;;  %v735_v28 = vpop.permute.xlu0 %734 }
 0x1b0   : > { %v700_v32 = vadd.f32 %v696_v25, %v644_v20  ;;  %v740_v10 = vadd.f32 %v735_v28, %v3158_v21  ;;  %v1312_v25 = vmul.f32 %v1310_v60, %v3240_v46  ;;  %v1325_v28 = vmul.f32 %v1324_v12, %v3227_v22 }
 0x1b1   : > { %1207 = vrot.lane.b32.xlu1 %v1202_v1, %s2522_s20  ;;  %1219 = vrot.lane.b32.xlu0 %v1215_v3, %s2522_s20  ;;  %v1338_v1 = vstv %s3251_s22  ;;  %s3387_s22 = sld [smem:[#allocation7 + $0x62]] }
 0x1b2   : > { %v3214_v29 = vadd.f32 %v725_v30, %v700_v32  ;;  %v1340_v33 = vmul.f32 %v1338_v1, %v3240_v46 }
 0x1b3   : > { %v737_v31 = vpop.permute.xlu1 %736  ;;  %v749_v27 = vpop.permute.xlu0 %748 }
 0x1b4   : > { %v741_v21 = vadd.f32 %v737_v31, %v3172_v55  ;;  %v754_v6 = vadd.f32 %v749_v27, %v3174_v34  ;;  %v850_v55 = vmul.f32 %v849_v0, %v2897_v2  ;;  %v855_v34 = vstv %s3246_s19  ;;  %s3371_s19 = sld [smem:[#allocation7 + $0x3e]] }
 0x1b5   : > { %1221 = vrot.lane.b32.xlu1 %v1216_v37, %s2522_s20  ;;  %1233 = vrot.lane.b32.xlu0 %v1229_v38, %s2522_s20 }
 0x1b7   : > { %v751_v36 = vpop.permute.xlu1 %750  ;;  %v763_v40 = vpop.permute.xlu0 %762 }
 0x1b8   : > { %v755_v48 = vadd.f32 %v751_v36, %v3188_v9  ;;  %v768_v62 = vadd.f32 %v763_v40, %v3190_v19  ;;  %v851_v9 = vmul.f32 %v849_v0, %v2916_v15  ;;  %v856_v19 = vmul.f32 %v855_v34, %v2897_v2 }
 0x1b9   : > { %1235 = vrot.lane.b32.xlu1 %v1230_v63, %s2522_s20  ;;  %1247 = vrot.lane.b32.xlu0 %v1243_v41, %s2522_s20  ;;  %v1326_v36 = vmul.f32 %v1324_v12, %v3240_v46  ;;  %v1339_v40 = vmul.f32 %v1338_v1, %v3227_v22  ;;  %v1352_v63 = vstv %s3267_s29  ;;  %s3417_s29 = sld [smem:[#allocation7 + $0x1c]] }
 0x1bb   : > { %v765_v42 = vpop.permute.xlu1 %764  ;;  %v777_v44 = vpop.permute.xlu0 %776 }
 0x1bc   : > { %v769_v30 = vadd.f32 %v765_v42, %v3202_v23  ;;  %v782_v31 = vadd.f32 %v777_v44, %v3204_v24  ;;  %v857_v23 = vmul.f32 %v855_v34, %v2916_v15  ;;  %v862_v24 = vmul.f32 %v861_v11, %v2897_v2 }
 0x1bd   : > { %1249 = vrot.lane.b32.xlu1 %v1244_v49, %s2522_s20  ;;  %1287 = vrot.lane.b32.xlu0 %v1283_v50, %s2521_s30  ;;  %v863_v2 = vmul.f32 %v861_v11, %v2916_v15 }
 0x1bf   : > { %v779_v52 = vpop.permute.xlu1 %778  ;;  %v791_v53 = vpop.permute.xlu0 %790 }
 0x1c0   : > { %v796_v59 = vadd.f32 %v791_v53, %v740_v10  ;;  %v783_v42 = vadd.f32 %v779_v52, %v3214_v29  ;;  %v1353_v10 = vmul.f32 %v1352_v63, %v3227_v22 }
 0x1c1   : > { %1289 = vrot.lane.b32.xlu1 %v1284_v35, %s2521_s30  ;;  %1301 = vrot.lane.b32.xlu0 %v1297_v56, %s2521_s30  ;;  %v1366_v35 = vstv %s3283_s6  ;;  %s3427_s6 = sld [smem:[#allocation7 + $0x40]] }
 0x1c2   : > { %v3262_v45 = vadd.f32 %v844_v61, %v796_v59  ;;  %v1354_v59 = vmul.f32 %v1352_v63, %v3240_v46  ;;  %v1367_v60 = vmul.f32 %v1366_v35, %v3227_v22  ;;  %v1380_v61 = vstv %s3299_s8  ;;  %s3431_s8 = sld [smem:[#allocation7 + $0x12]] }
 0x1c3   : > { %v793_v47 = vpop.permute.xlu1 %792  ;;  %v805_v7 = vpop.permute.xlu0 %804  ;;  %v1382_v12 = vmul.f32 %v1380_v61, %v3240_v46 }
 0x1c4   : > { %v797_v13 = vadd.f32 %v793_v47, %v741_v21  ;;  %v810_v8 = vadd.f32 %v805_v7, %v754_v6  ;;  %v1368_v21 = vmul.f32 %v1366_v35, %v3240_v46  ;;  %v1381_v6 = vmul.f32 %v1380_v61, %v3227_v22  ;;  %v3331_v47 = vld [vmem:[#allocation2 + $0x32] sm:$0xff] }
 0x1c5   : > { %1303 = vrot.lane.b32.xlu1 %v1298_v4, %s2521_s30  ;;  %1315 = vrot.lane.b32.xlu0 %v1311_v5, %s2521_s30  ;;  %v1420_v7 = vstv %s3313_s9  ;;  %v999_v35 = vstv %s3362_s10  ;;  %s3438_s9 = sld [smem:[#allocation7 + $0x64]]  ;;  %s3497_s10 = sld [smem:[#allocation7 + $0x89]] }
 0x1c6   : > { %v3276_v18 = vadd.f32 %v845_v16, %v797_v13  ;;  %v3278_v57 = vadd.f32 %v850_v55, %v810_v8  ;;  %v1421_v13 = vmul.f32 %v1420_v7, %v3331_v47  ;;  %v3344_v8 = vld [vmem:[#allocation2 + $0x3a] sm:$0xff]  ;;  %v1434_v16 = vstv %s3323_s23  ;;  %s3442_s23 = sld [smem:[#allocation7 + $0x36]] }
 0x1c7   : > { %v807_v58 = vpop.permute.xlu1 %806  ;;  %v819_v20 = vpop.permute.xlu0 %818  ;;  %v981_v55 = vstv %s3327_s26  ;;  %s3446_s26 = sld [smem:[#allocation7 + $0x88]] }
 0x1c8   : > { %v811_v3 = vadd.f32 %v807_v58, %v755_v48  ;;  %v824_v32 = vadd.f32 %v819_v20, %v768_v62  ;;  %v1422_v58 = vmul.f32 %v1420_v7, %v3344_v8  ;;  %v1435_v20 = vmul.f32 %v1434_v16, %v3331_v47 }
 0x1c9   : > { %1317 = vrot.lane.b32.xlu1 %v1312_v25, %s2521_s30  ;;  %1329 = vrot.lane.b32.xlu0 %v1325_v28, %s2521_s30  ;;  %v1448_v28 = vstv %s3334_s7  ;;  %v982_v1 = vmul.f32 %v981_v55, %v3019_v54  ;;  %s3454_s7 = sld [smem:[#allocation7 + $0x5a]] }
 0x1ca   : > { %v3292_v27 = vadd.f32 %v851_v9, %v811_v3  ;;  %v3294_v37 = vadd.f32 %v856_v19, %v824_v32  ;;  %v987_v3 = vstv %s3338_s28  ;;  %s3459_s28 = sld [smem:[#allocation7 + $0x1d]] }
 0x1cb   : > { %v821_v38 = vpop.permute.xlu1 %820  ;;  %v833_v39 = vpop.permute.xlu0 %832 }
 0x1cc   : > { %v825_v41 = vadd.f32 %v821_v38, %v769_v30  ;;  %v838_v43 = vadd.f32 %v833_v39, %v782_v31  ;;  %v1436_v30 = vmul.f32 %v1434_v16, %v3344_v8  ;;  %v1449_v31 = vmul.f32 %v1448_v28, %v3331_v47 }
 0x1cd   : > { %1331 = vrot.lane.b32.xlu1 %v1326_v36, %s2521_s30  ;;  %1343 = vrot.lane.b32.xlu0 %v1339_v40, %s2522_s20  ;;  %v1462_v38 = vstv %s3342_s4  ;;  %v983_v40 = vmul.f32 %v981_v55, %v3032_v14  ;;  %s3466_s4 = sld [smem:[#allocation7 + $0x7e]] }
 0x1ce   : > { %v3306_v44 = vadd.f32 %v857_v23, %v825_v41  ;;  %v3308_v49 = vadd.f32 %v862_v24, %v838_v43 }
 0x1cf   : > { %v835_v50 = vpop.permute.xlu1 %834  ;;  %v873_v51 = vpop.permute.xlu0 %872 }
 0x1d0   : > { %v839_v53 = vadd.f32 %v835_v50, %v783_v42  ;;  %v878_v34 = vadd.f32 %v873_v51, %v3262_v45  ;;  %v1450_v50 = vmul.f32 %v1448_v28, %v3344_v8  ;;  %v1463_v51 = vmul.f32 %v1462_v38, %v3331_v47 }
 0x1d1   : > { %1345 = vrot.lane.b32.xlu1 %v1340_v33, %s2522_s20  ;;  %1357 = vrot.lane.b32.xlu0 %v1353_v10, %s2522_s20  ;;  %v1476_v33 = vstv %s3355_s17  ;;  %s3485_s17 = sld [smem:[#allocation7 + $0x65]] }
 0x1d2   : > { %v3318_v29 = vadd.f32 %v863_v2, %v839_v53  ;;  %v1478_v55 = vmul.f32 %v1476_v33, %v3344_v8 }
 0x1d3   : > { %v875_v52 = vpop.permute.xlu1 %874  ;;  %v887_v56 = vpop.permute.xlu0 %886 }
 0x1d4   : > { %v879_v45 = vadd.f32 %v875_v52, %v3276_v18  ;;  %v892_v32 = vadd.f32 %v887_v56, %v3278_v57  ;;  %v988_v18 = vmul.f32 %v987_v3, %v3019_v54  ;;  %v993_v57 = vstv %s3350_s11  ;;  %s3473_s11 = sld [smem:[#allocation7 + $0x41]] }
 0x1d5   : > { %1359 = vrot.lane.b32.xlu1 %v1354_v59, %s2522_s20  ;;  %1371 = vrot.lane.b32.xlu0 %v1367_v60, %s2522_s20 }
 0x1d7   : > { %v889_v15 = vpop.permute.xlu1 %888  ;;  %v901_v0 = vpop.permute.xlu0 %900 }
 0x1d8   : > { %v893_v63 = vadd.f32 %v889_v15, %v3292_v27  ;;  %v906_v41 = vadd.f32 %v901_v0, %v3294_v37  ;;  %v989_v27 = vmul.f32 %v987_v3, %v3032_v14  ;;  %v994_v37 = vmul.f32 %v993_v57, %v3019_v54 }
 0x1d9   : > { %1373 = vrot.lane.b32.xlu1 %v1368_v21, %s2522_s20  ;;  %1385 = vrot.lane.b32.xlu0 %v1381_v6, %s2522_s20  ;;  %v1464_v15 = vmul.f32 %v1462_v38, %v3344_v8  ;;  %v1477_v0 = vmul.f32 %v1476_v33, %v3331_v47  ;;  %v1490_v21 = vstv %s3371_s19  ;;  %s3507_s19 = sld [smem:[#allocation7 + $0x1f]] }
 0x1db   : > { %v903_v4 = vpop.permute.xlu1 %902  ;;  %v915_v5 = vpop.permute.xlu0 %914 }
 0x1dc   : > { %v907_v2 = vadd.f32 %v903_v4, %v3306_v44  ;;  %v920_v52 = vadd.f32 %v915_v5, %v3308_v49  ;;  %v995_v44 = vmul.f32 %v993_v57, %v3032_v14  ;;  %v1000_v49 = vmul.f32 %v999_v35, %v3019_v54 }
 0x1dd   : > { %1387 = vrot.lane.b32.xlu1 %v1382_v12, %s2522_s20  ;;  %1425 = vrot.lane.b32.xlu0 %v1421_v13, %s2521_s30  ;;  %v1001_v54 = vmul.f32 %v999_v35, %v3032_v14 }
 0x1df   : > { %v917_v48 = vpop.permute.xlu1 %916  ;;  %v929_v62 = vpop.permute.xlu0 %928 }
 0x1e0   : > { %v934_v25 = vadd.f32 %v929_v62, %v878_v34  ;;  %v921_v4 = vadd.f32 %v917_v48, %v3318_v29  ;;  %v1491_v34 = vmul.f32 %v1490_v21, %v3331_v47 }
 0x1e1   : > { %1427 = vrot.lane.b32.xlu1 %v1422_v58, %s2521_s30  ;;  %1439 = vrot.lane.b32.xlu0 %v1435_v20, %s2521_s30  ;;  %v1504_v58 = vstv %s3387_s22  ;;  %s3515_s22 = sld [smem:[#allocation7 + $0x43]] }
 0x1e2   : > { %v3366_v9 = vadd.f32 %v982_v1, %v934_v25  ;;  %v1492_v25 = vmul.f32 %v1490_v21, %v3344_v8  ;;  %v1505_v28 = vmul.f32 %v1504_v58, %v3331_v47  ;;  %v1518_v1 = vstv %s3403_s27  ;;  %s3519_s27 = sld [smem:[#allocation7 + $0x15]] }
 0x1e3   : > { %v931_v19 = vpop.permute.xlu1 %930  ;;  %v943_v11 = vpop.permute.xlu0 %942  ;;  %v1520_v38 = vmul.f32 %v1518_v1, %v3344_v8 }
 0x1e4   : > { %v935_v39 = vadd.f32 %v931_v19, %v879_v45  ;;  %v948_v36 = vadd.f32 %v943_v11, %v892_v32  ;;  %v1506_v45 = vmul.f32 %v1504_v58, %v3344_v8  ;;  %v1519_v32 = vmul.f32 %v1518_v1, %v3331_v47  ;;  %v3435_v19 = vld [vmem:[#allocation2 + $0x48] sm:$0xff] }
 0x1e5   : > { %1441 = vrot.lane.b32.xlu1 %v1436_v30, %s2521_s30  ;;  %1453 = vrot.lane.b32.xlu0 %v1449_v31, %s2521_s30  ;;  %v1559_v11 = vstv %s3417_s29  ;;  %s3526_s29 = sld [smem:[#allocation7 + $0x67]] }
 0x1e6   : > { %v3380_v43 = vadd.f32 %v983_v40, %v935_v39  ;;  %v3382_v23 = vadd.f32 %v988_v18, %v948_v36  ;;  %v1560_v39 = vmul.f32 %v1559_v11, %v3435_v19  ;;  %v3448_v36 = vld [vmem:[#allocation2 + $0x50] sm:$0xff]  ;;  %v1573_v40 = vstv %s3427_s6  ;;  %s3530_s6 = sld [smem:[#allocation7 + $0x39]] }
 0x1e7   : > { %v945_v24 = vpop.permute.xlu1 %944  ;;  %v957_v42 = vpop.permute.xlu0 %956  ;;  %v1120_v18 = vstv %s3431_s8  ;;  %s3534_s8 = sld [smem:[#allocation7 + $0x8b]] }
 0x1e8   : > { %v949_v10 = vadd.f32 %v945_v24, %v893_v63  ;;  %v962_v53 = vadd.f32 %v957_v42, %v906_v41  ;;  %v1561_v24 = vmul.f32 %v1559_v11, %v3448_v36  ;;  %v1574_v42 = vmul.f32 %v1573_v40, %v3435_v19 }
 0x1e9   : > { %1455 = vrot.lane.b32.xlu1 %v1450_v50, %s2521_s30  ;;  %1467 = vrot.lane.b32.xlu0 %v1463_v51, %s2521_s30  ;;  %v1587_v51 = vstv %s3438_s9  ;;  %v1121_v33 = vmul.f32 %v1120_v18, %v3123_v17  ;;  %s3542_s9 = sld [smem:[#allocation7 + $0x5d]] }
 0x1ea   : > { %v3396_v56 = vadd.f32 %v989_v27, %v949_v10  ;;  %v3398_v59 = vadd.f32 %v994_v37, %v962_v53  ;;  %v1126_v10 = vstv %s3442_s23  ;;  %s3546_s23 = sld [smem:[#allocation7 + $0x20]] }
 0x1eb   : > { %v959_v60 = vpop.permute.xlu1 %958  ;;  %v971_v61 = vpop.permute.xlu0 %970  ;;  %v1127_v21 = vmul.f32 %v1126_v10, %v3123_v17  ;;  %v1128_v58 = vmul.f32 %v1126_v10, %v3136_v26 }
 0x1ec   : > { %v963_v6 = vadd.f32 %v959_v60, %v907_v2  ;;  %v976_v7 = vadd.f32 %v971_v61, %v920_v52  ;;  %v1575_v2 = vmul.f32 %v1573_v40, %v3448_v36  ;;  %v1588_v52 = vmul.f32 %v1587_v51, %v3435_v19 }
 0x1ed   : > { %1469 = vrot.lane.b32.xlu1 %v1464_v15, %s2521_s30  ;;  %1481 = vrot.lane.b32.xlu0 %v1477_v0, %s2522_s20  ;;  %v1601_v60 = vstv %s3446_s26  ;;  %v1122_v0 = vmul.f32 %v1120_v18, %v3136_v26  ;;  %s3553_s26 = sld [smem:[#allocation7 + $0x81]] }
 0x1ee   : > { %v3410_v5 = vadd.f32 %v995_v44, %v963_v6  ;;  %v3412_v12 = vadd.f32 %v1000_v49, %v976_v7 }
 0x1ef   : > { %v973_v13 = vpop.permute.xlu1 %972  ;;  %v1011_v16 = vpop.permute.xlu0 %1010 }
 0x1f0   : > { %v977_v62 = vadd.f32 %v973_v13, %v921_v4  ;;  %v1016_v57 = vadd.f32 %v1011_v16, %v3366_v9  ;;  %v1589_v13 = vmul.f32 %v1587_v51, %v3448_v36  ;;  %v1602_v16 = vmul.f32 %v1601_v60, %v3435_v19 }
 0x1f1   : > { %1483 = vrot.lane.b32.xlu1 %v1478_v55, %s2522_s20  ;;  %1495 = vrot.lane.b32.xlu0 %v1491_v34, %s2522_s20  ;;  %v1615_v55 = vstv %s3459_s28  ;;  %s3568_s28 = sld [smem:[#allocation7 + $0x68]] }
 0x1f2   : > { %v3422_v29 = vadd.f32 %v1001_v54, %v977_v62  ;;  %v1617_v18 = vmul.f32 %v1615_v55, %v3448_v36 }
 0x1f3   : > { %v1013_v48 = vpop.permute.xlu1 %1012  ;;  %v1025_v20 = vpop.permute.xlu0 %1024 }
 0x1f4   : > { %v1017_v9 = vadd.f32 %v1013_v48, %v3380_v43  ;;  %v1030_v53 = vadd.f32 %v1025_v20, %v3382_v23  ;;  %v1132_v43 = vstv %s3454_s7  ;;  %s3558_s7 = sld [smem:[#allocation7 + $0x44]] }
 0x1f5   : > { %1497 = vrot.lane.b32.xlu1 %v1492_v25, %s2522_s20  ;;  %1509 = vrot.lane.b32.xlu0 %v1505_v28, %s2522_s20 }
 0x1f7   : > { %v1027_v14 = vpop.permute.xlu1 %1026  ;;  %v1039_v3 = vpop.permute.xlu0 %1038 }
 0x1f8   : > { %v1031_v23 = vadd.f32 %v1027_v14, %v3396_v56  ;;  %v1044_v6 = vadd.f32 %v1039_v3, %v3398_v59  ;;  %v1133_v56 = vmul.f32 %v1132_v43, %v3123_v17  ;;  %v1138_v59 = vstv %s3466_s4  ;;  %s3578_s4 = sld [smem:[#allocation7 + $0x8c]] }
 0x1f9   : > { %1511 = vrot.lane.b32.xlu1 %v1506_v45, %s2522_s20  ;;  %1523 = vrot.lane.b32.xlu0 %v1519_v32, %s2522_s20  ;;  %v1603_v14 = vmul.f32 %v1601_v60, %v3448_v36  ;;  %v1616_v3 = vmul.f32 %v1615_v55, %v3435_v19  ;;  %v1629_v45 = vstv %s3473_s11  ;;  %s3587_s11 = sld [smem:[#allocation7 + $0x22]] }
 0x1fa   : > { %v1631_v51 = vmul.f32 %v1629_v45, %v3448_v36 }
 0x1fb   : > { %v1041_v30 = vpop.permute.xlu1 %1040  ;;  %v1053_v31 = vpop.permute.xlu0 %1052 }
 0x1fc   : > { %v1045_v54 = vadd.f32 %v1041_v30, %v3410_v5  ;;  %v1058_v48 = vadd.f32 %v1053_v31, %v3412_v12  ;;  %v1139_v5 = vmul.f32 %v1138_v59, %v3123_v17  ;;  %v1140_v17 = vmul.f32 %v1138_v59, %v3136_v26 }
 0x1fd   : > { %1525 = vrot.lane.b32.xlu1 %v1520_v38, %s2522_s20  ;;  %1564 = vrot.lane.b32.xlu0 %v1560_v39, %s2521_s30  ;;  %v1134_v38 = vmul.f32 %v1132_v43, %v3136_v26  ;;  %v1264_v59 = vstv %s3530_s6  ;;  %s3626_s6 = sld [smem:[#allocation7 + $0x23]] }
 0x1ff   : > { %v1055_v63 = vpop.permute.xlu1 %1054  ;;  %v1067_v41 = vpop.permute.xlu0 %1066 }
 0x200   : > { %v1072_v50 = vadd.f32 %v1067_v41, %v1016_v57  ;;  %v1059_v12 = vadd.f32 %v1055_v63, %v3422_v29  ;;  %v1630_v57 = vmul.f32 %v1629_v45, %v3435_v19 }
 0x201   : > { %1566 = vrot.lane.b32.xlu1 %v1561_v24, %s2521_s30  ;;  %1578 = vrot.lane.b32.xlu0 %v1574_v42, %s2521_s30  ;;  %v1643_v42 = vstv %s3485_s17  ;;  %s3595_s17 = sld [smem:[#allocation7 + $0x46]] }
 0x202   : > { %v1123_v27 = vadd.f32 %v1121_v33, %v1072_v50  ;;  %v1644_v33 = vmul.f32 %v1643_v42, %v3435_v19 }
 0x203   : > { %v1069_v37 = vpop.permute.xlu1 %1068  ;;  %v1081_v35 = vpop.permute.xlu0 %1080 }
 0x204   : > { %v1073_v61 = vadd.f32 %v1069_v37, %v1017_v9  ;;  %v1086_v15 = vadd.f32 %v1081_v35, %v1030_v53  ;;  %v1657_v53 = vstv %s3497_s10  ;;  %v1645_v37 = vmul.f32 %v1643_v42, %v3448_v36  ;;  %s3599_s10 = sld [smem:[#allocation7 + $0x18]] }
 0x205   : > { %1580 = vrot.lane.b32.xlu1 %v1575_v2, %s2521_s30  ;;  %1592 = vrot.lane.b32.xlu0 %v1588_v52, %s2521_s30  ;;  %v1658_v35 = vmul.f32 %v1657_v53, %v3435_v19  ;;  %v3523_v2 = vld [vmem:[#allocation2 + $0x49] sm:$0xff]  ;;  %v1276_v42 = vstv %s3553_s26  ;;  %s3658_s26 = sld [smem:[#allocation7 + $0x8f]] }
 0x206   : > { %v1124_v7 = vadd.f32 %v1122_v0, %v1073_v61  ;;  %v1129_v44 = vadd.f32 %v1127_v21, %v1086_v15  ;;  %v1697_v61 = vstv %s3507_s19  ;;  %v1659_v21 = vmul.f32 %v1657_v53, %v3448_v36  ;;  %s3606_s19 = sld [smem:[#allocation7 + $0x6a]] }
 0x207   : > { %v1083_v49 = vpop.permute.xlu1 %1082  ;;  %v1095_v4 = vpop.permute.xlu0 %1094  ;;  %v1698_v43 = vmul.f32 %v1697_v61, %v3523_v2 }
 0x208   : > { %v1087_v34 = vadd.f32 %v1083_v49, %v1031_v23  ;;  %v1100_v62 = vadd.f32 %v1095_v4, %v1044_v6  ;;  %v3536_v23 = vld [vmem:[#allocation2 + $0x51] sm:$0xff]  ;;  %v1258_v49 = vstv %s3519_s27  ;;  %s3614_s27 = sld [smem:[#allocation7 + $0x8e]] }
 0x209   : > { %1594 = vrot.lane.b32.xlu1 %v1589_v13, %s2521_s30  ;;  %1606 = vrot.lane.b32.xlu0 %v1602_v16, %s2521_s30  ;;  %v1699_v16 = vmul.f32 %v1697_v61, %v3536_v23  ;;  %v1260_v45 = vmul.f32 %v1258_v49, %v3240_v46 }
 0x20a   : > { %v1130_v20 = vadd.f32 %v1128_v58, %v1087_v34  ;;  %v1135_v25 = vadd.f32 %v1133_v56, %v1100_v62  ;;  %v1725_v58 = vstv %s3526_s29  ;;  %v1259_v56 = vmul.f32 %v1258_v49, %v3227_v22  ;;  %s3622_s29 = sld [smem:[#allocation7 + $0x60]] }
 0x20b   : > { %v1097_v28 = vpop.permute.xlu1 %1096  ;;  %v1109_v1 = vpop.permute.xlu0 %1108 }
 0x20c   : > { %v1101_v32 = vadd.f32 %v1097_v28, %v1045_v54  ;;  %v1114_v11 = vadd.f32 %v1109_v1, %v1058_v48  ;;  %v1726_v28 = vmul.f32 %v1725_v58, %v3523_v2  ;;  %v1739_v1 = vstv %s3534_s8  ;;  %s3633_s8 = sld [smem:[#allocation7 + $0x84]] }
 0x20d   : > { %1608 = vrot.lane.b32.xlu1 %v1603_v14, %s2521_s30  ;;  %1620 = vrot.lane.b32.xlu0 %v1616_v3, %s2522_s20 }
 0x20e   : > { %v1136_v30 = vadd.f32 %v1134_v38, %v1101_v32  ;;  %v1141_v31 = vadd.f32 %v1139_v5, %v1114_v11  ;;  %v1265_v32 = vmul.f32 %v1264_v59, %v3227_v22  ;;  %v1270_v11 = vstv %s3542_s9  ;;  %s3638_s9 = sld [smem:[#allocation7 + $0x47]] }
 0x20f   : > { %v1111_v39 = vpop.permute.xlu1 %1110  ;;  %v1150_v40 = vpop.permute.xlu0 %1149 }
 0x210   : > { %v1115_v41 = vadd.f32 %v1111_v39, %v1059_v12  ;;  %v1155_v24 = vadd.f32 %v1150_v40, %v1123_v27  ;;  %v1740_v39 = vmul.f32 %v1739_v1, %v3523_v2  ;;  %v1753_v40 = vstv %s3546_s23  ;;  %s3648_s23 = sld [smem:[#allocation7 + $0x6b]] }
 0x211   : > { %1622 = vrot.lane.b32.xlu1 %v1617_v18, %s2522_s20  ;;  %1634 = vrot.lane.b32.xlu0 %v1630_v57, %s2522_s20  ;;  %v1755_v61 = vmul.f32 %v1753_v40, %v3536_v23 }
 0x212   : > { %v1142_v29 = vadd.f32 %v1140_v17, %v1115_v41  ;;  %v1266_v41 = vmul.f32 %v1264_v59, %v3240_v46 }
 0x213   : > { %v1152_v63 = vpop.permute.xlu1 %1151  ;;  %v1164_v50 = vpop.permute.xlu0 %1163 }
 0x214   : > { %v1156_v10 = vadd.f32 %v1152_v63, %v1124_v7  ;;  %v1169_v9 = vadd.f32 %v1164_v50, %v1129_v44  ;;  %v1711_v44 = vstv %s3515_s22  ;;  %s3610_s22 = sld [smem:[#allocation7 + $0x3c]] }
 0x215   : > { %1636 = vrot.lane.b32.xlu1 %v1631_v51, %s2522_s20  ;;  %1648 = vrot.lane.b32.xlu0 %v1644_v33, %s2522_s20  ;;  %v1712_v55 = vmul.f32 %v1711_v44, %v3523_v2  ;;  %v1741_v51 = vmul.f32 %v1739_v1, %v3536_v23  ;;  %v1754_v33 = vmul.f32 %v1753_v40, %v3523_v2  ;;  %v1863_v40 = vstv %s3606_s19  ;;  %s2262_s19 = sld [smem:[#allocation7 + $0x21]] }
 0x217   : > { %v1166_v26 = vpop.permute.xlu1 %1165  ;;  %v1178_v27 = vpop.permute.xlu0 %1177 }
 0x218   : > { %v1170_v52 = vadd.f32 %v1166_v26, %v1130_v20  ;;  %v1183_v60 = vadd.f32 %v1178_v27, %v1135_v25  ;;  %v1713_v25 = vmul.f32 %v1711_v44, %v3536_v23  ;;  %v1272_v26 = vmul.f32 %v1270_v11, %v3240_v46 }
 0x219   : > { %1650 = vrot.lane.b32.xlu1 %v1645_v37, %s2522_s20  ;;  %1662 = vrot.lane.b32.xlu0 %v1658_v35, %s2522_s20  ;;  %v1277_v27 = vmul.f32 %v1276_v42, %v3227_v22 }
 0x21b   : > { %v1180_v15 = vpop.permute.xlu1 %1179  ;;  %v1192_v0 = vpop.permute.xlu0 %1191 }
 0x21c   : > { %v1184_v6 = vadd.f32 %v1180_v15, %v1136_v30  ;;  %v1197_v7 = vadd.f32 %v1192_v0, %v1141_v31  ;;  %v1727_v31 = vmul.f32 %v1725_v58, %v3536_v23 }
 0x21d   : > { %1664 = vrot.lane.b32.xlu1 %v1659_v21, %s2522_s20  ;;  %1702 = vrot.lane.b32.xlu0 %v1698_v43, %s2521_s30  ;;  %v1781_v43 = vstv %s3568_s28  ;;  %s3681_s28 = sld [smem:[#allocation7 + $0x63]] }
 0x21f   : > { %v1194_v4 = vpop.permute.xlu1 %1193  ;;  %v1206_v13 = vpop.permute.xlu0 %1205 }
 0x220   : > { %v1198_v34 = vadd.f32 %v1194_v4, %v1142_v29  ;;  %v1211_v62 = vadd.f32 %v1206_v13, %v1155_v24  ;;  %v1271_v24 = vmul.f32 %v1270_v11, %v3227_v22  ;;  %v1278_v22 = vmul.f32 %v1276_v42, %v3240_v46 }
 0x221   : > { %1704 = vrot.lane.b32.xlu1 %v1699_v16, %s2521_s30  ;;  %1716 = vrot.lane.b32.xlu0 %v1712_v55, %s2521_s30  ;;  %v1782_v4 = vmul.f32 %v1781_v43, %v3523_v2  ;;  %v1795_v55 = vstv %s3578_s4  ;;  %v1396_v11 = vstv %s3599_s10  ;;  %s3684_s4 = sld [smem:[#allocation7 + $0x87]]  ;;  %s3698_s10 = sld [smem:[#allocation7 + $0x8a]] }
 0x222   : > { %v1261_v54 = vadd.f32 %v1259_v56, %v1211_v62  ;;  %v1783_v62 = vmul.f32 %v1781_v43, %v3536_v23  ;;  %v1796_v58 = vmul.f32 %v1795_v55, %v3523_v2  ;;  %v3603_v56 = vld [vmem:[#allocation2 + $0x4a] sm:$0xff]  ;;  %v1414_v43 = vstv %s3633_s8 }
 0x223   : > { %v1208_v48 = vpop.permute.xlu1 %1207  ;;  %v1220_v20 = vpop.permute.xlu0 %1219 }
 0x224   : > { %v1212_v14 = vadd.f32 %v1208_v48, %v1156_v10  ;;  %v1225_v3 = vadd.f32 %v1220_v20, %v1169_v9  ;;  %v1767_v10 = vstv %s3558_s7  ;;  %v1835_v48 = vstv %s3587_s11  ;;  %s2239_s7 = sld [smem:[#allocation7 + $0x3f]]  ;;  %s2251_s11 = sld [smem:[#allocation7 + $0x42]] }
 0x225   : > { %1718 = vrot.lane.b32.xlu1 %v1713_v25, %s2521_s30  ;;  %1730 = vrot.lane.b32.xlu0 %v1726_v28, %s2521_s30  ;;  %v1768_v15 = vmul.f32 %v1767_v10, %v3523_v2  ;;  %v1769_v49 = vmul.f32 %v1767_v10, %v3536_v23  ;;  %v1797_v28 = vmul.f32 %v1795_v55, %v3536_v23 }
 0x226   : > { %v1262_v38 = vadd.f32 %v1260_v45, %v1212_v14  ;;  %v1267_v5 = vadd.f32 %v1265_v32, %v1225_v3  ;;  %v1836_v1 = vmul.f32 %v1835_v48, %v3603_v56  ;;  %v3616_v14 = vld [vmem:[#allocation2 + $0x52] sm:$0xff]  ;;  %v1849_v32 = vstv %s3595_s17  ;;  %s3695_s17 = sld [smem:[#allocation7 + $0x66]] }
 0x227   : > { %v1222_v12 = vpop.permute.xlu1 %1221  ;;  %v1234_v30 = vpop.permute.xlu0 %1233 }
 0x228   : > { %v1226_v18 = vadd.f32 %v1222_v12, %v1170_v52  ;;  %v1239_v57 = vadd.f32 %v1234_v30, %v1183_v60  ;;  %v1837_v12 = vmul.f32 %v1835_v48, %v3616_v14  ;;  %v1850_v30 = vmul.f32 %v1849_v32, %v3603_v56 }
 0x229   : > { %1732 = vrot.lane.b32.xlu1 %v1727_v31, %s2521_s30  ;;  %1744 = vrot.lane.b32.xlu0 %v1740_v39, %s2521_s30 }
 0x22a   : > { %v1268_v17 = vadd.f32 %v1266_v41, %v1226_v18  ;;  %v1273_v29 = vadd.f32 %v1271_v24, %v1239_v57  ;;  %v1397_v18 = vmul.f32 %v1396_v11, %v3331_v47  ;;  %v1402_v57 = vstv %s3610_s22  ;;  %s2263_s22 = sld [smem:[#allocation7 + $0x45]] }
 0x22b   : > { %v1236_v63 = vpop.permute.xlu1 %1235  ;;  %v1248_v50 = vpop.permute.xlu0 %1247  ;;  %v1403_v10 = vmul.f32 %v1402_v57, %v3331_v47 }
 0x22c   : > { %v1240_v9 = vadd.f32 %v1236_v63, %v1184_v6  ;;  %v1253_v53 = vadd.f32 %v1248_v50, %v1197_v7  ;;  %v1877_v63 = vstv %s3614_s27  ;;  %s3709_s27 = sld [smem:[#allocation7 + $0x69]] }
 0x22d   : > { %1746 = vrot.lane.b32.xlu1 %v1741_v51, %s2521_s30  ;;  %1758 = vrot.lane.b32.xlu0 %v1754_v33, %s2522_s20  ;;  %v1398_v33 = vmul.f32 %v1396_v11, %v3344_v8 }
 0x22e   : > { %v1274_v37 = vadd.f32 %v1272_v26, %v1240_v9  ;;  %v1279_v35 = vadd.f32 %v1277_v27, %v1253_v53  ;;  %v1408_v9 = vstv %s3622_s29  ;;  %s3712_s29 = sld [smem:[#allocation7 + $0x8d]] }
 0x22f   : > { %v1250_v52 = vpop.permute.xlu1 %1249  ;;  %v1288_v60 = vpop.permute.xlu0 %1287 }
 0x230   : > { %v1254_v0 = vadd.f32 %v1250_v52, %v1198_v34  ;;  %v1293_v21 = vadd.f32 %v1288_v60, %v1261_v54  ;;  %v1878_v52 = vmul.f32 %v1877_v63, %v3603_v56  ;;  %v1891_v60 = vstv %s3626_s6  ;;  %s2127_s6 = sshll.u32 %s2684_s5, 5 }
 0x231   : > { %1760 = vrot.lane.b32.xlu1 %v1755_v61, %s2522_s20  ;;  %1772 = vrot.lane.b32.xlu0 %v1768_v15, %s2522_s20  ;;  %v1893_v48 = vmul.f32 %v1891_v60, %v3616_v14  ;;  %s3724_s8 = scalar_lea.vmem [#allocation10], %s2127_s6 }
 0x232   : > { %v1280_v6 = vadd.f32 %v1278_v22, %v1254_v0  ;;  %v1404_v0 = vmul.f32 %v1402_v57, %v3344_v8 }
 0x233   : > { %v1290_v7 = vpop.permute.xlu1 %1289  ;;  %v1302_v44 = vpop.permute.xlu0 %1301 }
 0x234   : > { %v1294_v13 = vadd.f32 %v1290_v7, %v1262_v38  ;;  %v1307_v16 = vadd.f32 %v1302_v44, %v1267_v5 }
 0x235   : > { %1774 = vrot.lane.b32.xlu1 %v1769_v49, %s2522_s20  ;;  %1786 = vrot.lane.b32.xlu0 %v1782_v4, %s2522_s20  ;;  %v1879_v49 = vmul.f32 %v1877_v63, %v3616_v14  ;;  %v1892_v4 = vmul.f32 %v1891_v60, %v3603_v56 }
 0x237   : > { %v1304_v46 = vpop.permute.xlu1 %1303  ;;  %v1316_v34 = vpop.permute.xlu0 %1315 }
 0x238   : > { %v1308_v59 = vadd.f32 %v1304_v46, %v1268_v17  ;;  %v1321_v54 = vadd.f32 %v1316_v34, %v1273_v29  ;;  %v1851_v17 = vmul.f32 %v1849_v32, %v3616_v14  ;;  %v1864_v29 = vmul.f32 %v1863_v40, %v3603_v56 }
 0x239   : > { %1788 = vrot.lane.b32.xlu1 %v1783_v62, %s2522_s20  ;;  %1800 = vrot.lane.b32.xlu0 %v1796_v58, %s2522_s20  ;;  %v1410_v46 = vmul.f32 %v1408_v9, %v3344_v8  ;;  %v1415_v34 = vmul.f32 %v1414_v43, %v3331_v47 }
 0x23b   : > { %v1318_v20 = vpop.permute.xlu1 %1317  ;;  %v1330_v25 = vpop.permute.xlu0 %1329 }
 0x23c   : > { %v1322_v3 = vadd.f32 %v1318_v20, %v1274_v37  ;;  %v1335_v45 = vadd.f32 %v1330_v25, %v1279_v35  ;;  %v1865_v35 = vmul.f32 %v1863_v40, %v3616_v14 }
 0x23d   : > { %1802 = vrot.lane.b32.xlu1 %v1797_v28, %s2522_s20  ;;  %1840 = vrot.lane.b32.xlu0 %v1836_v1, %s2521_s30  ;;  %v1919_v1 = vstv %s3648_s23  ;;  %s2020_s23 = sshll.u32 %s3724_s8, 4  ;;  %s3747_s23 = int_to_ptr.vmem [resolvable:$true] %s2020_s23 }
 0x23f   : > { %v1332_v38 = vpop.permute.xlu1 %1331  ;;  %v1344_v5 = vpop.permute.xlu0 %1343 }
 0x240   : > { %v1336_v31 = vadd.f32 %v1332_v38, %v1280_v6  ;;  %v1349_v39 = vadd.f32 %v1344_v5, %v1293_v21  ;;  %v1409_v21 = vmul.f32 %v1408_v9, %v3331_v47  ;;  %v1920_v38 = vmul.f32 %v1919_v1, %v3603_v56 }
 0x241   : > { %1842 = vrot.lane.b32.xlu1 %v1837_v12, %s2521_s30  ;;  %1854 = vrot.lane.b32.xlu0 %v1850_v30, %s2521_s30  ;;  %v1933_v30 = vstv %s3658_s26 }
 0x242   : > { %v1399_v41 = vadd.f32 %v1397_v18, %v1349_v39  ;;  %v1921_v39 = vmul.f32 %v1919_v1, %v3616_v14  ;;  %v1934_v40 = vmul.f32 %v1933_v30, %v3603_v56 }
 0x243   : > { %v1346_v24 = vpop.permute.xlu1 %1345  ;;  %v1358_v42 = vpop.permute.xlu0 %1357 }
 0x244   : > { %v1350_v50 = vadd.f32 %v1346_v24, %v1294_v13  ;;  %v1363_v51 = vadd.f32 %v1358_v42, %v1307_v16  ;;  %v1905_v13 = vstv %s3638_s9  ;;  %v1935_v42 = vmul.f32 %v1933_v30, %v3616_v14  ;;  %s2302_s9 = sshll.u32 %s2567_s16, 9  ;;  %s2007_s16 = scalar_lea.sflag [#allocation5], %s2684_s5 }
 0x245   : > { %1856 = vrot.lane.b32.xlu1 %v1851_v17, %s2521_s30  ;;  %1868 = vrot.lane.b32.xlu0 %v1864_v29, %s2521_s30  ;;  %v1906_v20 = vmul.f32 %v1905_v13, %v3603_v56  ;;  %v1907_v11 = vmul.f32 %v1905_v13, %v3616_v14 }
 0x246   : > { %v1400_v53 = vadd.f32 %v1398_v33, %v1350_v50  ;;  %v1405_v26 = vadd.f32 %v1403_v10, %v1363_v51 }
 0x247   : > { %v1360_v27 = vpop.permute.xlu1 %1359  ;;  %v1372_v37 = vpop.permute.xlu0 %1371 }
 0x248   : > { %v1364_v61 = vadd.f32 %v1360_v27, %v1308_v59  ;;  %v1377_v15 = vadd.f32 %v1372_v37, %v1321_v54 }
 0x249   : > { %1870 = vrot.lane.b32.xlu1 %v1865_v35, %s2521_s30  ;;  %1882 = vrot.lane.b32.xlu0 %v1878_v52, %s2521_s30 }
 0x24a   : > { %v1406_v22 = vadd.f32 %v1404_v0, %v1364_v61  ;;  %v1411_v6 = vadd.f32 %v1409_v21, %v1377_v15  ;;  %v1547_v15 = vstv %s3681_s28  ;;  %s2438_s28 = scalar_lea.vmem %s3747_s23, 512 }
 0x24b   : > { %v1374_v7 = vpop.permute.xlu1 %1373  ;;  %v1386_v44 = vpop.permute.xlu0 %1385  ;;  %p2439_p5 = scmp.ne.s32.totalorder %s3747_s23, %s2438_s28 }
 0x24c   : > { %v1378_v16 = vadd.f32 %v1374_v7, %v1322_v3  ;;  %v1391_v55 = vadd.f32 %v1386_v44, %v1335_v45  ;;  %v1416_v3 = vmul.f32 %v1414_v43, %v3344_v8 }
 0x24d   : > { %1884 = vrot.lane.b32.xlu1 %v1879_v49, %s2521_s30  ;;  %1896 = vrot.lane.b32.xlu0 %v1892_v4, %s2522_s20  ;;  %s2238_s30 = sld [smem:[#allocation7 + $0x1b]]  ;;  %v1548_v49 = vmul.f32 %v1547_v15, %v3435_v19  ;;  %v1553_v4 = vstv %s3684_s4  ;;  %p2440_p8 = pnand %p2439_p5, %p3816_p2 }
 0x24e   : > { %v1412_v62 = vadd.f32 %v1410_v46, %v1378_v16  ;;  %v1417_v58 = vadd.f32 %v1415_v34, %v1391_v55  ;;  %s2523_s4 = smov [#allocation10]  }
 0x24f   : > { %v1388_v59 = vpop.permute.xlu1 %1387  ;;  %v1426_v54 = vpop.permute.xlu0 %1425  ;;  %p2441_p10 = pneg %p2440_p8 }
 0x250   : > { %v1392_v25 = vadd.f32 %v1388_v59, %v1336_v31  ;;  %v1431_v28 = vadd.f32 %v1426_v54, %v1399_v41  ;;  %v1554_v59 = vmul.f32 %v1553_v4, %v3435_v19 }
 0x251   : > { %1898 = vrot.lane.b32.xlu1 %v1893_v48, %s2522_s20  ;;  %1910 = vrot.lane.b32.xlu0 %v1906_v20, %s2522_s20 }
 0x252   : > { %v1418_v47 = vadd.f32 %v1416_v3, %v1392_v25  ;;  %v1555_v3 = vmul.f32 %v1553_v4, %v3448_v36 }
 0x253   : > { %v1428_v45 = vpop.permute.xlu1 %1427  ;;  %v1440_v32 = vpop.permute.xlu0 %1439  ;;  %v1535_v63 = vstv %s2238_s30 }
 0x254   : > { %v1432_v5 = vadd.f32 %v1428_v45, %v1400_v53  ;;  %v1445_v12 = vadd.f32 %v1440_v32, %v1405_v26  ;;  %v1536_v9 = vmul.f32 %v1535_v63, %v3435_v19  ;;  %v1541_v53 = vstv %s2239_s7  ;;  %s3745_s7 = scalar_lea.hbm %s3796_s3, %s2302_s9 }
 0x255   : > { %1912 = vrot.lane.b32.xlu1 %v1907_v11, %s2522_s20  ;;  %1924 = vrot.lane.b32.xlu0 %v1920_v38, %s2522_s20  ;;  %v1537_v60 = vmul.f32 %v1535_v63, %v3448_v36  ;;  %v1542_v61 = vmul.f32 %v1541_v53, %v3435_v19  ;;  %v1543_v44 = vmul.f32 %v1541_v53, %v3448_v36  ;;  %v1685_v53 = vstv %s3695_s17 }
 0x257   : > { %v1442_v8 = vpop.permute.xlu1 %1441  ;;  %v1454_v31 = vpop.permute.xlu0 %1453 }
 0x258   : > { %v1446_v18 = vadd.f32 %v1442_v8, %v1406_v22  ;;  %v1459_v57 = vadd.f32 %v1454_v31, %v1411_v6 }
 0x259   : > { %1926 = vrot.lane.b32.xlu1 %v1921_v39, %s2522_s20  ;;  %1938 = vrot.lane.b32.xlu0 %v1934_v40, %s2522_s20 }
 0x25b   : > { %v1456_v41 = vpop.permute.xlu1 %1455  ;;  %v1468_v24 = vpop.permute.xlu0 %1467 }
 0x25c   : > { %v1460_v17 = vadd.f32 %v1456_v41, %v1412_v62  ;;  %v1473_v29 = vadd.f32 %v1468_v24, %v1417_v58  ;;  %v1549_v58 = vmul.f32 %v1547_v15, %v3448_v36  ;;  %v1686_v15 = vmul.f32 %v1685_v53, %v3523_v2 }
 0x25d   : > { %1940 = vrot.lane.b32.xlu1 %v1935_v42, %s2522_s20  ;;  %s2250_s20 = sld [smem:[#allocation7 + $0x1e]] }
 0x25f   : > { %v1470_v50 = vpop.permute.xlu1 %1469  ;;  %v1482_v51 = vpop.permute.xlu0 %1481 }
 0x260   : > { %v1474_v33 = vadd.f32 %v1470_v50, %v1418_v47  ;;  %v1487_v10 = vadd.f32 %v1482_v51, %v1431_v28 }
 0x262   : > { %v1538_v26 = vadd.f32 %v1536_v9, %v1487_v10 }
 0x263   : > { %v1484_v27 = vpop.permute.xlu1 %1483  ;;  %v1496_v37 = vpop.permute.xlu0 %1495 }
 0x264   : > { %v1488_v35 = vadd.f32 %v1484_v27, %v1432_v5  ;;  %v1501_v52 = vadd.f32 %v1496_v37, %v1445_v12 }
 0x266   : > { %v1539_v0 = vadd.f32 %v1537_v60, %v1488_v35  ;;  %v1544_v21 = vadd.f32 %v1542_v61, %v1501_v52 }
 0x267   : > { %v1498_v43 = vpop.permute.xlu1 %1497  ;;  %v1510_v22 = vpop.permute.xlu0 %1509 }
 0x268   : > { %v1502_v6 = vadd.f32 %v1498_v43, %v1446_v18  ;;  %v1515_v7 = vadd.f32 %v1510_v22, %v1459_v57  ;;  %v1673_v18 = vstv %s2250_s20  ;;  %s2442_s20 = sshll.u32 %s2523_s4, 4  ;;  %s2443_s20 = int_to_ptr.vmem [resolvable:$false] %s2442_s20 }
 0x269   : > { %v1674_v42 = vmul.f32 %v1673_v18, %v3523_v2  ;;  %v1675_v10 = vmul.f32 %v1673_v18, %v3536_v23  ;;  %p2445_p4 = scmp.lt.s32.totalorder %s3747_s23, %s2443_s20 }
 0x26a   : > { %v1545_v13 = vadd.f32 %v1543_v44, %v1502_v6  ;;  %v1550_v16 = vadd.f32 %v1548_v49, %v1515_v7  ;;  %v1687_v49 = vmul.f32 %v1685_v53, %v3536_v23 }
 0x26b   : > { %v1512_v55 = vpop.permute.xlu1 %1511  ;;  %v1524_v46 = vpop.permute.xlu0 %1523 }
 0x26c   : > { %v1516_v34 = vadd.f32 %v1512_v55, %v1460_v17  ;;  %v1529_v62 = vadd.f32 %v1524_v46, %v1473_v29  ;;  %v1679_v17 = vstv %s2251_s11  ;;  %s2444_s11 = scalar_lea.vmem %s2443_s20, 1024 }
 0x26d   : > { %v1680_v9 = vmul.f32 %v1679_v17, %v3523_v2  ;;  %v1681_v61 = vmul.f32 %v1679_v17, %v3536_v23  ;;  %p2446_p12 = scmp.lt.s32.totalorder %s2444_s11, %s2438_s28 }
 0x26e   : > { %v1551_v54 = vadd.f32 %v1549_v58, %v1516_v34  ;;  %v1556_v48 = vadd.f32 %v1554_v59, %v1529_v62 }
 0x26f   : > { %v1526_v20 = vpop.permute.xlu1 %1525  ;;  %v1565_v25 = vpop.permute.xlu0 %1564  ;;  %p2447_p0 = por %p2446_p12, %p2445_p4 }
 0x270   : > { %v1530_v28 = vadd.f32 %v1526_v20, %v1474_v33  ;;  %v1570_v1 = vadd.f32 %v1565_v25, %v1538_v26 }
 0x271   : > { %p2448_p7 = pnand %p2447_p0, %p2441_p10 }
 0x272   : > { %v1557_v47 = vadd.f32 %v1555_v3, %v1530_v28 }
 0x273   : > { %v1567_v45 = vpop.permute.xlu1 %1566  ;;  %v1579_v32 = vpop.permute.xlu0 %1578 }
 0x274   : > { %v1571_v11 = vadd.f32 %v1567_v45, %v1539_v0  ;;  %v1584_v38 = vadd.f32 %v1579_v32, %v1544_v21  ;;  %v1691_v0 = vstv %s3698_s10 }
 0x275   : > { %v1692_v4 = vmul.f32 %v1691_v0, %v3523_v2  ;;  %v1693_v62 = vmul.f32 %v1691_v0, %v3536_v23  ;;  %v1817_v23 = vstv %s2263_s22 }
 0x277   : > { %v1581_v5 = vpop.permute.xlu1 %1580  ;;  %v1593_v12 = vpop.permute.xlu0 %1592 }
 0x278   : > { %v1585_v30 = vadd.f32 %v1581_v5, %v1545_v13  ;;  %v1598_v8 = vadd.f32 %v1593_v12, %v1550_v16 }
 0x27b   : > { %v1595_v19 = vpop.permute.xlu1 %1594  ;;  %v1607_v31 = vpop.permute.xlu0 %1606 }
 0x27c   : > { %v1599_v39 = vadd.f32 %v1595_v19, %v1551_v54  ;;  %v1612_v40 = vadd.f32 %v1607_v31, %v1556_v48 }
 0x27f   : > { %v1609_v36 = vpop.permute.xlu1 %1608  ;;  %v1621_v57 = vpop.permute.xlu0 %1620 }
 0x280   : > { %v1613_v41 = vadd.f32 %v1609_v36, %v1557_v47  ;;  %v1626_v24 = vadd.f32 %v1621_v57, %v1570_v1  ;;  %v1811_v1 = vstv %s2262_s19 }
 0x281   : > { %v1812_v32 = vmul.f32 %v1811_v1, %v3603_v56  ;;  %v1813_v31 = vmul.f32 %v1811_v1, %v3616_v14 }
 0x282   : > { %v1676_v29 = vadd.f32 %v1674_v42, %v1626_v24 }
 0x283   : > { %v1623_v63 = vpop.permute.xlu1 %1622  ;;  %v1635_v50 = vpop.permute.xlu0 %1634 }
 0x284   : > { %v1627_v51 = vadd.f32 %v1623_v63, %v1571_v11  ;;  %v1640_v33 = vadd.f32 %v1635_v50, %v1584_v38  ;;  %v1819_v63 = vmul.f32 %v1817_v23, %v3616_v14 }
 0x286   : > { %v1677_v26 = vadd.f32 %v1675_v10, %v1627_v51  ;;  %v1682_v27 = vadd.f32 %v1680_v9, %v1640_v33  ;;  %v1829_v51 = vstv %s3712_s29 }
 0x287   : > { %v1637_v37 = vpop.permute.xlu1 %1636  ;;  %v1649_v35 = vpop.permute.xlu0 %1648 }
 0x288   : > { %v1641_v52 = vadd.f32 %v1637_v37, %v1585_v30  ;;  %v1654_v60 = vadd.f32 %v1649_v35, %v1598_v8 }
 0x28a   : > { %v1683_v21 = vadd.f32 %v1681_v61, %v1641_v52  ;;  %v1688_v43 = vadd.f32 %v1686_v15, %v1654_v60  ;;  %v1830_v60 = vmul.f32 %v1829_v51, %v3603_v56 }
 0x28b   : > { %v1651_v22 = vpop.permute.xlu1 %1650  ;;  %v1663_v6 = vpop.permute.xlu0 %1662 }
 0x28c   : > { %v1655_v7 = vadd.f32 %v1651_v22, %v1599_v39  ;;  %v1668_v44 = vadd.f32 %v1663_v6, %v1612_v40  ;;  %v1818_v39 = vmul.f32 %v1817_v23, %v3603_v56  ;;  %v1823_v40 = vstv %s3709_s27 }
 0x28d   : > { %v1824_v50 = vmul.f32 %v1823_v40, %v3603_v56  ;;  %v1825_v52 = vmul.f32 %v1823_v40, %v3616_v14  ;;  %v1831_v6 = vmul.f32 %v1829_v51, %v3616_v14 }
 0x28e   : > { %v1689_v13 = vadd.f32 %v1687_v49, %v1655_v7  ;;  %v1694_v16 = vadd.f32 %v1692_v4, %v1668_v44 }
 0x28f   : > { %v1665_v55 = vpop.permute.xlu1 %1664  ;;  %v1703_v46 = vpop.permute.xlu0 %1702 }
 0x290   : > { %v1669_v34 = vadd.f32 %v1665_v55, %v1613_v41  ;;  %v1708_v2 = vadd.f32 %v1703_v46, %v1676_v29 }
 0x292   : > { %v1695_v58 = vadd.f32 %v1693_v62, %v1669_v34 }
 0x293   : > { %v1705_v59 = vpop.permute.xlu1 %1704  ;;  %v1717_v54 = vpop.permute.xlu0 %1716 }
 0x294   : > { %v1709_v11 = vadd.f32 %v1705_v59, %v1677_v26  ;;  %v1722_v38 = vadd.f32 %v1717_v54, %v1682_v27 }
 0x297   : > { %v1719_v48 = vpop.permute.xlu1 %1718  ;;  %v1731_v20 = vpop.permute.xlu0 %1730 }
 0x298   : > { %v1723_v18 = vadd.f32 %v1719_v48, %v1683_v21  ;;  %v1736_v36 = vadd.f32 %v1731_v20, %v1688_v43 }
 0x29b   : > { %v1733_v25 = vpop.permute.xlu1 %1732  ;;  %v1745_v28 = vpop.permute.xlu0 %1744 }
 0x29c   : > { %v1737_v33 = vadd.f32 %v1733_v25, %v1689_v13  ;;  %v1750_v10 = vadd.f32 %v1745_v28, %v1694_v16 }
 0x29f   : > { %v1747_v3 = vpop.permute.xlu1 %1746  ;;  %v1759_v47 = vpop.permute.xlu0 %1758 }
 0x2a0   : > { %v1764_v45 = vadd.f32 %v1759_v47, %v1708_v2  ;;  %v1751_v61 = vadd.f32 %v1747_v3, %v1695_v58 }
 0x2a2   : > { %v1814_v5 = vadd.f32 %v1812_v32, %v1764_v45 }
 0x2a3   : > { %v1761_v12 = vpop.permute.xlu1 %1760  ;;  %v1773_v30 = vpop.permute.xlu0 %1772 }
 0x2a4   : > { %v1765_v8 = vadd.f32 %v1761_v12, %v1709_v11  ;;  %v1778_v19 = vadd.f32 %v1773_v30, %v1722_v38 }
 0x2a6   : > { %v1815_v57 = vadd.f32 %v1813_v31, %v1765_v8  ;;  %v1820_v41 = vadd.f32 %v1818_v39, %v1778_v19 }
 0x2a7   : > { %v1775_v24 = vpop.permute.xlu1 %1774  ;;  %v1787_v42 = vpop.permute.xlu0 %1786 }
 0x2a8   : > { %v1779_v17 = vadd.f32 %v1775_v24, %v1723_v18  ;;  %v1792_v29 = vadd.f32 %v1787_v42, %v1736_v36 }
 0x2aa   : > { %v1821_v9 = vadd.f32 %v1819_v63, %v1779_v17  ;;  %v1826_v53 = vadd.f32 %v1824_v50, %v1792_v29 }
 0x2ab   : > { %v1789_v26 = vpop.permute.xlu1 %1788  ;;  %v1801_v27 = vpop.permute.xlu0 %1800 }
 0x2ac   : > { %v1793_v37 = vadd.f32 %v1789_v26, %v1737_v33  ;;  %v1806_v35 = vadd.f32 %v1801_v27, %v1750_v10 }
 0x2ae   : > { %v1827_v15 = vadd.f32 %v1825_v52, %v1793_v37  ;;  %v1832_v0 = vadd.f32 %v1830_v60, %v1806_v35 }
 0x2af   : > { %v1803_v21 = vpop.permute.xlu1 %1802  ;;  %v1841_v43 = vpop.permute.xlu0 %1840 }
 0x2b0   : > { %v1807_v22 = vadd.f32 %v1803_v21, %v1751_v61  ;;  %v1846_v46 = vadd.f32 %v1841_v43, %v1814_v5 }
 0x2b2   : > { %v1833_v7 = vadd.f32 %v1831_v6, %v1807_v22 }
 0x2b3   : > { %v1843_v44 = vpop.permute.xlu1 %1842  ;;  %v1855_v49 = vpop.permute.xlu0 %1854 }
 0x2b4   : > { %v1847_v58 = vadd.f32 %v1843_v44, %v1815_v57  ;;  %v1860_v59 = vadd.f32 %v1855_v49, %v1820_v41 }
 0x2b7   : > { %v1857_v4 = vpop.permute.xlu1 %1856  ;;  %v1869_v13 = vpop.permute.xlu0 %1868 }
 0x2b8   : > { %v1861_v1 = vadd.f32 %v1857_v4, %v1821_v9  ;;  %v1874_v2 = vadd.f32 %v1869_v13, %v1826_v53 }
 0x2bb   : > { %v1871_v16 = vpop.permute.xlu1 %1870  ;;  %v1883_v55 = vpop.permute.xlu0 %1882 }
 0x2bc   : > { %v1875_v30 = vadd.f32 %v1871_v16, %v1827_v15  ;;  %v1888_v8 = vadd.f32 %v1883_v55, %v1832_v0 }
 0x2bf   : > { %v1885_v34 = vpop.permute.xlu1 %1884  ;;  %v1897_v62 = vpop.permute.xlu0 %1896 }
 0x2c0   : > { %v1902_v56 = vadd.f32 %v1897_v62, %v1846_v46  ;;  %v1889_v17 = vadd.f32 %v1885_v34, %v1833_v7 }
 0x2c2   : > { %v1946_v54 = vmax.f32 %v1902_v56, 0.0 }
 0x2c3   : > { %v1899_v48 = vpop.permute.xlu1 %1898  ;;  %v1911_v20 = vpop.permute.xlu0 %1910 }
 0x2c4   : > { %v1948_v25 = vmin.f32 %v1946_v54, 1.0  ;;  %v1903_v28 = vadd.f32 %v1899_v48, %v1847_v58  ;;  %v1916_v14 = vadd.f32 %v1911_v20, %v1860_v59 }
 0x2c6   : > { %v2294_v3 = vpack.c.bf16 %v1948_v25, %v1948_v25  ;;  %v1947_v47 = vmax.f32 %v1903_v28, 0.0  ;;  %v1961_v45 = vmax.f32 %v1916_v14, 0.0 }
 0x2c7   : > { %v1913_v32 = vpop.permute.xlu1 %1912  ;;  %v1925_v23 = vpop.permute.xlu0 %1924 }
 0x2c8   : > { %1959 = vst.msk [vmem:[%s3724_s8] sm:$0xf] %vm1958_vm3, %v2294_v3  ;;  %v1949_v11 = vmin.f32 %v1947_v47, 1.0  ;;  %v1963_v38 = vmin.f32 %v1961_v45, 1.0  ;;  %v1917_v5 = vadd.f32 %v1913_v32, %v1861_v1  ;;  %v1930_v12 = vadd.f32 %v1925_v23, %v1874_v2 }
 0x2ca   : > { %v2295_v19 = vpack.c.bf16 %v1949_v11, %v1949_v11  ;;  %v2296_v31 = vpack.c.bf16 %v1963_v38, %v1963_v38  ;;  %v1962_v39 = vmax.f32 %v1917_v5, 0.0  ;;  %v1976_v40 = vmax.f32 %v1930_v12, 0.0 }
 0x2cb   : > { %v1927_v18 = vpop.permute.xlu1 %1926  ;;  %v1939_v36 = vpop.permute.xlu0 %1938 }
 0x2cc   : > { %1960 = vst.msk [vmem:[%s3724_s8 + $0x4] sm:$0xf] %vm1958_vm3, %v2295_v19  ;;  %2278 = vst.msk [vmem:[%s3724_s8 + $0x8] sm:$0xf] %vm1958_vm3, %v2296_v31  ;;  %v1964_v57 = vmin.f32 %v1962_v39, 1.0  ;;  %v1978_v41 = vmin.f32 %v1976_v40, 1.0  ;;  %v1931_v24 = vadd.f32 %v1927_v18, %v1875_v30  ;;  %v1944_v42 = vadd.f32 %v1939_v36, %v1888_v8 }
 0x2ce   : > { %v2297_v29 = vpack.c.bf16 %v1964_v57, %v1964_v57  ;;  %v2298_v63 = vpack.c.bf16 %v1978_v41, %v1978_v41  ;;  %v1977_v50 = vmax.f32 %v1931_v24, 0.0  ;;  %v1991_v51 = vmax.f32 %v1944_v42, 0.0 }
 0x2cf   : > { %v1941_v33 = vpop.permute.xlu1 %1940 }
 0x2d0   : > { %2279 = vst.msk [vmem:[%s3724_s8 + $0xc] sm:$0xf] %vm1958_vm3, %v2297_v29  ;;  %2282 = vst.msk [vmem:[%s3724_s8 + $0x10] sm:$0xf] %vm1958_vm3, %v2298_v63  ;;  %v1979_v10 = vmin.f32 %v1977_v50, 1.0  ;;  %v1993_v9 = vmin.f32 %v1991_v51, 1.0  ;;  %v1945_v53 = vadd.f32 %v1941_v33, %v1889_v17 }
 0x2d2   : > { %v2299_v26 = vpack.c.bf16 %v1979_v10, %v1979_v10  ;;  %v2300_v27 = vpack.c.bf16 %v1993_v9, %v1993_v9  ;;  %v1992_v37 = vmax.f32 %v1945_v53, 0.0 }
 0x2d4   : > { %2283 = vst.msk [vmem:[%s3724_s8 + $0x14] sm:$0xf] %vm1958_vm3, %v2299_v26  ;;  %2286 = vst.msk [vmem:[%s3724_s8 + $0x18] sm:$0xf] %vm1958_vm3, %v2300_v27  ;;  %v1994_v35 = vmin.f32 %v1992_v37, 1.0 }
 0x2d6   : > { %v2301_v52 = vpack.c.bf16 %v1994_v35, %v1994_v35 }
 0x2d8   : > { %2287 = vst.msk [vmem:[%s3724_s8 + $0x1c] sm:$0xf] %vm1958_vm3, %v2301_v52 }
 0x2d9   : > { %2451 = shalt.err (!%p2448_p7)
}
 0x2da   : > { %s2452_s17 = scalar_lea.hbm %s3745_s7, 512  ;;  %s2456_s22 = scalar_lea.hbm %s3796_s3, 1024 }
 0x2db   : > { %p2453_p11 = scmp.ne.s32.totalorder %s3745_s7, %s2452_s17  ;;  %p2457_p3 = scmp.lt.u32.totalorder %s3745_s7, %s3796_s3 }
 0x2dc   : > { %p2458_p9 = scmp.lt.u32.totalorder %s2456_s22, %s2452_s17  ;;  %p2460_p5 = scmp.lt.u32.totalorder %s2452_s17, %s3745_s7 }
 0x2dd   : > { %p2454_p13 = pnand %p2453_p11, %p3816_p2 }
 0x2de   : > { %p2459_p1 = por %p2458_p9, %p2457_p3 }
 0x2df   : > { %p2455_p6 = pneg %p2454_p13 }
 0x2e0   : > { %p2461_p8 = por %p2460_p5, %p2459_p1 }
 0x2e2   : > { %p2462_p10 = pnand %p2461_p8, %p2455_p6 }
 0x2e4   : > { %2465 = shalt.err (!%p2462_p10)
}
 0x2e5   : > { %s2524_s6 = smov 64   ;;  %s2525_s8 = smov 4  }
 0x2e6   : > { %2313 = dma.vmem_to_hbm [thread:$0]  (%p3816_p2), %s3747_s23, 512, %s3745_s7, %s2007_s16, %s2524_s6, %s2524_s6, %s2525_s8  }
 0x2e7 PF: > { %s2035_s9 = sand.u32 1, %s2500_s12   ;;  %p3817_p4 = scmp.ne.s32.totalorder %s3805_s25, 0 }
 0x2e8   : > { %p3818_p12 = scmp.ge.s32.totalorder %s2512_s15, 2  ;;  %s2036_s26 = scalar_lea.sflag [#allocation5], %s2035_s9 }
 0x2ea   : > { %p2327_p0 = pnand %p3818_p12, %p3817_p4 }
 0x2ec   : > { %2495 = dma.done.wait (!%p2327_p0), %s2036_s26, 512  }
 0x2ed   : > { %2497 = vsyncadd (!%p2327_p0), %s2036_s26, 4294966784  ;;  %p18_p7 = scmp.ge.s32.totalorder %s2571_s18, 4   ;;  %s3819_s12 = smov %s2504_s13 }
 0x2ee   : > { %s3820_s13 = smov %s2508_s14  ;;  %s3821_s14 = smov %s2583_s21 }
 0x2ef   : > { %s3822_s15 = smov %s2571_s18  ;;  %20 = sbr.rel (!%p18_p7) target bundleno = 7 (0x7), region = 92 }
 0x2f6   :  { %2041 = vsyncpa [#allocation4], 1 }
 0x2f7   :  { %2043 = vsyncpa [#allocation4 + $0x1], 1 }
 0x2f8   :  { %2044 = vsyncpa [#allocation5], 1 }
 0x2f9   :  { %2046 = vsyncpa [#allocation5 + $0x1], 1 }
 0x2fa   :  { %2047 = vsyncpa [#allocation6], 1 }
 0x2fb   :  { %2049 = vsyncpa [#allocation6 + $0x1], 1 }
 0x2fc   :  { %2050 = vsyncpa [#allocation9], 1 }

</bundles_post_ra>
